<compile_context>
chip_gen: v7x
topology: tpu7x:2x2x1
jax: 0.10.0
libtpu: 0.0.40
codegen_flags: <defaults>
</compile_context>

<pallas_src>
import jax
import jax.numpy as jnp
from jax import lax
from jax.experimental import pallas as pl
from jax.experimental.pallas import tpu as pltpu


_VMEM_LIMIT = 32 * 1024 * 1024          # bytes; safe scoped limit on v5e/v6e/v7x
_COLS_BUF_BYTES = 4 * 1024 * 1024       # per-buffer budget for the cols block


def _round_up(n, m):
    return ((n + m - 1) // m) * m


def _cdiv(a, b):
    return (a + b - 1) // b


def _pick_m_tile(M, kp):
    """Lane tile: multiple of 128, >=2 grid steps whenever M > 128 (v7x has
    2 TCs), and small enough that the double-buffered (8, Kp, TM) bf16 cols
    block stays within the VMEM budget."""
    vmem_cap = max(128, (_COLS_BUF_BYTES // (8 * kp * 2)) // 128 * 128)
    two_step = _round_up(_cdiv(M, 2), 128)
    return max(128, min(2048, vmem_cap, two_step))


# ---------------------------------------------------------------------------
# Pallas kernels
# ---------------------------------------------------------------------------

def _conv_pool_kernel(w_ref, b_ref, cols_ref, o_ref):
    # Fused Conv3d + bias + ReLU + MaxPool3d(2,2,2):
    #   cols_ref is (8, Kp, TM): one im2col slab per pooling offset, pooled
    #   spatial index on lanes.  8 MXU GEMMs -> running max -> bias -> ReLU.
    # (ReLU/max commute; bias is offset-invariant so it is added after max.)
    w = w_ref[...]
    m = jnp.dot(w, cols_ref[0], preferred_element_type=jnp.float32)
    for o in range(1, 8):
        m = jnp.maximum(m, jnp.dot(w, cols_ref[o],
                                   preferred_element_type=jnp.float32))
    o_ref[...] = jnp.maximum(m + b_ref[...], 0.0).astype(o_ref.dtype)


def _attn_kernel(wa_ref, b_ref, xp_ref, o_ref):
    # Fused per-frame SpatialAttention: 3x3 conv logit built in-kernel from
    # the halo-padded tile (no im2col cols input), exact sigmoid, multiply.
    C = o_ref.shape[0]
    H2, W2 = o_ref.shape[2], o_ref.shape[3]
    xp = xp_ref[...].astype(jnp.float32)[:, 0]          # (C, H2+2, W2+2)
    logit = jnp.zeros((H2, W2), jnp.float32)
    for dh in range(3):
        for dw in range(3):
            t = dh * 3 + dw
            slab = xp[:, dh:dh + H2, dw:dw + W2]         # (C, H2, W2)
            logit = logit + jnp.sum(slab * wa_ref[t], axis=0)
    attn = 1.0 / (1.0 + jnp.exp(-(logit + b_ref[...])))  # exact sigmoid (f32)
    x_c = xp[:, 1:1 + H2, 1:1 + W2]                      # (C, H2, W2)
    res = (x_c * attn[None, :, :]).astype(o_ref.dtype)
    o_ref[...] = res[:, None, :, :]


# ---------------------------------------------------------------------------
# Pallas wrappers
# ---------------------------------------------------------------------------

def conv3d_relu_pool(x, w, b):
    """Fused Conv3d(k=3, stride=(1,2,2), pad=1) + bias + ReLU + MaxPool3d(2).

    x: (Cin, D, H, W); w: (Cout, Cin, 3, 3, 3); b: (Cout,).
    Returns the POOLED activation (Cout, D2, H2, W2) in bf16.
    """
    Cin = x.shape[0]
    Cout = w.shape[0]
    K = Cin * 27

    # One fused XLA op for im2col (channel-major, then kd,kh,kw — matches the
    # PyTorch weight.reshape(Cout, -1) ordering).
    # TODO(synk): move tap extraction in-kernel (halo blocks + pl.ds) to avoid
    #   materializing the K-fold inflated patches tensor in HBM.
    p = lax.conv_general_dilated_patches(
        x[None].astype(jnp.bfloat16),
        filter_shape=(3, 3, 3),
        window_strides=(1, 2, 2),
        padding=((1, 1), (1, 1), (1, 1)))
    _, _, D1, H1, W1 = p.shape
    D2, H2, W2 = D1 // 2, H1 // 2, W1 // 2
    M2 = D2 * H2 * W2

    # Regroup so the 8 MaxPool3d offsets form a leading axis and the pooled
    # spatial index is lane-dense -> pooling fuses into the GEMM epilogue.
    p = p[0, :, :2 * D2, :2 * H2, :2 * W2]
    p = p.reshape(K, D2, 2, H2, 2, W2, 2)
    p = p.transpose(2, 4, 6, 0, 1, 3, 5).reshape(8, K, M2)

    Kp = _round_up(K, 16)
    TM = _pick_m_tile(M2, Kp)
    M2p = _round_up(M2, TM)

    cols8 = jnp.pad(p, ((0, 0), (0, Kp - K), (0, M2p - M2)))
    wp = jnp.pad(w.reshape(Cout, K).astype(jnp.bfloat16), ((0, 0), (0, Kp - K)))
    b2 = b.reshape(Cout, 1).astype(jnp.float32)

    out = pl.pallas_call(
        _conv_pool_kernel,
        grid=(M2p // TM,),
        in_specs=[
            pl.BlockSpec((Cout, Kp), lambda i: (0, 0)),
            pl.BlockSpec((Cout, 1), lambda i: (0, 0)),
            pl.BlockSpec((8, Kp, TM), lambda i: (0, 0, i)),
        ],
        out_specs=pl.BlockSpec((Cout, TM), lambda i: (0, i)),
        out_shape=jax.ShapeDtypeStruct((Cout, M2p), jnp.bfloat16),
        compiler_params=pltpu.CompilerParams(
            dimension_semantics=("parallel",),
            vmem_limit_bytes=_VMEM_LIMIT),
    )(wp, b2, cols8)
    return out[:, :M2].reshape(Cout, D2, H2, W2)


def spatial_attention(y, wa, ba):
    """Fused SpatialAttention on pooled features y: (C, D2, H2, W2) bf16.

    Matches PyTorch: permute -> conv2d(C->1, k3, p1) -> sigmoid -> multiply
    -> permute back.  Both permutes are layout no-ops here; the 3x3 conv
    logit is built in-kernel from the halo-padded frame (no cols input).
    """
    C, D2, H2, W2 = y.shape
    ypad = jnp.pad(y, ((0, 0), (0, 0), (1, 1), (1, 1)))           # zero halo
    # (9, C, 1, 1): per-tap channel vectors; trailing singleton dims broadcast
    # cheaply against the (C, H2, W2) slabs in the kernel.
    wa9 = jnp.transpose(wa.reshape(C, 9), (1, 0)).reshape(9, C, 1, 1)
    wa9 = wa9.astype(jnp.float32)
    b2 = ba.reshape(1, 1).astype(jnp.float32)

    out = pl.pallas_call(
        _attn_kernel,
        grid=(D2,),
        in_specs=[
            pl.BlockSpec((9, C, 1, 1), lambda d: (0, 0, 0, 0)),
            pl.BlockSpec((1, 1), lambda d: (0, 0)),
            pl.BlockSpec((C, 1, H2 + 2, W2 + 2), lambda d: (0, d, 0, 0)),
        ],
        out_specs=pl.BlockSpec((C, 1, H2, W2), lambda d: (0, d, 0, 0)),
        out_shape=jax.ShapeDtypeStruct((C, D2, H2, W2), jnp.bfloat16),
        compiler_params=pltpu.CompilerParams(
            dimension_semantics=("parallel",),
            vmem_limit_bytes=_VMEM_LIMIT),
    )(wa9, b2, ypad)
    return out


# ---------------------------------------------------------------------------
# Model: parameters + forward
# ---------------------------------------------------------------------------

def flat_feature_count(input_shape):
    D, H, W = input_shape
    D1, H1, W1 = D, (H - 1) // 2 + 1, (W - 1) // 2 + 1          # conv3d_1
    D2, H2, W2 = D1 // 2, H1 // 2, W1 // 2                      # pool
    D3, H3, W3 = D2, (H2 - 1) // 2 + 1, (W2 - 1) // 2 + 1       # conv3d_2
    D4, H4, W4 = D3 // 2, H3 // 2, W3 // 2                      # pool
    return D4 * H4 * W4


def init_params(key, input_shape):
    F = flat_feature_count(input_shape)
    ks = jax.random.split(key, 8)
    return {
        "conv3d_1_w": 0.1 * jax.random.normal(ks[0], (16, 1, 3, 3, 3), jnp.float32),
        "conv3d_1_b": 0.1 * jax.random.normal(ks[1], (16,), jnp.float32),
        "attn_w":     0.1 * jax.random.normal(ks[2], (1, 16, 3, 3), jnp.float32),
        "attn_b":     0.1 * jax.random.normal(ks[3], (1,), jnp.float32),
        "conv3d_2_w": 0.1 * jax.random.normal(ks[4], (32, 16, 3, 3, 3), jnp.float32),
        "conv3d_2_b": 0.1 * jax.random.normal(ks[5], (32,), jnp.float32),
        "fc_w":       0.1 * jax.random.normal(ks[6], (1, F), jnp.float32),
        "fc_b":       0.1 * jax.random.normal(ks[7], (1,), jnp.float32),
    }


def attention_3d_cnn_forward(x, params):
    """x: (1, D, H, W) float32 (channel-first, unbatched — as the PyTorch module requires)."""
    # conv3d_1 + ReLU + MaxPool3d fused -> (16, D2, H2, W2) bf16
    y = conv3d_relu_pool(x, params["conv3d_1_w"], params["conv3d_1_b"])

    # SpatialAttention (fused; both permutes are layout no-ops)
    y = spatial_attention(y, params["attn_w"], params["attn_b"])

    # conv3d_2 + ReLU + MaxPool3d fused -> (32, D4, H4, W4) bf16
    y = conv3d_relu_pool(y, params["conv3d_2_w"], params["conv3d_2_b"])

    # flatten per "channel-batch" (matches x.view(x.size(0), -1)) + fc.
    # fc has M=1: a padded Pallas GEMM is pure overhead -> plain f32 jnp.
    flat = y.reshape(y.shape[0], -1).astype(jnp.float32)            # (32, F)
    out = flat @ params["fc_w"].astype(jnp.float32).T + params["fc_b"].astype(jnp.float32)
    return out                                                      # (32, 1)


if __name__ == "__main__":
    D, H, W = 8, 32, 32                     # small input_shape = (depth, height, width)
    key = jax.random.PRNGKey(0)
    kx, kp = jax.random.split(key)
    x = jax.random.normal(kx, (1, D, H, W), jnp.float32)   # (C=1, D, H, W) unbatched
    params = init_params(kp, (D, H, W))

    fwd = jax.jit(attention_3d_cnn_forward)
    out = fwd(x, params)
    out = jax.block_until_ready(out)

    assert out.shape == (32, 1), out.shape
    assert bool(jnp.all(jnp.isfinite(out)))
    print("KERNEL_OK")
</pallas_src>

<mosaic_0001>
module attributes {stable_mosaic.version = 11 : i64} {
  func.func @_conv_pool_kernel(%arg0: i32, %arg1: memref<16x32xbf16, #tpu.memory_space<vmem>>, %arg2: memref<16x1xf32, #tpu.memory_space<vmem>>, %arg3: memref<8x32x128xbf16, #tpu.memory_space<vmem>>, %arg4: memref<16x128xbf16, #tpu.memory_space<vmem>>) attributes {dimension_semantics = [#tpu.dimension_semantics<parallel>], iteration_bounds = array<i64: 2>, scalar_prefetch = 0 : i64, scratch_operands = 0 : i64, tpu.core_type = #tpu.core_type<tc>, window_params = [{pipeline_mode = #tpu.pipeline_mode<synchronous>, transform_indices = @transform_0, window_bounds = array<i64: 16, 32>}, {pipeline_mode = #tpu.pipeline_mode<synchronous>, transform_indices = @transform_1, window_bounds = array<i64: 16, 1>}, {transform_indices = @transform_2, window_bounds = array<i64: 8, 32, 128>}, {transform_indices = @transform_3, window_bounds = array<i64: 16, 128>}]} {
    %c0 = arith.constant 0 : index
    %c0_0 = arith.constant 0 : index
    %0 = vector.load %arg1[%c0, %c0_0] : memref<16x32xbf16, #tpu.memory_space<vmem>>, vector<16x32xbf16>
    %c0_1 = arith.constant 0 : index
    %c0_2 = arith.constant 0 : index
    %c0_3 = arith.constant 0 : index
    %1 = vector.load %arg3[%c0_1, %c0_2, %c0_3] : memref<8x32x128xbf16, #tpu.memory_space<vmem>>, vector<1x32x128xbf16>
    %2 = vector.shape_cast %1 : vector<1x32x128xbf16> to vector<32x128xbf16>
    %cst = arith.constant dense<0.000000e+00> : vector<16x128xf32>
    %3 = tpu.matmul %0, %2, %cst {dimension_numbers = #tpu.dot_dimension_numbers<[1], [0], [0], [1], [0, 0, 1, 1], [], []>} : vector<16x32xbf16>, vector<32x128xbf16>, vector<16x128xf32> -> vector<16x128xf32>
    %c1 = arith.constant 1 : index
    %c0_4 = arith.constant 0 : index
    %c0_5 = arith.constant 0 : index
    %4 = vector.load %arg3[%c1, %c0_4, %c0_5] : memref<8x32x128xbf16, #tpu.memory_space<vmem>>, vector<1x32x128xbf16>
    %5 = vector.shape_cast %4 : vector<1x32x128xbf16> to vector<32x128xbf16>
    %cst_6 = arith.constant dense<0.000000e+00> : vector<16x128xf32>
    %6 = tpu.matmul %0, %5, %cst_6 {dimension_numbers = #tpu.dot_dimension_numbers<[1], [0], [0], [1], [0, 0, 1, 1], [], []>} : vector<16x32xbf16>, vector<32x128xbf16>, vector<16x128xf32> -> vector<16x128xf32>
    %7 = arith.maximumf %3, %6 : vector<16x128xf32>
    %c2 = arith.constant 2 : index
    %c0_7 = arith.constant 0 : index
    %c0_8 = arith.constant 0 : index
    %8 = vector.load %arg3[%c2, %c0_7, %c0_8] : memref<8x32x128xbf16, #tpu.memory_space<vmem>>, vector<1x32x128xbf16>
    %9 = vector.shape_cast %8 : vector<1x32x128xbf16> to vector<32x128xbf16>
    %cst_9 = arith.constant dense<0.000000e+00> : vector<16x128xf32>
    %10 = tpu.matmul %0, %9, %cst_9 {dimension_numbers = #tpu.dot_dimension_numbers<[1], [0], [0], [1], [0, 0, 1, 1], [], []>} : vector<16x32xbf16>, vector<32x128xbf16>, vector<16x128xf32> -> vector<16x128xf32>
    %11 = arith.maximumf %7, %10 : vector<16x128xf32>
    %c3 = arith.constant 3 : index
    %c0_10 = arith.constant 0 : index
    %c0_11 = arith.constant 0 : index
    %12 = vector.load %arg3[%c3, %c0_10, %c0_11] : memref<8x32x128xbf16, #tpu.memory_space<vmem>>, vector<1x32x128xbf16>
    %13 = vector.shape_cast %12 : vector<1x32x128xbf16> to vector<32x128xbf16>
    %cst_12 = arith.constant dense<0.000000e+00> : vector<16x128xf32>
    %14 = tpu.matmul %0, %13, %cst_12 {dimension_numbers = #tpu.dot_dimension_numbers<[1], [0], [0], [1], [0, 0, 1, 1], [], []>} : vector<16x32xbf16>, vector<32x128xbf16>, vector<16x128xf32> -> vector<16x128xf32>
    %15 = arith.maximumf %11, %14 : vector<16x128xf32>
    %c4 = arith.constant 4 : index
    %c0_13 = arith.constant 0 : index
    %c0_14 = arith.constant 0 : index
    %16 = vector.load %arg3[%c4, %c0_13, %c0_14] : memref<8x32x128xbf16, #tpu.memory_space<vmem>>, vector<1x32x128xbf16>
    %17 = vector.shape_cast %16 : vector<1x32x128xbf16> to vector<32x128xbf16>
    %cst_15 = arith.constant dense<0.000000e+00> : vector<16x128xf32>
    %18 = tpu.matmul %0, %17, %cst_15 {dimension_numbers = #tpu.dot_dimension_numbers<[1], [0], [0], [1], [0, 0, 1, 1], [], []>} : vector<16x32xbf16>, vector<32x128xbf16>, vector<16x128xf32> -> vector<16x128xf32>
    %19 = arith.maximumf %15, %18 : vector<16x128xf32>
    %c5 = arith.constant 5 : index
    %c0_16 = arith.constant 0 : index
    %c0_17 = arith.constant 0 : index
    %20 = vector.load %arg3[%c5, %c0_16, %c0_17] : memref<8x32x128xbf16, #tpu.memory_space<vmem>>, vector<1x32x128xbf16>
    %21 = vector.shape_cast %20 : vector<1x32x128xbf16> to vector<32x128xbf16>
    %cst_18 = arith.constant dense<0.000000e+00> : vector<16x128xf32>
    %22 = tpu.matmul %0, %21, %cst_18 {dimension_numbers = #tpu.dot_dimension_numbers<[1], [0], [0], [1], [0, 0, 1, 1], [], []>} : vector<16x32xbf16>, vector<32x128xbf16>, vector<16x128xf32> -> vector<16x128xf32>
    %23 = arith.maximumf %19, %22 : vector<16x128xf32>
    %c6 = arith.constant 6 : index
    %c0_19 = arith.constant 0 : index
    %c0_20 = arith.constant 0 : index
    %24 = vector.load %arg3[%c6, %c0_19, %c0_20] : memref<8x32x128xbf16, #tpu.memory_space<vmem>>, vector<1x32x128xbf16>
    %25 = vector.shape_cast %24 : vector<1x32x128xbf16> to vector<32x128xbf16>
    %cst_21 = arith.constant dense<0.000000e+00> : vector<16x128xf32>
    %26 = tpu.matmul %0, %25, %cst_21 {dimension_numbers = #tpu.dot_dimension_numbers<[1], [0], [0], [1], [0, 0, 1, 1], [], []>} : vector<16x32xbf16>, vector<32x128xbf16>, vector<16x128xf32> -> vector<16x128xf32>
    %27 = arith.maximumf %23, %26 : vector<16x128xf32>
    %c7 = arith.constant 7 : index
    %c0_22 = arith.constant 0 : index
    %c0_23 = arith.constant 0 : index
    %28 = vector.load %arg3[%c7, %c0_22, %c0_23] : memref<8x32x128xbf16, #tpu.memory_space<vmem>>, vector<1x32x128xbf16>
    %29 = vector.shape_cast %28 : vector<1x32x128xbf16> to vector<32x128xbf16>
    %cst_24 = arith.constant dense<0.000000e+00> : vector<16x128xf32>
    %30 = tpu.matmul %0, %29, %cst_24 {dimension_numbers = #tpu.dot_dimension_numbers<[1], [0], [0], [1], [0, 0, 1, 1], [], []>} : vector<16x32xbf16>, vector<32x128xbf16>, vector<16x128xf32> -> vector<16x128xf32>
    %31 = arith.maximumf %27, %30 : vector<16x128xf32>
    %c0_25 = arith.constant 0 : index
    %c0_26 = arith.constant 0 : index
    %32 = vector.load %arg2[%c0_25, %c0_26] : memref<16x1xf32, #tpu.memory_space<vmem>>, vector<16x1xf32>
    %33 = vector.broadcast %32 : vector<16x1xf32> to vector<16x128xf32>
    %34 = arith.addf %31, %33 : vector<16x128xf32>
    %cst_27 = arith.constant 0.000000e+00 : f32
    %35 = vector.broadcast %cst_27 : f32 to vector<16x128xf32>
    %36 = arith.maximumf %34, %35 : vector<16x128xf32>
    %37 = arith.truncf %36 : vector<16x128xf32> to vector<16x128xbf16>
    %c0_28 = arith.constant 0 : index
    %c0_29 = arith.constant 0 : index
    %38 = vector.load %arg4[%c0_28, %c0_29] : memref<16x128xbf16, #tpu.memory_space<vmem>>, vector<16x128xbf16>
    tpu.vector_store %arg4[%c0_28, %c0_29], %37 {strides = array<i32>} : memref<16x128xbf16, #tpu.memory_space<vmem>>, vector<16x128xbf16>,
    return
  }
  func.func @transform_0(%arg0: i32) -> (i32, i32) {
    %c0_i32 = arith.constant 0 : i32
    %c0_i32_0 = arith.constant 0 : i32
    %c0_i32_1 = arith.constant 0 : i32
    return %c0_i32, %c0_i32_0 : i32, i32
  }
  func.func @transform_1(%arg0: i32) -> (i32, i32) {
    %c0_i32 = arith.constant 0 : i32
    %c0_i32_0 = arith.constant 0 : i32
    %c0_i32_1 = arith.constant 0 : i32
    return %c0_i32, %c0_i32_0 : i32, i32
  }
  func.func @transform_2(%arg0: i32) -> (i32, i32, i32) {
    %c0_i32 = arith.constant 0 : i32
    %c0_i32_0 = arith.constant 0 : i32
    %c0_i32_1 = arith.constant 0 : i32
    return %c0_i32, %c0_i32_0, %arg0 : i32, i32, i32
  }
  func.func @transform_3(%arg0: i32) -> (i32, i32) {
    %c0_i32 = arith.constant 0 : i32
    %c0_i32_0 = arith.constant 0 : i32
    return %c0_i32, %arg0 : i32, i32
  }
}

module attributes {stable_mosaic.version = 11 : i64} {
  func.func @_attn_kernel(%arg0: i32, %arg1: memref<9x16x1x1xf32, #tpu.memory_space<vmem>>, %arg2: memref<1x1xf32, #tpu.memory_space<vmem>>, %arg3: memref<16x1x10x10xbf16, #tpu.memory_space<vmem>>, %arg4: memref<16x1x8x8xbf16, #tpu.memory_space<vmem>>) attributes {dimension_semantics = [#tpu.dimension_semantics<parallel>], iteration_bounds = array<i64: 4>, scalar_prefetch = 0 : i64, scratch_operands = 0 : i64, tpu.core_type = #tpu.core_type<tc>, window_params = [{pipeline_mode = #tpu.pipeline_mode<synchronous>, transform_indices = @transform_0, window_bounds = array<i64: 9, 16, 1, 1>}, {pipeline_mode = #tpu.pipeline_mode<synchronous>, transform_indices = @transform_1, window_bounds = array<i64: 1, 1>}, {transform_indices = @transform_2, window_bounds = array<i64: 16, 1, 10, 10>}, {transform_indices = @transform_3, window_bounds = array<i64: 16, 1, 8, 8>}]} {
    %c0 = arith.constant 0 : index
    %c0_0 = arith.constant 0 : index
    %c0_1 = arith.constant 0 : index
    %c0_2 = arith.constant 0 : index
    %0 = vector.load %arg3[%c0, %c0_0, %c0_1, %c0_2] : memref<16x1x10x10xbf16, #tpu.memory_space<vmem>>, vector<16x1x10x10xbf16>
    %1 = arith.extf %0 : vector<16x1x10x10xbf16> to vector<16x1x10x10xf32>
    %2 = vector.shape_cast %1 : vector<16x1x10x10xf32> to vector<16x10x10xf32>
    %cst = arith.constant 0.000000e+00 : f32
    %3 = vector.broadcast %cst : f32 to vector<8x8xf32>
    %4 = vector.extract_strided_slice %2 {offsets = [0, 0, 0], sizes = [16, 8, 8], strides = [1, 1, 1]} : vector<16x10x10xf32> to vector<16x8x8xf32>
    %c0_3 = arith.constant 0 : index
    %c0_4 = arith.constant 0 : index
    %c0_5 = arith.constant 0 : index
    %c0_6 = arith.constant 0 : index
    %5 = vector.load %arg1[%c0_3, %c0_4, %c0_5, %c0_6] : memref<9x16x1x1xf32, #tpu.memory_space<vmem>>, vector<1x16x1x1xf32>
    %6 = vector.shape_cast %5 : vector<1x16x1x1xf32> to vector<16x1x1xf32>
    %7 = vector.broadcast %6 : vector<16x1x1xf32> to vector<16x8x8xf32>
    %8 = arith.mulf %4, %7 : vector<16x8x8xf32>
    %cst_7 = arith.constant dense<0.000000e+00> : vector<8x8xf32>
    %9 = vector.multi_reduction <add>, %8, %cst_7 [0] : vector<16x8x8xf32> to vector<8x8xf32>
    %10 = arith.addf %3, %9 : vector<8x8xf32>
    %11 = vector.extract_strided_slice %2 {offsets = [0, 0, 1], sizes = [16, 8, 8], strides = [1, 1, 1]} : vector<16x10x10xf32> to vector<16x8x8xf32>
    %c1 = arith.constant 1 : index
    %c0_8 = arith.constant 0 : index
    %c0_9 = arith.constant 0 : index
    %c0_10 = arith.constant 0 : index
    %12 = vector.load %arg1[%c1, %c0_8, %c0_9, %c0_10] : memref<9x16x1x1xf32, #tpu.memory_space<vmem>>, vector<1x16x1x1xf32>
    %13 = vector.shape_cast %12 : vector<1x16x1x1xf32> to vector<16x1x1xf32>
    %14 = vector.broadcast %13 : vector<16x1x1xf32> to vector<16x8x8xf32>
    %15 = arith.mulf %11, %14 : vector<16x8x8xf32>
    %cst_11 = arith.constant dense<0.000000e+00> : vector<8x8xf32>
    %16 = vector.multi_reduction <add>, %15, %cst_11 [0] : vector<16x8x8xf32> to vector<8x8xf32>
    %17 = arith.addf %10, %16 : vector<8x8xf32>
    %18 = vector.extract_strided_slice %2 {offsets = [0, 0, 2], sizes = [16, 8, 8], strides = [1, 1, 1]} : vector<16x10x10xf32> to vector<16x8x8xf32>
    %c2 = arith.constant 2 : index
    %c0_12 = arith.constant 0 : index
    %c0_13 = arith.constant 0 : index
    %c0_14 = arith.constant 0 : index
    %19 = vector.load %arg1[%c2, %c0_12, %c0_13, %c0_14] : memref<9x16x1x1xf32, #tpu.memory_space<vmem>>, vector<1x16x1x1xf32>
    %20 = vector.shape_cast %19 : vector<1x16x1x1xf32> to vector<16x1x1xf32>
    %21 = vector.broadcast %20 : vector<16x1x1xf32> to vector<16x8x8xf32>
    %22 = arith.mulf %18, %21 : vector<16x8x8xf32>
    %cst_15 = arith.constant dense<0.000000e+00> : vector<8x8xf32>
    %23 = vector.multi_reduction <add>, %22, %cst_15 [0] : vector<16x8x8xf32> to vector<8x8xf32>
    %24 = arith.addf %17, %23 : vector<8x8xf32>
    %25 = vector.extract_strided_slice %2 {offsets = [0, 1, 0], sizes = [16, 8, 8], strides = [1, 1, 1]} : vector<16x10x10xf32> to vector<16x8x8xf32>
    %c3 = arith.constant 3 : index
    %c0_16 = arith.constant 0 : index
    %c0_17 = arith.constant 0 : index
    %c0_18 = arith.constant 0 : index
    %26 = vector.load %arg1[%c3, %c0_16, %c0_17, %c0_18] : memref<9x16x1x1xf32, #tpu.memory_space<vmem>>, vector<1x16x1x1xf32>
    %27 = vector.shape_cast %26 : vector<1x16x1x1xf32> to vector<16x1x1xf32>
    %28 = vector.broadcast %27 : vector<16x1x1xf32> to vector<16x8x8xf32>
    %29 = arith.mulf %25, %28 : vector<16x8x8xf32>
    %cst_19 = arith.constant dense<0.000000e+00> : vector<8x8xf32>
    %30 = vector.multi_reduction <add>, %29, %cst_19 [0] : vector<16x8x8xf32> to vector<8x8xf32>
    %31 = arith.addf %24, %30 : vector<8x8xf32>
    %32 = vector.extract_strided_slice %2 {offsets = [0, 1, 1], sizes = [16, 8, 8], strides = [1, 1, 1]} : vector<16x10x10xf32> to vector<16x8x8xf32>
    %c4 = arith.constant 4 : index
    %c0_20 = arith.constant 0 : index
    %c0_21 = arith.constant 0 : index
    %c0_22 = arith.constant 0 : index
    %33 = vector.load %arg1[%c4, %c0_20, %c0_21, %c0_22] : memref<9x16x1x1xf32, #tpu.memory_space<vmem>>, vector<1x16x1x1xf32>
    %34 = vector.shape_cast %33 : vector<1x16x1x1xf32> to vector<16x1x1xf32>
    %35 = vector.broadcast %34 : vector<16x1x1xf32> to vector<16x8x8xf32>
    %36 = arith.mulf %32, %35 : vector<16x8x8xf32>
    %cst_23 = arith.constant dense<0.000000e+00> : vector<8x8xf32>
    %37 = vector.multi_reduction <add>, %36, %cst_23 [0] : vector<16x8x8xf32> to vector<8x8xf32>
    %38 = arith.addf %31, %37 : vector<8x8xf32>
    %39 = vector.extract_strided_slice %2 {offsets = [0, 1, 2], sizes = [16, 8, 8], strides = [1, 1, 1]} : vector<16x10x10xf32> to vector<16x8x8xf32>
    %c5 = arith.constant 5 : index
    %c0_24 = arith.constant 0 : index
    %c0_25 = arith.constant 0 : index
    %c0_26 = arith.constant 0 : index
    %40 = vector.load %arg1[%c5, %c0_24, %c0_25, %c0_26] : memref<9x16x1x1xf32, #tpu.memory_space<vmem>>, vector<1x16x1x1xf32>
    %41 = vector.shape_cast %40 : vector<1x16x1x1xf32> to vector<16x1x1xf32>
    %42 = vector.broadcast %41 : vector<16x1x1xf32> to vector<16x8x8xf32>
    %43 = arith.mulf %39, %42 : vector<16x8x8xf32>
    %cst_27 = arith.constant dense<0.000000e+00> : vector<8x8xf32>
    %44 = vector.multi_reduction <add>, %43, %cst_27 [0] : vector<16x8x8xf32> to vector<8x8xf32>
    %45 = arith.addf %38, %44 : vector<8x8xf32>
    %46 = vector.extract_strided_slice %2 {offsets = [0, 2, 0], sizes = [16, 8, 8], strides = [1, 1, 1]} : vector<16x10x10xf32> to vector<16x8x8xf32>
    %c6 = arith.constant 6 : index
    %c0_28 = arith.constant 0 : index
    %c0_29 = arith.constant 0 : index
    %c0_30 = arith.constant 0 : index
    %47 = vector.load %arg1[%c6, %c0_28, %c0_29, %c0_30] : memref<9x16x1x1xf32, #tpu.memory_space<vmem>>, vector<1x16x1x1xf32>
    %48 = vector.shape_cast %47 : vector<1x16x1x1xf32> to vector<16x1x1xf32>
    %49 = vector.broadcast %48 : vector<16x1x1xf32> to vector<16x8x8xf32>
    %50 = arith.mulf %46, %49 : vector<16x8x8xf32>
    %cst_31 = arith.constant dense<0.000000e+00> : vector<8x8xf32>
    %51 = vector.multi_reduction <add>, %50, %cst_31 [0] : vector<16x8x8xf32> to vector<8x8xf32>
    %52 = arith.addf %45, %51 : vector<8x8xf32>
    %53 = vector.extract_strided_slice %2 {offsets = [0, 2, 1], sizes = [16, 8, 8], strides = [1, 1, 1]} : vector<16x10x10xf32> to vector<16x8x8xf32>
    %c7 = arith.constant 7 : index
    %c0_32 = arith.constant 0 : index
    %c0_33 = arith.constant 0 : index
    %c0_34 = arith.constant 0 : index
    %54 = vector.load %arg1[%c7, %c0_32, %c0_33, %c0_34] : memref<9x16x1x1xf32, #tpu.memory_space<vmem>>, vector<1x16x1x1xf32>
    %55 = vector.shape_cast %54 : vector<1x16x1x1xf32> to vector<16x1x1xf32>
    %56 = vector.broadcast %55 : vector<16x1x1xf32> to vector<16x8x8xf32>
    %57 = arith.mulf %53, %56 : vector<16x8x8xf32>
    %cst_35 = arith.constant dense<0.000000e+00> : vector<8x8xf32>
    %58 = vector.multi_reduction <add>, %57, %cst_35 [0] : vector<16x8x8xf32> to vector<8x8xf32>
    %59 = arith.addf %52, %58 : vector<8x8xf32>
    %60 = vector.extract_strided_slice %2 {offsets = [0, 2, 2], sizes = [16, 8, 8], strides = [1, 1, 1]} : vector<16x10x10xf32> to vector<16x8x8xf32>
    %c8 = arith.constant 8 : index
    %c0_36 = arith.constant 0 : index
    %c0_37 = arith.constant 0 : index
    %c0_38 = arith.constant 0 : index
    %61 = vector.load %arg1[%c8, %c0_36, %c0_37, %c0_38] : memref<9x16x1x1xf32, #tpu.memory_space<vmem>>, vector<1x16x1x1xf32>
    %62 = vector.shape_cast %61 : vector<1x16x1x1xf32> to vector<16x1x1xf32>
    %63 = vector.broadcast %62 : vector<16x1x1xf32> to vector<16x8x8xf32>
    %64 = arith.mulf %60, %63 : vector<16x8x8xf32>
    %cst_39 = arith.constant dense<0.000000e+00> : vector<8x8xf32>
    %65 = vector.multi_reduction <add>, %64, %cst_39 [0] : vector<16x8x8xf32> to vector<8x8xf32>
    %66 = arith.addf %59, %65 : vector<8x8xf32>
    %c0_40 = arith.constant 0 : index
    %c0_41 = arith.constant 0 : index
    %67 = vector.load %arg2[%c0_40, %c0_41] : memref<1x1xf32, #tpu.memory_space<vmem>>, vector<1x1xf32>
    %68 = vector.broadcast %67 : vector<1x1xf32> to vector<8x8xf32>
    %69 = arith.addf %66, %68 : vector<8x8xf32>
    %cst_42 = arith.constant 0.000000e+00 : f32
    %70 = vector.broadcast %cst_42 : f32 to vector<8x8xf32>
    %71 = arith.subf %70, %69 : vector<8x8xf32>
    %72 = math.exp %71 : vector<8x8xf32>
    %cst_43 = arith.constant 1.000000e+00 : f32
    %73 = vector.broadcast %cst_43 : f32 to vector<8x8xf32>
    %74 = arith.addf %73, %72 : vector<8x8xf32>
    %cst_44 = arith.constant 1.000000e+00 : f32
    %75 = vector.broadcast %cst_44 : f32 to vector<8x8xf32>
    %76 = arith.divf %75, %74 : vector<8x8xf32>
    %77 = vector.extract_strided_slice %2 {offsets = [0, 1, 1], sizes = [16, 8, 8], strides = [1, 1, 1]} : vector<16x10x10xf32> to vector<16x8x8xf32>
    %78 = vector.shape_cast %76 : vector<8x8xf32> to vector<1x8x8xf32>
    %79 = vector.broadcast %78 : vector<1x8x8xf32> to vector<16x8x8xf32>
    %80 = arith.mulf %77, %79 : vector<16x8x8xf32>
    %81 = arith.truncf %80 : vector<16x8x8xf32> to vector<16x8x8xbf16>
    %82 = vector.shape_cast %81 : vector<16x8x8xbf16> to vector<16x1x8x8xbf16>
    %c0_45 = arith.constant 0 : index
    %c0_46 = arith.constant 0 : index
    %c0_47 = arith.constant 0 : index
    %c0_48 = arith.constant 0 : index
    %83 = vector.load %arg4[%c0_45, %c0_46, %c0_47, %c0_48] : memref<16x1x8x8xbf16, #tpu.memory_space<vmem>>, vector<16x1x8x8xbf16>
    tpu.vector_store %arg4[%c0_45, %c0_46, %c0_47, %c0_48], %82 {strides = array<i32>} : memref<16x1x8x8xbf16, #tpu.memory_space<vmem>>, vector<16x1x8x8xbf16>,
    return
  }
  func.func @transform_0(%arg0: i32) -> (i32, i32, i32, i32) {
    %c0_i32 = arith.constant 0 : i32
    %c0_i32_0 = arith.constant 0 : i32
    %c0_i32_1 = arith.constant 0 : i32
    %c0_i32_2 = arith.constant 0 : i32
    %c0_i32_3 = arith.constant 0 : i32
    return %c0_i32, %c0_i32_0, %c0_i32_1, %c0_i32_2 : i32, i32, i32, i32
  }
  func.func @transform_1(%arg0: i32) -> (i32, i32) {
    %c0_i32 = arith.constant 0 : i32
    %c0_i32_0 = arith.constant 0 : i32
    %c0_i32_1 = arith.constant 0 : i32
    return %c0_i32, %c0_i32_0 : i32, i32
  }
  func.func @transform_2(%arg0: i32) -> (i32, i32, i32, i32) {
    %c0_i32 = arith.constant 0 : i32
    %c0_i32_0 = arith.constant 0 : i32
    %c0_i32_1 = arith.constant 0 : i32
    %c0_i32_2 = arith.constant 0 : i32
    return %c0_i32, %arg0, %c0_i32_0, %c0_i32_1 : i32, i32, i32, i32
  }
  func.func @transform_3(%arg0: i32) -> (i32, i32, i32, i32) {
    %c0_i32 = arith.constant 0 : i32
    %c0_i32_0 = arith.constant 0 : i32
    %c0_i32_1 = arith.constant 0 : i32
    %c0_i32_2 = arith.constant 0 : i32
    return %c0_i32, %arg0, %c0_i32_0, %c0_i32_1 : i32, i32, i32, i32
  }
}

module attributes {stable_mosaic.version = 11 : i64} {
  func.func @_conv_pool_kernel(%arg0: i32, %arg1: memref<32x432xbf16, #tpu.memory_space<vmem>>, %arg2: memref<32x1xf32, #tpu.memory_space<vmem>>, %arg3: memref<8x432x128xbf16, #tpu.memory_space<vmem>>, %arg4: memref<32x128xbf16, #tpu.memory_space<vmem>>) attributes {dimension_semantics = [#tpu.dimension_semantics<parallel>], iteration_bounds = array<i64: 1>, scalar_prefetch = 0 : i64, scratch_operands = 0 : i64, tpu.core_type = #tpu.core_type<tc>, window_params = [{pipeline_mode = #tpu.pipeline_mode<synchronous>, transform_indices = @transform_0, window_bounds = array<i64: 32, 432>}, {pipeline_mode = #tpu.pipeline_mode<synchronous>, transform_indices = @transform_1, window_bounds = array<i64: 32, 1>}, {transform_indices = @transform_2, window_bounds = array<i64: 8, 432, 128>}, {transform_indices = @transform_3, window_bounds = array<i64: 32, 128>}]} {
    %c0 = arith.constant 0 : index
    %c0_0 = arith.constant 0 : index
    %0 = vector.load %arg1[%c0, %c0_0] : memref<32x432xbf16, #tpu.memory_space<vmem>>, vector<32x432xbf16>
    %c0_1 = arith.constant 0 : index
    %c0_2 = arith.constant 0 : index
    %c0_3 = arith.constant 0 : index
    %1 = vector.load %arg3[%c0_1, %c0_2, %c0_3] : memref<8x432x128xbf16, #tpu.memory_space<vmem>>, vector<1x432x128xbf16>
    %2 = vector.shape_cast %1 : vector<1x432x128xbf16> to vector<432x128xbf16>
    %cst = arith.constant dense<0.000000e+00> : vector<32x128xf32>
    %3 = tpu.matmul %0, %2, %cst {dimension_numbers = #tpu.dot_dimension_numbers<[1], [0], [0], [1], [0, 0, 1, 1], [], []>} : vector<32x432xbf16>, vector<432x128xbf16>, vector<32x128xf32> -> vector<32x128xf32>
    %c1 = arith.constant 1 : index
    %c0_4 = arith.constant 0 : index
    %c0_5 = arith.constant 0 : index
    %4 = vector.load %arg3[%c1, %c0_4, %c0_5] : memref<8x432x128xbf16, #tpu.memory_space<vmem>>, vector<1x432x128xbf16>
    %5 = vector.shape_cast %4 : vector<1x432x128xbf16> to vector<432x128xbf16>
    %cst_6 = arith.constant dense<0.000000e+00> : vector<32x128xf32>
    %6 = tpu.matmul %0, %5, %cst_6 {dimension_numbers = #tpu.dot_dimension_numbers<[1], [0], [0], [1], [0, 0, 1, 1], [], []>} : vector<32x432xbf16>, vector<432x128xbf16>, vector<32x128xf32> -> vector<32x128xf32>
    %7 = arith.maximumf %3, %6 : vector<32x128xf32>
    %c2 = arith.constant 2 : index
    %c0_7 = arith.constant 0 : index
    %c0_8 = arith.constant 0 : index
    %8 = vector.load %arg3[%c2, %c0_7, %c0_8] : memref<8x432x128xbf16, #tpu.memory_space<vmem>>, vector<1x432x128xbf16>
    %9 = vector.shape_cast %8 : vector<1x432x128xbf16> to vector<432x128xbf16>
    %cst_9 = arith.constant dense<0.000000e+00> : vector<32x128xf32>
    %10 = tpu.matmul %0, %9, %cst_9 {dimension_numbers = #tpu.dot_dimension_numbers<[1], [0], [0], [1], [0, 0, 1, 1], [], []>} : vector<32x432xbf16>, vector<432x128xbf16>, vector<32x128xf32> -> vector<32x128xf32>
    %11 = arith.maximumf %7, %10 : vector<32x128xf32>
    %c3 = arith.constant 3 : index
    %c0_10 = arith.constant 0 : index
    %c0_11 = arith.constant 0 : index
    %12 = vector.load %arg3[%c3, %c0_10, %c0_11] : memref<8x432x128xbf16, #tpu.memory_space<vmem>>, vector<1x432x128xbf16>
    %13 = vector.shape_cast %12 : vector<1x432x128xbf16> to vector<432x128xbf16>
    %cst_12 = arith.constant dense<0.000000e+00> : vector<32x128xf32>
    %14 = tpu.matmul %0, %13, %cst_12 {dimension_numbers = #tpu.dot_dimension_numbers<[1], [0], [0], [1], [0, 0, 1, 1], [], []>} : vector<32x432xbf16>, vector<432x128xbf16>, vector<32x128xf32> -> vector<32x128xf32>
    %15 = arith.maximumf %11, %14 : vector<32x128xf32>
    %c4 = arith.constant 4 : index
    %c0_13 = arith.constant 0 : index
    %c0_14 = arith.constant 0 : index
    %16 = vector.load %arg3[%c4, %c0_13, %c0_14] : memref<8x432x128xbf16, #tpu.memory_space<vmem>>, vector<1x432x128xbf16>
    %17 = vector.shape_cast %16 : vector<1x432x128xbf16> to vector<432x128xbf16>
    %cst_15 = arith.constant dense<0.000000e+00> : vector<32x128xf32>
    %18 = tpu.matmul %0, %17, %cst_15 {dimension_numbers = #tpu.dot_dimension_numbers<[1], [0], [0], [1], [0, 0, 1, 1], [], []>} : vector<32x432xbf16>, vector<432x128xbf16>, vector<32x128xf32> -> vector<32x128xf32>
    %19 = arith.maximumf %15, %18 : vector<32x128xf32>
    %c5 = arith.constant 5 : index
    %c0_16 = arith.constant 0 : index
    %c0_17 = arith.constant 0 : index
    %20 = vector.load %arg3[%c5, %c0_16, %c0_17] : memref<8x432x128xbf16, #tpu.memory_space<vmem>>, vector<1x432x128xbf16>
    %21 = vector.shape_cast %20 : vector<1x432x128xbf16> to vector<432x128xbf16>
    %cst_18 = arith.constant dense<0.000000e+00> : vector<32x128xf32>
    %22 = tpu.matmul %0, %21, %cst_18 {dimension_numbers = #tpu.dot_dimension_numbers<[1], [0], [0], [1], [0, 0, 1, 1], [], []>} : vector<32x432xbf16>, vector<432x128xbf16>, vector<32x128xf32> -> vector<32x128xf32>
    %23 = arith.maximumf %19, %22 : vector<32x128xf32>
    %c6 = arith.constant 6 : index
    %c0_19 = arith.constant 0 : index
    %c0_20 = arith.constant 0 : index
    %24 = vector.load %arg3[%c6, %c0_19, %c0_20] : memref<8x432x128xbf16, #tpu.memory_space<vmem>>, vector<1x432x128xbf16>
    %25 = vector.shape_cast %24 : vector<1x432x128xbf16> to vector<432x128xbf16>
    %cst_21 = arith.constant dense<0.000000e+00> : vector<32x128xf32>
    %26 = tpu.matmul %0, %25, %cst_21 {dimension_numbers = #tpu.dot_dimension_numbers<[1], [0], [0], [1], [0, 0, 1, 1], [], []>} : vector<32x432xbf16>, vector<432x128xbf16>, vector<32x128xf32> -> vector<32x128xf32>
    %27 = arith.maximumf %23, %26 : vector<32x128xf32>
    %c7 = arith.constant 7 : index
    %c0_22 = arith.constant 0 : index
    %c0_23 = arith.constant 0 : index
    %28 = vector.load %arg3[%c7, %c0_22, %c0_23] : memref<8x432x128xbf16, #tpu.memory_space<vmem>>, vector<1x432x128xbf16>
    %29 = vector.shape_cast %28 : vector<1x432x128xbf16> to vector<432x128xbf16>
    %cst_24 = arith.constant dense<0.000000e+00> : vector<32x128xf32>
    %30 = tpu.matmul %0, %29, %cst_24 {dimension_numbers = #tpu.dot_dimension_numbers<[1], [0], [0], [1], [0, 0, 1, 1], [], []>} : vector<32x432xbf16>, vector<432x128xbf16>, vector<32x128xf32> -> vector<32x128xf32>
    %31 = arith.maximumf %27, %30 : vector<32x128xf32>
    %c0_25 = arith.constant 0 : index
    %c0_26 = arith.constant 0 : index
    %32 = vector.load %arg2[%c0_25, %c0_26] : memref<32x1xf32, #tpu.memory_space<vmem>>, vector<32x1xf32>
    %33 = vector.broadcast %32 : vector<32x1xf32> to vector<32x128xf32>
    %34 = arith.addf %31, %33 : vector<32x128xf32>
    %cst_27 = arith.constant 0.000000e+00 : f32
    %35 = vector.broadcast %cst_27 : f32 to vector<32x128xf32>
    %36 = arith.maximumf %34, %35 : vector<32x128xf32>
    %37 = arith.truncf %36 : vector<32x128xf32> to vector<32x128xbf16>
    %c0_28 = arith.constant 0 : index
    %c0_29 = arith.constant 0 : index
    %38 = vector.load %arg4[%c0_28, %c0_29] : memref<32x128xbf16, #tpu.memory_space<vmem>>, vector<32x128xbf16>
    tpu.vector_store %arg4[%c0_28, %c0_29], %37 {strides = array<i32>} : memref<32x128xbf16, #tpu.memory_space<vmem>>, vector<32x128xbf16>,
    return
  }
  func.func @transform_0(%arg0: i32) -> (i32, i32) {
    %c0_i32 = arith.constant 0 : i32
    %c0_i32_0 = arith.constant 0 : i32
    %c0_i32_1 = arith.constant 0 : i32
    return %c0_i32, %c0_i32_0 : i32, i32
  }
  func.func @transform_1(%arg0: i32) -> (i32, i32) {
    %c0_i32 = arith.constant 0 : i32
    %c0_i32_0 = arith.constant 0 : i32
    %c0_i32_1 = arith.constant 0 : i32
    return %c0_i32, %c0_i32_0 : i32, i32
  }
  func.func @transform_2(%arg0: i32) -> (i32, i32, i32) {
    %c0_i32 = arith.constant 0 : i32
    %c0_i32_0 = arith.constant 0 : i32
    %c0_i32_1 = arith.constant 0 : i32
    return %c0_i32, %c0_i32_0, %arg0 : i32, i32, i32
  }
  func.func @transform_3(%arg0: i32) -> (i32, i32) {
    %c0_i32 = arith.constant 0 : i32
    %c0_i32_0 = arith.constant 0 : i32
    return %c0_i32, %arg0 : i32, i32
  }
}

</mosaic_0001>

<bundles_post_ra>
// kernel: attention_3d_cnn_forward.3
= control target key start
LH: loop header
LB: loop body
LE: loop exit
PB: predicated region body
PF: predicated region fallthrough
CT: control target
= control target key end

     0   :  { %s1208_s12 = smov 0   ;;  %s1210_s13 = smov 0   ;;  %s1407_s0 = inlined_call_operand.vmem [shape: bf16[16,32], index: 0, kind: input, shape index: {}]   ;;  %s1408_s1 = inlined_call_operand.vmem [shape: f32[16,1], index: 1, kind: input, shape index: {}]   ;;  %s1409_s2 = inlined_call_operand.vmem [shape: bf16[8,32,256], index: 2, kind: input, shape index: {}]   ;;  %s1410_s3 = inlined_call_operand.vmem [shape: bf16[16,256], index: 3, kind: output, shape index: {}]  }
   0x1   :  { %s1212_s14 = smov 0  }
   0x2 LB: > { %s953_s15 = sadd.s32 4294967295, %s1183_s14   ;;  %s1225_s16 = sadd.s32 1, %s1183_s14   ;;  %s1183_s14 = sphi %s1212_s14, %s1414_s14   ;;  %s1179_s13 = sphi %s1210_s13, %s1413_s13   ;;  %s1175_s12 = sphi %s1208_s12, %s1412_s12  }
   0x3   : > { %s59_s17 = ssub.s32 %s1183_s14, %s1225_s16  ;;  %s62_s18 = sadd.s32 1, %s1179_s13 }
   0x4   : > { %p60_p0 = scmp.eq.s32.totalorder %s59_s17, 0  ;;  %p69_p1 = scmp.ne.s32.totalorder %s1179_s13, %s1175_s12 }
   0x5   : > { %p70_p2 = scmp.eq.s32.totalorder %s1183_s14, 0  ;;  %p99_p3 = scmp.eq.s32.totalorder %s953_s15, 1 }
   0x6   : > { %s1236_s19 = scalar_select %p60_p0, %s1179_s13, %s62_s18  }
   0x7   : > { %p71_p4 = por %p70_p2, %p69_p1  ;;  %p1238_p5 = por %p99_p3, %p69_p1 }
   0x8   : > { %p956_p6 = scmp.ge.s32.totalorder %s1183_s14, 2 }
   0xa   : > { %127 = sbr.rel (%p956_p6) target bundleno = 42 (0x2a), region = 24 }
  0x11   : > { %130 = sbr.rel (!%p71_p4) target bundleno = 42 (0x2a), region = 28  ;;  %s132_s21 = sand.u32 (%p71_p4), 1, %s1179_s13  }
  0x12   : > { %s958_s22 = sshll.u32 (%p71_p4), %s1183_s14, 2  ;;  %s957_s23 = sshll.u32 (%p71_p4), %s132_s21, 7 }
  0x13   : > { %s1248_s26 = scalar_lea.vmem (%p71_p4), %s1409_s2, %s958_s22  ;;  %s1252_s27 = scalar_lea.vmem (%p71_p4), [#allocation2], %s957_s23 }
  0x14   : > { %v152_v0 = vld [vmem:[%s1248_s26] sm:$0xf] (%p71_p4)  ;;  %v154_v1 = vld [vmem:[%s1248_s26 + $0x8] sm:$0xf] (%p71_p4)  ;;  %v156_v2 = vld [vmem:[%s1248_s26 + $0x10] sm:$0xf] (%p71_p4) }
  0x15   : > { %153 = vst [vmem:[%s1252_s27] sm:$0xf] (%p71_p4), %v152_v0  ;;  %155 = vst [vmem:[%s1252_s27 + $0x4] sm:$0xf] (%p71_p4), %v154_v1  ;;  %v158_v3 = vld [vmem:[%s1248_s26 + $0x18] sm:$0xf] (%p71_p4) }
  0x16   : > { %v160_v4 = vld [vmem:[%s1248_s26 + $0x20] sm:$0xf] (%p71_p4)  ;;  %157 = vst [vmem:[%s1252_s27 + $0x8] sm:$0xf] (%p71_p4), %v156_v2  ;;  %159 = vst [vmem:[%s1252_s27 + $0xc] sm:$0xf] (%p71_p4), %v158_v3 }
  0x17   : > { %161 = vst [vmem:[%s1252_s27 + $0x10] sm:$0xf] (%p71_p4), %v160_v4  ;;  %v162_v5 = vld [vmem:[%s1248_s26 + $0x28] sm:$0xf] (%p71_p4)  ;;  %v164_v6 = vld [vmem:[%s1248_s26 + $0x30] sm:$0xf] (%p71_p4) }
  0x18   : > { %v166_v7 = vld [vmem:[%s1248_s26 + $0x38] sm:$0xf]  ;;  %163 = vst [vmem:[%s1252_s27 + $0x14] sm:$0xf] %v162_v5  ;;  %165 = vst [vmem:[%s1252_s27 + $0x18] sm:$0xf] %v164_v6 }
  0x19   : > { %167 = vst [vmem:[%s1252_s27 + $0x1c] sm:$0xf] %v166_v7  ;;  %v168_v8 = vld [vmem:[%s1248_s26 + $0x40] sm:$0xf]  ;;  %v170_v9 = vld [vmem:[%s1248_s26 + $0x48] sm:$0xf] }
  0x1a   : > { %v172_v10 = vld [vmem:[%s1248_s26 + $0x50] sm:$0xf]  ;;  %169 = vst [vmem:[%s1252_s27 + $0x20] sm:$0xf] %v168_v8  ;;  %171 = vst [vmem:[%s1252_s27 + $0x24] sm:$0xf] %v170_v9 }
  0x1b   : > { %173 = vst [vmem:[%s1252_s27 + $0x28] sm:$0xf] %v172_v10  ;;  %v174_v11 = vld [vmem:[%s1248_s26 + $0x58] sm:$0xf]  ;;  %v176_v12 = vld [vmem:[%s1248_s26 + $0x60] sm:$0xf] }
  0x1c   : > { %v178_v13 = vld [vmem:[%s1248_s26 + $0x68] sm:$0xf]  ;;  %175 = vst [vmem:[%s1252_s27 + $0x2c] sm:$0xf] %v174_v11  ;;  %177 = vst [vmem:[%s1252_s27 + $0x30] sm:$0xf] %v176_v12 }
  0x1d   : > { %179 = vst [vmem:[%s1252_s27 + $0x34] sm:$0xf] %v178_v13  ;;  %v180_v14 = vld [vmem:[%s1248_s26 + $0x70] sm:$0xf]  ;;  %v182_v15 = vld [vmem:[%s1248_s26 + $0x78] sm:$0xf] }
  0x1e   : > { %v184_v16 = vld [vmem:[%s1248_s26 + $0x80] sm:$0xf]  ;;  %181 = vst [vmem:[%s1252_s27 + $0x38] sm:$0xf] %v180_v14  ;;  %183 = vst [vmem:[%s1252_s27 + $0x3c] sm:$0xf] %v182_v15 }
  0x1f   : > { %185 = vst [vmem:[%s1252_s27 + $0x40] sm:$0xf] %v184_v16  ;;  %v186_v17 = vld [vmem:[%s1248_s26 + $0x88] sm:$0xf]  ;;  %v188_v18 = vld [vmem:[%s1248_s26 + $0x90] sm:$0xf] }
  0x20   : > { %v190_v19 = vld [vmem:[%s1248_s26 + $0x98] sm:$0xf]  ;;  %187 = vst [vmem:[%s1252_s27 + $0x44] sm:$0xf] %v186_v17  ;;  %189 = vst [vmem:[%s1252_s27 + $0x48] sm:$0xf] %v188_v18 }
  0x21   : > { %191 = vst [vmem:[%s1252_s27 + $0x4c] sm:$0xf] %v190_v19  ;;  %v192_v20 = vld [vmem:[%s1248_s26 + $0xa0] sm:$0xf]  ;;  %v194_v21 = vld [vmem:[%s1248_s26 + $0xa8] sm:$0xf] }
  0x22   : > { %v196_v22 = vld [vmem:[%s1248_s26 + $0xb0] sm:$0xf]  ;;  %193 = vst [vmem:[%s1252_s27 + $0x50] sm:$0xf] %v192_v20  ;;  %195 = vst [vmem:[%s1252_s27 + $0x54] sm:$0xf] %v194_v21 }
  0x23   : > { %197 = vst [vmem:[%s1252_s27 + $0x58] sm:$0xf] %v196_v22  ;;  %v198_v23 = vld [vmem:[%s1248_s26 + $0xb8] sm:$0xf]  ;;  %v200_v24 = vld [vmem:[%s1248_s26 + $0xc0] sm:$0xf] }
  0x24   : > { %v202_v25 = vld [vmem:[%s1248_s26 + $0xc8] sm:$0xf]  ;;  %199 = vst [vmem:[%s1252_s27 + $0x5c] sm:$0xf] %v198_v23  ;;  %201 = vst [vmem:[%s1252_s27 + $0x60] sm:$0xf] %v200_v24 }
  0x25   : > { %203 = vst [vmem:[%s1252_s27 + $0x64] sm:$0xf] %v202_v25  ;;  %v204_v26 = vld [vmem:[%s1248_s26 + $0xd0] sm:$0xf]  ;;  %v206_v27 = vld [vmem:[%s1248_s26 + $0xd8] sm:$0xf] }
  0x26   : > { %v208_v28 = vld [vmem:[%s1248_s26 + $0xe0] sm:$0xf]  ;;  %205 = vst [vmem:[%s1252_s27 + $0x68] sm:$0xf] %v204_v26  ;;  %207 = vst [vmem:[%s1252_s27 + $0x6c] sm:$0xf] %v206_v27 }
  0x27   : > { %209 = vst [vmem:[%s1252_s27 + $0x70] sm:$0xf] %v208_v28  ;;  %v210_v29 = vld [vmem:[%s1248_s26 + $0xe8] sm:$0xf]  ;;  %v212_v30 = vld [vmem:[%s1248_s26 + $0xf0] sm:$0xf] }
  0x28   : > { %v214_v31 = vld [vmem:[%s1248_s26 + $0xf8] sm:$0xf]  ;;  %211 = vst [vmem:[%s1252_s27 + $0x74] sm:$0xf] %v210_v29  ;;  %213 = vst [vmem:[%s1252_s27 + $0x78] sm:$0xf] %v212_v30 }
  0x29   : > { %215 = vst [vmem:[%s1252_s27 + $0x7c] sm:$0xf] %v214_v31 }
  0x2a PF: > { %p959_p7 = scmp.ge.s32.totalorder %s1183_s14, 1  ;;  %p301_p8 = scmp.lt.s32.totalorder %s1183_s14, 3 }
  0x2c   : > { %p302_p9 = pnand %p959_p7, %p301_p8 }
  0x2d   : > { %s308_s28 = sand.u32 (!%p302_p9), 1, %s1175_s12   ;;  %v1185_v32 = vmov (!%p302_p9), 0.0   ;;  %v819_v33 = vld [vmem:[%s1408_s1] sm:$0xff] (!%p302_p9)  ;;  %vm1186_vm0 = vmmov (!%p302_p9), 0   ;;  %v1187_v35 = vmov (!%p302_p9), 0   ;;  %v820_v36 = vld [vmem:[%s1408_s1 + $0x8] sm:$0xff] (!%p302_p9) }
  0x2e   : > { %305 = sbr.rel (%p302_p9) target bundleno = 313 (0x139), region = 69  ;;  %1052 = vmatprep.subr.bf16.mxu0 (!%p302_p9), %v1185_v32  ;;  %1060 = vmatprep.subr.bf16.mxu1 (!%p302_p9), %v1185_v32  ;;  %s960_s29 = sshll.u32 (!%p302_p9), %s308_s28, 7  ;;  %v1148_v40 = vld [vmem:[%s1407_s0] sm:$0xff] (!%p302_p9)   ;;  %vm354_vm1 = vcmask (!%p302_p9), 261120  }
  0x2f   : > { %1056 = vmatprep.mubr.msk.bf16.mxu0 (!%p302_p9), %vm1186_vm0, %v1185_v32  ;;  %1064 = vmatprep.mubr.msk.bf16.mxu1 (!%p302_p9), %vm1186_vm0, %v1185_v32  ;;  %s1330_s5 = scalar_lea.vmem (!%p302_p9), [#allocation2], %s960_s29  ;;  %s961_s10 = sshll.u32 (!%p302_p9), %s308_s28, 3 }
  0x30   : > { %v1144_v34 = vld [vmem:[%s1330_s5] sm:$0xff] (!%p302_p9)   ;;  %1143 = vset.pattern.permute.xlu0 (!%p302_p9), %v1187_v35  ;;  %v1145_v37 = vld [vmem:[%s1330_s5 + $0x10] sm:$0xff] (!%p302_p9)   ;;  %v1146_v38 = vld [vmem:[%s1330_s5 + $0x8] sm:$0xff] (!%p302_p9)   ;;  %s329_s11 = scalar_lea.vmem (!%p302_p9), [#allocation3], %s961_s10 }
  0x31   : > { %823 = vperm.xlu0 (!%p302_p9), %1143, %v819_v33   ;;  %1053 = vmatpush3.bf16.msra.mxu0 (!%p302_p9), %v1144_v34  ;;  %v1147_v39 = vld [vmem:[%s1330_s5 + $0x18] sm:$0xff] (!%p302_p9)   ;;  %v1149_v41 = vld [vmem:[%s1330_s5 + $0x20] sm:$0xff] (!%p302_p9)   ;;  %v1150_v42 = vld [vmem:[%s1330_s5 + $0x30] sm:$0xff] (!%p302_p9)  }
  0x32   : > { %1061 = vmatpush3.bf16.msra.mxu1 (!%p302_p9), %v1145_v37  ;;  %1054 = vmatprep.subr.bf16.mxu0 (!%p302_p9), %v1185_v32  ;;  %v1151_v43 = vld [vmem:[%s1330_s5 + $0x28] sm:$0xff] (!%p302_p9)   ;;  %v1152_v44 = vld [vmem:[%s1330_s5 + $0x38] sm:$0xff] (!%p302_p9)   ;;  %v1153_v45 = vld [vmem:[%s1330_s5 + $0x40] sm:$0xff] (!%p302_p9)  }
  0x33   : > { %1062 = vmatprep.subr.bf16.mxu1 (!%p302_p9), %v1185_v32  ;;  %v1154_v46 = vld [vmem:[%s1330_s5 + $0x50] sm:$0xff] (!%p302_p9)   ;;  %v1155_v47 = vld [vmem:[%s1330_s5 + $0x48] sm:$0xff] (!%p302_p9)   ;;  %v1156_v48 = vld [vmem:[%s1330_s5 + $0x58] sm:$0xff] (!%p302_p9)  }
  0x34   : > { %v1157_v49 = vld [vmem:[%s1330_s5 + $0x60] sm:$0xff] (!%p302_p9)   ;;  %v1158_v50 = vld [vmem:[%s1330_s5 + $0x70] sm:$0xff] (!%p302_p9)   ;;  %v1159_v51 = vld [vmem:[%s1330_s5 + $0x68] sm:$0xff] (!%p302_p9)  }
  0x35   : > { %828 = vperm.xlu0 %1143, %v820_v36   ;;  %1055 = vmatpush3.bf16.msra.mxu0 %v1146_v38  ;;  %v1160_v52 = vld [vmem:[%s1330_s5 + $0x78] sm:$0xff]   ;;  %s1018_s17 = sshll.u32 (%p1238_p5), %s953_s15, 2 }
  0x36   : > { %1063 = vmatpush3.bf16.msra.mxu1 %v1147_v39  ;;  %1068 = vmatprep.subr.bf16.mxu0 %v1185_v32  ;;  %s853_s22 = scalar_lea.vmem (%p1238_p5), %s1410_s3, %s1018_s17 }
  0x37   : > { %1076 = vmatprep.subr.bf16.mxu1 %v1185_v32 }
  0x38   : > { %1057 = vmatmul.mubr.msk.bf16.vlgmr.msra.gmra.mrb[0].mxu0 %vm354_vm1, %v1148_v40 }
  0x39   : > { %1065 = vmatmul.mubr.msk.bf16.vlgmr.msra.gmra.mrb[0].mxu1 %vm354_vm1, %v1148_v40  ;;  %1069 = vmatpush3.bf16.msra.mxu0 %v1149_v41 }
  0x3a   : > { %1077 = vmatpush3.bf16.msra.mxu1 %v1150_v42  ;;  %1070 = vmatprep.subr.bf16.mxu0 %v1185_v32 }
  0x3b   : > { %1078 = vmatprep.subr.bf16.mxu1 %v1185_v32  ;;  %1072 = vmatprep.mubr.msk.bf16.mxu0 %vm1186_vm0, %v1185_v32 }
  0x3c   : > { %1080 = vmatprep.mubr.msk.bf16.mxu1 %vm1186_vm0, %v1185_v32 }
  0x3d   : > { %1071 = vmatpush3.bf16.msra.mxu0 %v1151_v43 }
  0x3e   : > { %1079 = vmatpush3.bf16.msra.mxu1 %v1152_v44  ;;  %1084 = vmatprep.subr.bf16.mxu0 %v1185_v32 }
  0x3f   : > { %1092 = vmatprep.subr.bf16.mxu1 %v1185_v32 }
  0x40   : > { %1073 = vmatmul.mubr.msk.bf16.vlgmr.msra.gmra.mrb[4].mxu0 %vm354_vm1, %v1148_v40 }
  0x41   : > { %1081 = vmatmul.mubr.msk.bf16.vlgmr.msra.gmra.mrb[4].mxu1 %vm354_vm1, %v1148_v40  ;;  %1085 = vmatpush3.bf16.msra.mxu0 %v1153_v45 }
  0x42   : > { %1093 = vmatpush3.bf16.msra.mxu1 %v1154_v46  ;;  %1086 = vmatprep.subr.bf16.mxu0 %v1185_v32 }
  0x43   : > { %1094 = vmatprep.subr.bf16.mxu1 %v1185_v32  ;;  %1088 = vmatprep.mubr.msk.bf16.mxu0 %vm1186_vm0, %v1185_v32 }
  0x44   : > { %1096 = vmatprep.mubr.msk.bf16.mxu1 %vm1186_vm0, %v1185_v32 }
  0x45   : > { %1087 = vmatpush3.bf16.msra.mxu0 %v1155_v47 }
  0x46   : > { %1095 = vmatpush3.bf16.msra.mxu1 %v1156_v48  ;;  %1100 = vmatprep.subr.bf16.mxu0 %v1185_v32 }
  0x47   : > { %1108 = vmatprep.subr.bf16.mxu1 %v1185_v32 }
  0x48   : > { %1089 = vmatmul.mubr.msk.bf16.vlgmr.msra.gmra.mrb[8].mxu0 %vm354_vm1, %v1148_v40 }
  0x49   : > { %1097 = vmatmul.mubr.msk.bf16.vlgmr.msra.gmra.mrb[8].mxu1 %vm354_vm1, %v1148_v40  ;;  %1101 = vmatpush3.bf16.msra.mxu0 %v1157_v49 }
  0x4a   : > { %1109 = vmatpush3.bf16.msra.mxu1 %v1158_v50  ;;  %1102 = vmatprep.subr.bf16.mxu0 %v1185_v32 }
  0x4b   : > { %1110 = vmatprep.subr.bf16.mxu1 %v1185_v32  ;;  %1104 = vmatprep.mubr.msk.bf16.mxu0 %vm1186_vm0, %v1185_v32 }
  0x4c   : > { %1112 = vmatprep.mubr.msk.bf16.mxu1 %vm1186_vm0, %v1185_v32 }
  0x4d   : > { %1103 = vmatpush3.bf16.msra.mxu0 %v1159_v51 }
  0x4e   : > { %1111 = vmatpush3.bf16.msra.mxu1 %v1160_v52 }
  0x50   : > { %1105 = vmatmul.mubr.msk.bf16.vlgmr.msra.gmra.mrb[12].mxu0 %vm354_vm1, %v1148_v40 }
  0x51   : > { %1113 = vmatmul.mubr.msk.bf16.vlgmr.msra.gmra.mrb[12].mxu1 %vm354_vm1, %v1148_v40 }
  0xb0   : > { %v824_v23 = vpop.permute.xlu0 %823 }
  0xb4   : > { %v829_v37 = vpop.permute.xlu0 %828 }
 0x10b   : > { %v392_v53 = vpop.f32.mrb[0].mxu0 }
 0x10c   : > { %v450_v54 = vpop.f32.mrb[0].mxu1  ;;  %v1058_v55 = vpop.f32.mrb[1].mxu0 }
 0x10d   : > { %v457_v56 = vmax.f32 %v392_v53, %v450_v54  ;;  %v1066_v57 = vpop.f32.mrb[1].mxu1  ;;  %v395_v58 = vpop.f32.mrb[2].mxu0 }
 0x10e   : > { %v453_v59 = vpop.f32.mrb[2].mxu1  ;;  %v1059_v60 = vpop.f32.mrb[3].mxu0 }
 0x10f   : > { %v458_v61 = vmax.f32 %v395_v58, %v453_v59  ;;  %v1067_v62 = vpop.f32.mrb[3].mxu1 }
 0x113   : > { %v510_v63 = vpop.f32.mrb[4].mxu0 }
 0x114   : > { %v517_v0 = vmax.f32 %v457_v56, %v510_v63  ;;  %v570_v1 = vpop.f32.mrb[4].mxu1  ;;  %v1074_v2 = vpop.f32.mrb[5].mxu0 }
 0x115   : > { %v1082_v3 = vpop.f32.mrb[5].mxu1  ;;  %v513_v4 = vpop.f32.mrb[6].mxu0 }
 0x116   : > { %v577_v5 = vmax.f32 %v517_v0, %v570_v1  ;;  %v518_v6 = vmax.f32 %v458_v61, %v513_v4  ;;  %v573_v7 = vpop.f32.mrb[6].mxu1  ;;  %v1075_v8 = vpop.f32.mrb[7].mxu0 }
 0x117   : > { %v1083_v9 = vpop.f32.mrb[7].mxu1 }
 0x118   : > { %v578_v10 = vmax.f32 %v518_v6, %v573_v7 }
 0x11b   : > { %v630_v11 = vpop.f32.mrb[8].mxu0 }
 0x11c   : > { %v637_v12 = vmax.f32 %v577_v5, %v630_v11  ;;  %v690_v13 = vpop.f32.mrb[8].mxu1  ;;  %v1090_v14 = vpop.f32.mrb[9].mxu0 }
 0x11d   : > { %v1098_v15 = vpop.f32.mrb[9].mxu1  ;;  %v633_v16 = vpop.f32.mrb[10].mxu0 }
 0x11e   : > { %v697_v17 = vmax.f32 %v637_v12, %v690_v13  ;;  %v638_v18 = vmax.f32 %v578_v10, %v633_v16  ;;  %v693_v19 = vpop.f32.mrb[10].mxu1  ;;  %v1091_v20 = vpop.f32.mrb[11].mxu0 }
 0x11f   : > { %v1099_v21 = vpop.f32.mrb[11].mxu1 }
 0x120   : > { %v698_v22 = vmax.f32 %v638_v18, %v693_v19 }
 0x123   : > { %v750_v24 = vpop.f32.mrb[12].mxu0 }
 0x124   : > { %v757_v25 = vmax.f32 %v697_v17, %v750_v24  ;;  %v810_v26 = vpop.f32.mrb[12].mxu1  ;;  %v1106_v27 = vpop.f32.mrb[13].mxu0 }
 0x125   : > { %v1114_v28 = vpop.f32.mrb[13].mxu1  ;;  %v753_v29 = vpop.f32.mrb[14].mxu0 }
 0x126   : > { %v817_v30 = vmax.f32 %v757_v25, %v810_v26  ;;  %v758_v31 = vmax.f32 %v698_v22, %v753_v29  ;;  %v813_v32 = vpop.f32.mrb[14].mxu1  ;;  %v1107_v33 = vpop.f32.mrb[15].mxu0 }
 0x127   : > { %v1115_v34 = vpop.f32.mrb[15].mxu1 }
 0x128   : > { %v831_v35 = vadd.f32 %v824_v23, %v817_v30  ;;  %v818_v36 = vmax.f32 %v758_v31, %v813_v32 }
 0x12a   : > { %v832_v38 = vadd.f32 %v829_v37, %v818_v36  ;;  %v833_v39 = vmax.f32 %v831_v35, 0.0  ;;  %851 = sbr.rel (!%p1238_p5) target bundleno = 313 (0x139), region = 77 }
 0x12c   : > { %v834_v40 = vmax.f32 %v832_v38, 0.0 }
 0x12e   : > { %v1026_v41 = vpack.c.bf16 %v834_v40, %v833_v39 }
 0x130   : > { %1027 = vst [vmem:[%s329_s11] sm:$0xff] %v1026_v41  }
 0x137   : > { %v869_v42 = vld [vmem:[%s329_s11] sm:$0xf]  ;;  %v871_v43 = vld [vmem:[%s329_s11 + $0x4] sm:$0xf] }
 0x138   : > { %870 = vst [vmem:[%s853_s22] sm:$0xf] %v869_v42  ;;  %872 = vst [vmem:[%s853_s22 + $0x8] sm:$0xf] %v871_v43 }
 0x139 PF: > { %p10_p10 = scmp.ge.s32.totalorder %s1225_s16, 4   ;;  %s1412_s12 = smov %s1179_s13 }
 0x13a   : > { %s1413_s13 = smov %s1236_s19  ;;  %s1414_s14 = smov %s1225_s16 }
 0x13b   :  { %12 = sbr.rel (!%p10_p10) target bundleno = 2 (0x2), region = 156 }

// kernel: attention_3d_cnn_forward.4
= control target key start
LH: loop header
LB: loop body
LE: loop exit
PB: predicated region body
PF: predicated region fallthrough
CT: control target
= control target key end

     0   :  { %s5174_s0 = inlined_call_operand.vmem [shape: f32[9,16,1,1], index: 0, kind: input, shape index: {}]   ;;  %s5175_s1 = inlined_call_operand.<no memory space> [shape: f32[1,1], index: 1, kind: input, shape index: {}]   ;;  %s5176_s2 = inlined_call_operand.vmem [shape: bf16[16,4,10,10], index: 2, kind: input, shape index: {}]   ;;  %s5177_s3 = inlined_call_operand.vmem [shape: bf16[16,4,8,8], index: 3, kind: output, shape index: {}]  }
   0x1   :  { %v8_v0 = vstv %s5175_s1 }
   0x2   :  { %9 = vst [vmem:[#allocation2] sm:$0x1] %v8_v0 }
   0x3   :  { %s3671_s14 = smov 0   ;;  %s3673_s15 = smov 0  }
   0x4   :  { %s3675_s16 = smov 0  }
   0x5 LB: > { %s3234_s1 = sadd.s32 4294967295, %s3642_s16   ;;  %s3688_s17 = sadd.s32 1, %s3642_s16   ;;  %s3642_s16 = sphi %s3675_s16, %s5258_s16   ;;  %s3638_s15 = sphi %s3673_s15, %s5257_s15   ;;  %s3634_s14 = sphi %s3671_s14, %s5256_s14  }
   0x6   : > { %s61_s18 = ssub.s32 %s3642_s16, %s3688_s17  ;;  %s64_s19 = sadd.s32 1, %s3638_s15 }
   0x7   : > { %p62_p0 = scmp.eq.s32.totalorder %s61_s18, 0  ;;  %p71_p1 = scmp.ne.s32.totalorder %s3638_s15, %s3634_s14 }
   0x8   : > { %p72_p2 = scmp.eq.s32.totalorder %s3642_s16, 0  ;;  %p101_p3 = scmp.eq.s32.totalorder %s3234_s1, 3 }
   0x9   : > { %s3699_s20 = scalar_select %p62_p0, %s3638_s15, %s64_s19  }
   0xa   : > { %p73_p4 = por %p72_p2, %p71_p1  ;;  %p3701_p5 = por %p101_p3, %p71_p1 }
   0xb   : > { %p3237_p6 = scmp.ge.s32.totalorder %s3642_s16, 4 }
   0xd   : > { %129 = sbr.rel (%p3237_p6) target bundleno = 40 (0x28), region = 24 }
  0x14   : > { %132 = sbr.rel (!%p73_p4) target bundleno = 40 (0x28), region = 28  ;;  %s134_s22 = sand.u32 (%p73_p4), 1, %s3638_s15  }
  0x15   : > { %s3553_s23 = sshll.u32 (%p73_p4), %s3642_s16, 3  ;;  %s3238_s24 = sshll.u32 (%p73_p4), %s134_s22, 7 }
  0x16   : > { %s3711_s27 = scalar_lea.vmem (%p73_p4), %s5176_s2, %s3553_s23  ;;  %s136_s28 = scalar_lea.vmem (%p73_p4), [#allocation3], %s3238_s24 }
  0x17   : > { %v155_v1 = vld [vmem:[%s3711_s27] sm:$0xff] (%p73_p4)  }
  0x18   : > { %v159_v2 = vld [vmem:[%s3711_s27 + $0x20] sm:$0xff] (%p73_p4)   ;;  %156 = vst [vmem:[%s136_s28] sm:$0xff] (%p73_p4), %v155_v1  }
  0x19   : > { %v163_v3 = vld [vmem:[%s3711_s27 + $0x40] sm:$0xff] (%p73_p4)   ;;  %160 = vst [vmem:[%s136_s28 + $0x8] sm:$0xff] (%p73_p4), %v159_v2  }
  0x1a   : > { %164 = vst [vmem:[%s136_s28 + $0x10] sm:$0xff] (%p73_p4), %v163_v3   ;;  %v167_v4 = vld [vmem:[%s3711_s27 + $0x60] sm:$0xff] (%p73_p4)  }
  0x1b   : > { %v171_v5 = vld [vmem:[%s3711_s27 + $0x80] sm:$0xff]   ;;  %168 = vst [vmem:[%s136_s28 + $0x18] sm:$0xff] %v167_v4  }
  0x1c   : > { %v175_v6 = vld [vmem:[%s3711_s27 + $0xa0] sm:$0xff]   ;;  %172 = vst [vmem:[%s136_s28 + $0x20] sm:$0xff] %v171_v5  }
  0x1d   : > { %176 = vst [vmem:[%s136_s28 + $0x28] sm:$0xff] %v175_v6   ;;  %v179_v7 = vld [vmem:[%s3711_s27 + $0xc0] sm:$0xff]  }
  0x1e   : > { %v183_v8 = vld [vmem:[%s3711_s27 + $0xe0] sm:$0xff]   ;;  %180 = vst [vmem:[%s136_s28 + $0x30] sm:$0xff] %v179_v7  }
  0x1f   : > { %v187_v9 = vld [vmem:[%s3711_s27 + $0x100] sm:$0xff]   ;;  %184 = vst [vmem:[%s136_s28 + $0x38] sm:$0xff] %v183_v8  }
  0x20   : > { %188 = vst [vmem:[%s136_s28 + $0x40] sm:$0xff] %v187_v9   ;;  %v191_v10 = vld [vmem:[%s3711_s27 + $0x120] sm:$0xff]  }
  0x21   : > { %v195_v11 = vld [vmem:[%s3711_s27 + $0x140] sm:$0xff]   ;;  %192 = vst [vmem:[%s136_s28 + $0x48] sm:$0xff] %v191_v10  }
  0x22   : > { %v199_v12 = vld [vmem:[%s3711_s27 + $0x160] sm:$0xff]   ;;  %196 = vst [vmem:[%s136_s28 + $0x50] sm:$0xff] %v195_v11  }
  0x23   : > { %200 = vst [vmem:[%s136_s28 + $0x58] sm:$0xff] %v199_v12   ;;  %v203_v13 = vld [vmem:[%s3711_s27 + $0x180] sm:$0xff]  }
  0x24   : > { %v207_v14 = vld [vmem:[%s3711_s27 + $0x1a0] sm:$0xff]   ;;  %204 = vst [vmem:[%s136_s28 + $0x60] sm:$0xff] %v203_v13  }
  0x25   : > { %v211_v15 = vld [vmem:[%s3711_s27 + $0x1c0] sm:$0xff]   ;;  %208 = vst [vmem:[%s136_s28 + $0x68] sm:$0xff] %v207_v14  }
  0x26   : > { %212 = vst [vmem:[%s136_s28 + $0x70] sm:$0xff] %v211_v15   ;;  %v215_v16 = vld [vmem:[%s3711_s27 + $0x1e0] sm:$0xff]  }
  0x27   : > { %216 = vst [vmem:[%s136_s28 + $0x78] sm:$0xff] %v215_v16  }
  0x28 PF: > { %p3241_p7 = scmp.ge.s32.totalorder %s3642_s16, 1  ;;  %p304_p8 = scmp.lt.s32.totalorder %s3642_s16, 5 }
  0x2a   : > { %p305_p9 = pnand %p3241_p7, %p304_p8 }
  0x2c   : > { %308 = sbr.rel (%p305_p9) target bundleno = 957 (0x3bd), region = 69 }
  0x33   : > { %v3246_v17 = vld [vmem:[%s5174_s0 + $0x2] ss:$0 sm:$0xff]  ;;  %v3244_v18 = vld [vmem:[%s5174_s0] ss:$0 sm:$0xff]  ;;  %v3644_v19 = vmov 0   ;;  %s311_s7 = sand.u32 1, %s3634_s14  }
  0x34   : > { %3615 = vset.pattern.permute.xlu1 %v3644_v19  ;;  %3614 = vset.pattern.permute.xlu0 %v3644_v19  ;;  %v3247_v20 = vld [vmem:[%s5174_s0 + $0x3] ss:$0 sm:$0xff]  ;;  %v3245_v21 = vld [vmem:[%s5174_s0 + $0x1] ss:$0 sm:$0xff]  ;;  %v3249_v22 = vld [vmem:[%s5174_s0 + $0x5] ss:$0 sm:$0xff] }
  0x35   : > { %502 = vperm.xlu1 %3615, %v3246_v17   ;;  %494 = vperm.xlu0 %3614, %v3244_v18   ;;  %v3248_v23 = vld [vmem:[%s5174_s0 + $0x4] ss:$0 sm:$0xff]  ;;  %v3251_v24 = vld [vmem:[%s5174_s0 + $0x7] ss:$0 sm:$0xff]  ;;  %v3250_v25 = vld [vmem:[%s5174_s0 + $0x6] ss:$0 sm:$0xff] }
  0x36   : > { %v3253_v26 = vld [vmem:[%s5174_s0 + $0x9] ss:$0 sm:$0xff]  ;;  %v3252_v27 = vld [vmem:[%s5174_s0 + $0x8] ss:$0 sm:$0xff]  ;;  %v3255_v28 = vld [vmem:[%s5174_s0 + $0xb] ss:$0 sm:$0xff] }
  0x37   : > { %v3254_v29 = vld [vmem:[%s5174_s0 + $0xa] ss:$0 sm:$0xff]  ;;  %v3257_v30 = vld [vmem:[%s5174_s0 + $0xd] ss:$0 sm:$0xff]  ;;  %v3256_v31 = vld [vmem:[%s5174_s0 + $0xc] ss:$0 sm:$0xff] }
  0x38   : > { %v3259_v32 = vld [vmem:[%s5174_s0 + $0xf] ss:$0 sm:$0xff]  ;;  %v3258_v33 = vld [vmem:[%s5174_s0 + $0xe] ss:$0 sm:$0xff]  ;;  %v3277_v34 = vld [vmem:[%s5174_s0 + $0x11] ss:$0 sm:$0xff] }
  0x39   : > { %506 = vperm.xlu1 %3615, %v3247_v20   ;;  %498 = vperm.xlu0 %3614, %v3245_v21   ;;  %v3276_v35 = vld [vmem:[%s5174_s0 + $0x10] ss:$0 sm:$0xff]  ;;  %v3279_v36 = vld [vmem:[%s5174_s0 + $0x13] ss:$0 sm:$0xff]  ;;  %v3278_v37 = vld [vmem:[%s5174_s0 + $0x12] ss:$0 sm:$0xff] }
  0x3a   : > { %v3281_v38 = vld [vmem:[%s5174_s0 + $0x15] ss:$0 sm:$0xff]  ;;  %v3280_v39 = vld [vmem:[%s5174_s0 + $0x14] ss:$0 sm:$0xff]  ;;  %v3283_v40 = vld [vmem:[%s5174_s0 + $0x17] ss:$0 sm:$0xff] }
  0x3b   : > { %v3282_v41 = vld [vmem:[%s5174_s0 + $0x16] ss:$0 sm:$0xff]  ;;  %v3285_v42 = vld [vmem:[%s5174_s0 + $0x19] ss:$0 sm:$0xff]  ;;  %v3284_v43 = vld [vmem:[%s5174_s0 + $0x18] ss:$0 sm:$0xff] }
  0x3c   : > { %v3287_v44 = vld [vmem:[%s5174_s0 + $0x1b] ss:$0 sm:$0xff]  ;;  %v3286_v45 = vld [vmem:[%s5174_s0 + $0x1a] ss:$0 sm:$0xff]  ;;  %v3289_v46 = vld [vmem:[%s5174_s0 + $0x1d] ss:$0 sm:$0xff] }
  0x3d   : > { %514 = vperm.xlu1 %3615, %v3249_v22   ;;  %510 = vperm.xlu0 %3614, %v3248_v23   ;;  %v3288_v47 = vld [vmem:[%s5174_s0 + $0x1c] ss:$0 sm:$0xff]  ;;  %v3291_v48 = vld [vmem:[%s5174_s0 + $0x1f] ss:$0 sm:$0xff]  ;;  %v3290_v49 = vld [vmem:[%s5174_s0 + $0x1e] ss:$0 sm:$0xff] }
  0x3e   : > { %v3308_v50 = vld [vmem:[%s5174_s0 + $0x20] ss:$0 sm:$0xff]  ;;  %v3309_v51 = vld [vmem:[%s5174_s0 + $0x21] ss:$0 sm:$0xff]  ;;  %v3310_v52 = vld [vmem:[%s5174_s0 + $0x22] ss:$0 sm:$0xff] }
  0x3f   : > { %v3311_v53 = vld [vmem:[%s5174_s0 + $0x23] ss:$0 sm:$0xff]  ;;  %v3312_v54 = vld [vmem:[%s5174_s0 + $0x24] ss:$0 sm:$0xff]  ;;  %v3313_v55 = vld [vmem:[%s5174_s0 + $0x25] ss:$0 sm:$0xff] }
  0x40   : > { %v3314_v56 = vld [vmem:[%s5174_s0 + $0x26] ss:$0 sm:$0xff]  ;;  %v3315_v57 = vld [vmem:[%s5174_s0 + $0x27] ss:$0 sm:$0xff]  ;;  %v3316_v58 = vld [vmem:[%s5174_s0 + $0x28] ss:$0 sm:$0xff] }
  0x41   : > { %522 = vperm.xlu1 %3615, %v3251_v24   ;;  %518 = vperm.xlu0 %3614, %v3250_v25   ;;  %v3317_v59 = vld [vmem:[%s5174_s0 + $0x29] ss:$0 sm:$0xff]  ;;  %v3318_v60 = vld [vmem:[%s5174_s0 + $0x2a] ss:$0 sm:$0xff]  ;;  %v3319_v61 = vld [vmem:[%s5174_s0 + $0x2b] ss:$0 sm:$0xff] }
  0x42   : > { %v3320_v62 = vld [vmem:[%s5174_s0 + $0x2c] ss:$0 sm:$0xff]  ;;  %v3321_v63 = vld [vmem:[%s5174_s0 + $0x2d] ss:$0 sm:$0xff]  ;;  %v3322_v0 = vld [vmem:[%s5174_s0 + $0x2e] ss:$0 sm:$0xff] }
  0x43   : > { %v3323_v1 = vld [vmem:[%s5174_s0 + $0x2f] ss:$0 sm:$0xff]  ;;  %v3341_v2 = vld [vmem:[%s5174_s0 + $0x31] ss:$0 sm:$0xff]  ;;  %v3340_v3 = vld [vmem:[%s5174_s0 + $0x30] ss:$0 sm:$0xff] }
  0x44   : > { %v3343_v4 = vld [vmem:[%s5174_s0 + $0x33] ss:$0 sm:$0xff]  ;;  %v3342_v5 = vld [vmem:[%s5174_s0 + $0x32] ss:$0 sm:$0xff]  ;;  %v3345_v6 = vld [vmem:[%s5174_s0 + $0x35] ss:$0 sm:$0xff] }
  0x45   : > { %530 = vperm.xlu1 %3615, %v3253_v26   ;;  %526 = vperm.xlu0 %3614, %v3252_v27   ;;  %v3344_v7 = vld [vmem:[%s5174_s0 + $0x34] ss:$0 sm:$0xff]  ;;  %v3347_v8 = vld [vmem:[%s5174_s0 + $0x37] ss:$0 sm:$0xff]  ;;  %v3346_v9 = vld [vmem:[%s5174_s0 + $0x36] ss:$0 sm:$0xff] }
  0x46   : > { %v3349_v10 = vld [vmem:[%s5174_s0 + $0x39] ss:$0 sm:$0xff]  ;;  %v3348_v11 = vld [vmem:[%s5174_s0 + $0x38] ss:$0 sm:$0xff]  ;;  %v3351_v12 = vld [vmem:[%s5174_s0 + $0x3b] ss:$0 sm:$0xff] }
  0x47   : > { %v3350_v13 = vld [vmem:[%s5174_s0 + $0x3a] ss:$0 sm:$0xff]  ;;  %v3353_v14 = vld [vmem:[%s5174_s0 + $0x3d] ss:$0 sm:$0xff]  ;;  %v3352_v15 = vld [vmem:[%s5174_s0 + $0x3c] ss:$0 sm:$0xff] }
  0x48   : > { %v3355_v16 = vld [vmem:[%s5174_s0 + $0x3f] ss:$0 sm:$0xff]  ;;  %v3354_v17 = vld [vmem:[%s5174_s0 + $0x3e] ss:$0 sm:$0xff]  ;;  %v3373_v18 = vld [vmem:[%s5174_s0 + $0x41] ss:$0 sm:$0xff] }
  0x49   : > { %538 = vperm.xlu1 %3615, %v3255_v28   ;;  %534 = vperm.xlu0 %3614, %v3254_v29   ;;  %v3372_v19 = vld [vmem:[%s5174_s0 + $0x40] ss:$0 sm:$0xff]  ;;  %v3375_v22 = vld [vmem:[%s5174_s0 + $0x43] ss:$0 sm:$0xff]  ;;  %v3374_v23 = vld [vmem:[%s5174_s0 + $0x42] ss:$0 sm:$0xff] }
  0x4a   : > { %v3377_v26 = vld [vmem:[%s5174_s0 + $0x45] ss:$0 sm:$0xff]  ;;  %v3376_v27 = vld [vmem:[%s5174_s0 + $0x44] ss:$0 sm:$0xff]  ;;  %s3242_s12 = sshll.u32 %s311_s7, 7  ;;  %vm783_vm0 = vcmask 72712  }
  0x4b   : > { %s4002_s23 = scalar_lea.vmem [#allocation3], %s3242_s12  ;;  %vm997_vm1 = vcmask 80912   ;;  %s3645_s24 = smov 127   ;;  %vm1492_vm2 = vcmask 72713   ;;  %vm1524_vm3 = vcmask 65544   ;;  %vm573_vm4 = vcmask 64512  }
  0x4c   : > { %s3646_s19 = smov 126   ;;  %vm1758_vm5 = vcmask 80913   ;;  %vm1790_vm6 = vcmask 73744   ;;  %vm2289_vm7 = vcmask 72714   ;;  %vm2321_vm8 = vcmask 66568   ;;  %s3550_s14 = sshll.u32 (%p3701_p5), %s3234_s1, 2 }
  0x4d   : > { %546 = vperm.xlu1 %3615, %v3257_v30   ;;  %542 = vperm.xlu0 %3614, %v3256_v31   ;;  %v3379_v30 = vld [vmem:[%s5174_s0 + $0x47] ss:$0 sm:$0xff]  ;;  %v3378_v31 = vld [vmem:[%s5174_s0 + $0x46] ss:$0 sm:$0xff]  ;;  %vm2555_vm9 = vcmask 80914   ;;  %vm2587_vm10 = vcmask 74768   ;;  %s3078_s9 = scalar_lea.vmem (%p3701_p5), %s5177_s3, %s3550_s14 }
  0x4e   : > { %vm1293_vm11 = vcmask 1046528   ;;  %vm2090_vm12 = vcmask 1045504   ;;  %vm1227_vm13 = vcmask 64513   ;;  %vm1259_vm14 = vcmask 57344  }
  0x4f   : > { %vm2024_vm15 = vcmask 64514  }
  0x51   : > { %554 = vperm.xlu1 %3615, %v3259_v32   ;;  %550 = vperm.xlu0 %3614, %v3258_v33  }
  0x55   : > { %708 = vperm.xlu1 %3615, %v3277_v34   ;;  %704 = vperm.xlu0 %3614, %v3276_v35   ;;  %v3381_v34 = vld [vmem:[%s5174_s0 + $0x49] ss:$0 sm:$0xff]  ;;  %v3380_v35 = vld [vmem:[%s5174_s0 + $0x48] ss:$0 sm:$0xff] }
  0x59   : > { %716 = vperm.xlu1 %3615, %v3279_v36   ;;  %712 = vperm.xlu0 %3614, %v3278_v37  }
  0x5d   : > { %724 = vperm.xlu1 %3615, %v3281_v38   ;;  %720 = vperm.xlu0 %3614, %v3280_v39   ;;  %v3405_v38 = vld [vmem:[%s5174_s0 + $0x51] ss:$0 sm:$0xff]  ;;  %v3404_v39 = vld [vmem:[%s5174_s0 + $0x50] ss:$0 sm:$0xff] }
  0x61   : > { %732 = vperm.xlu1 %3615, %v3283_v40   ;;  %728 = vperm.xlu0 %3614, %v3282_v41  }
  0x65   : > { %740 = vperm.xlu1 %3615, %v3285_v42   ;;  %736 = vperm.xlu0 %3614, %v3284_v43   ;;  %v3407_v42 = vld [vmem:[%s5174_s0 + $0x53] ss:$0 sm:$0xff]  ;;  %v3406_v43 = vld [vmem:[%s5174_s0 + $0x52] ss:$0 sm:$0xff] }
  0x69   : > { %748 = vperm.xlu1 %3615, %v3287_v44   ;;  %744 = vperm.xlu0 %3614, %v3286_v45  }
  0x6d   : > { %756 = vperm.xlu1 %3615, %v3289_v46   ;;  %752 = vperm.xlu0 %3614, %v3288_v47   ;;  %v3469_v46 = vld [vmem:[%s5174_s0 + $0x71] ss:$0 sm:$0xff]  ;;  %v3468_v47 = vld [vmem:[%s5174_s0 + $0x70] ss:$0 sm:$0xff] }
  0x71   : > { %764 = vperm.xlu1 %3615, %v3291_v48   ;;  %760 = vperm.xlu0 %3614, %v3290_v49   ;;  %v339_v48 = vld [vmem:[%s4002_s23 + $0x8] ss:$16 sps:$4 sm:$0xff]  }
  0x75   : > { %918 = vperm.xlu1 %3615, %v3308_v50   ;;  %922 = vperm.xlu0 %3614, %v3309_v51   ;;  %v337_v51 = vld [vmem:[%s4002_s23] ss:$16 sps:$4 sm:$0xff]  }
  0x79   : > { %926 = vperm.xlu1 %3615, %v3310_v52   ;;  %930 = vperm.xlu0 %3614, %v3311_v53   ;;  %v4010_v52 = vunpack.c.l.bf16 %v337_v51  ;;  %v4012_v53 = vunpack.c.l.bf16 %v339_v48 }
  0x7d   : > { %934 = vperm.xlu1 %3615, %v3312_v54   ;;  %938 = vperm.xlu0 %3614, %v3313_v55  }
  0x81   : > { %942 = vperm.xlu1 %3615, %v3314_v56   ;;  %946 = vperm.xlu0 %3614, %v3315_v57  }
  0x85   : > { %950 = vperm.xlu1 %3615, %v3316_v58   ;;  %954 = vperm.xlu0 %3614, %v3317_v59   ;;  %v4016_v58 = vunpack.c.h.bf16 %v337_v51  ;;  %v4018_v59 = vunpack.c.h.bf16 %v339_v48 }
  0x87   : > { %5208 = vst [vmem:[#allocation5_spill] sm:$0xff] %v4016_v58  ;;  %5209 = vst [vmem:[#allocation6_spill] sm:$0xff] %v4018_v59 }
  0x89   : > { %958 = vperm.xlu1 %3615, %v3318_v60   ;;  %962 = vperm.xlu0 %3614, %v3319_v61  }
  0x8d   : > { %966 = vperm.xlu1 %3615, %v3320_v62   ;;  %970 = vperm.xlu0 %3614, %v3321_v63   ;;  %v343_v62 = vld [vmem:[%s4002_s23 + $0x20] ss:$8 sps:$4 sm:$0xff]  }
  0x91   : > { %974 = vperm.xlu1 %3615, %v3322_v0   ;;  %978 = vperm.xlu0 %3614, %v3323_v1  }
  0x95   : > { %1136 = vperm.xlu1 %3615, %v3341_v2   ;;  %1132 = vperm.xlu0 %3614, %v3340_v3  }
  0x99   : > { %1144 = vperm.xlu1 %3615, %v3343_v4   ;;  %1140 = vperm.xlu0 %3614, %v3342_v5   ;;  %v4025_v4 = vunpack.c.h.bf16 %v343_v62  ;;  %v4027_v5 = vunpack.c.l.bf16 %v343_v62 }
  0x9b   : > { %5210 = vst [vmem:[#allocation7_spill] sm:$0xff] %v4027_v5 }
  0x9d   : > { %1152 = vperm.xlu1 %3615, %v3345_v6   ;;  %1148 = vperm.xlu0 %3614, %v3344_v7   ;;  %v347_v7 = vld [vmem:[%s4002_s23 + $0x30] ss:$8 sps:$4 sm:$0xff]  }
  0xa1   : > { %1160 = vperm.xlu1 %3615, %v3347_v8   ;;  %1156 = vperm.xlu0 %3614, %v3346_v9  }
  0xa5   : > { %1168 = vperm.xlu1 %3615, %v3349_v10   ;;  %1164 = vperm.xlu0 %3614, %v3348_v11  }
  0xa9   : > { %1176 = vperm.xlu1 %3615, %v3351_v12   ;;  %1172 = vperm.xlu0 %3614, %v3350_v13  }
  0xad   : > { %1184 = vperm.xlu1 %3615, %v3353_v14   ;;  %1180 = vperm.xlu0 %3614, %v3352_v15   ;;  %v4034_v15 = vunpack.c.h.bf16 %v347_v7 }
  0xb1   : > { %1192 = vperm.xlu1 %3615, %v3355_v16   ;;  %1188 = vperm.xlu0 %3614, %v3354_v17   ;;  %v4036_v16 = vunpack.c.l.bf16 %v347_v7 }
  0xb4   : > { %v3929_v20 = vpop.permute.xlu1 %502  ;;  %v3931_v21 = vpop.permute.xlu0 %494 }
  0xb5   : > { %1401 = vperm.xlu1 %3615, %v3373_v18   ;;  %1397 = vperm.xlu0 %3614, %v3372_v19   ;;  %v351_v18 = vld [vmem:[%s4002_s23 + $0x40] ss:$8 sps:$4 sm:$0xff]  }
  0xb8   : > { %v3939_v24 = vpop.permute.xlu1 %506  ;;  %v3941_v25 = vpop.permute.xlu0 %498 }
  0xb9   : > { %1409 = vperm.xlu1 %3615, %v3375_v22   ;;  %1405 = vperm.xlu0 %3614, %v3374_v23  }
  0xbc   : > { %v3949_v28 = vpop.permute.xlu1 %514  ;;  %v3951_v29 = vpop.permute.xlu0 %510 }
  0xbd   : > { %1417 = vperm.xlu1 %3615, %v3377_v26   ;;  %1413 = vperm.xlu0 %3614, %v3376_v27  }
  0xc0   : > { %v3959_v32 = vpop.permute.xlu1 %522  ;;  %v3961_v33 = vpop.permute.xlu0 %518 }
  0xc1   : > { %1425 = vperm.xlu1 %3615, %v3379_v30   ;;  %1421 = vperm.xlu0 %3614, %v3378_v31  }
  0xc4   : > { %v3969_v36 = vpop.permute.xlu1 %530  ;;  %v3971_v37 = vpop.permute.xlu0 %526 }
  0xc5   : > { %1433 = vperm.xlu1 %3615, %v3381_v34   ;;  %1429 = vperm.xlu0 %3614, %v3380_v35   ;;  %v4043_v34 = vunpack.c.h.bf16 %v351_v18  ;;  %v4045_v35 = vunpack.c.l.bf16 %v351_v18 }
  0xc8   : > { %v3979_v40 = vpop.permute.xlu1 %538  ;;  %v3981_v41 = vpop.permute.xlu0 %534 }
  0xc9   : > { %1667 = vperm.xlu1 %3615, %v3405_v38   ;;  %1663 = vperm.xlu0 %3614, %v3404_v39   ;;  %v355_v39 = vld [vmem:[%s4002_s23 + $0x50] ss:$8 sps:$4 sm:$0xff]  }
  0xcc   : > { %v3992_v44 = vpop.permute.xlu1 %546  ;;  %v3994_v45 = vpop.permute.xlu0 %542 }
  0xcd   : > { %1675 = vperm.xlu1 %3615, %v3407_v42   ;;  %1671 = vperm.xlu0 %3614, %v3406_v43  }
  0xd0   : > { %v4005_v49 = vpop.permute.xlu1 %554  ;;  %v4007_v50 = vpop.permute.xlu0 %550 }
  0xd1   : > { %2198 = vperm.xlu1 %3615, %v3469_v46   ;;  %2194 = vperm.xlu0 %3614, %v3468_v47  }
  0xd4   : > { %v709_v54 = vpop.permute.xlu1 %708  ;;  %v705_v55 = vpop.permute.xlu0 %704 }
  0xd5   : > { %v768_v56 = vmul.f32 %v709_v54, %v4012_v53  ;;  %v767_v57 = vmul.f32 %v705_v55, %v4010_v52  ;;  %v4052_v55 = vunpack.c.h.bf16 %v355_v39 }
  0xd7   : > { %v785_v60 = vsel %vm783_vm0, %v768_v56, 0.0  ;;  %v784_v61 = vsel %vm783_vm0, %v767_v57, 0.0  ;;  %v4054_v56 = vunpack.c.l.bf16 %v355_v39 }
  0xd8   : > { %v717_v63 = vpop.permute.xlu1 %716  ;;  %v713_v0 = vpop.permute.xlu0 %712  ;;  %v786_v3 = vadd.f32 %v785_v60, %v784_v61  ;;  %v359_v60 = vld [vmem:[%s4002_s23 + $0x60] ss:$8 sps:$4 sm:$0xff]  }
  0xd9   : > { %v770_v1 = vmul.f32 %v717_v63, %v4018_v59  ;;  %v769_v2 = vmul.f32 %v713_v0, %v4016_v58  ;;  %v4063_v7 = vunpack.c.l.bf16 %v359_v60 }
  0xdb   : > { %v787_v6 = vsel %vm783_vm0, %v769_v2, 0.0  ;;  %v789_v11 = vsel %vm783_vm0, %v770_v1, 0.0 }
  0xdc   : > { %v788_v8 = vadd.f32 %v787_v6, %v786_v3  ;;  %v725_v9 = vpop.permute.xlu1 %724  ;;  %v721_v10 = vpop.permute.xlu0 %720  ;;  %v4061_v6 = vunpack.c.h.bf16 %v359_v60 }
  0xdd   : > { %v772_v12 = vmul.f32 %v725_v9, %v4025_v4  ;;  %v771_v13 = vmul.f32 %v721_v10, %v4027_v5  ;;  %v363_v9 = vld [vmem:[%s4002_s23 + $0x70] ss:$8 sps:$4 sm:$0xff]  }
  0xde   : > { %v790_v14 = vadd.f32 %v789_v11, %v788_v8 }
  0xdf   : > { %v791_v17 = vsel %vm783_vm0, %v771_v13, 0.0  ;;  %v793_v26 = vsel %vm783_vm0, %v772_v12, 0.0 }
  0xe0   : > { %v792_v19 = vadd.f32 %v791_v17, %v790_v14  ;;  %v733_v22 = vpop.permute.xlu1 %732  ;;  %v729_v23 = vpop.permute.xlu0 %728 }
  0xe1   : > { %v774_v27 = vmul.f32 %v733_v22, %v4034_v15  ;;  %v773_v30 = vmul.f32 %v729_v23, %v4036_v16  ;;  %v4072_v22 = vunpack.c.l.bf16 %v363_v9 }
  0xe2   : > { %v794_v31 = vadd.f32 %v793_v26, %v792_v19  ;;  %v4070_v19 = vunpack.c.h.bf16 %v363_v9 }
  0xe3   : > { %v795_v38 = vsel %vm783_vm0, %v773_v30, 0.0  ;;  %v797_v47 = vsel %vm783_vm0, %v774_v27, 0.0 }
  0xe4   : > { %v796_v42 = vadd.f32 %v795_v38, %v794_v31  ;;  %v741_v43 = vpop.permute.xlu1 %740  ;;  %v737_v46 = vpop.permute.xlu0 %736 }
  0xe5   : > { %v776_v48 = vmul.f32 %v741_v43, %v4043_v34  ;;  %v775_v51 = vmul.f32 %v737_v46, %v4045_v35 }
  0xe6   : > { %v798_v54 = vadd.f32 %v797_v47, %v796_v42 }
  0xe7   : > { %v799_v57 = vsel %vm783_vm0, %v775_v51, 0.0  ;;  %v801_v0 = vsel %vm783_vm0, %v776_v48, 0.0 }
  0xe8   : > { %v800_v61 = vadd.f32 %v799_v57, %v798_v54  ;;  %v749_v62 = vpop.permute.xlu1 %748  ;;  %v745_v63 = vpop.permute.xlu0 %744 }
  0xe9   : > { %v778_v1 = vmul.f32 %v749_v62, %v4052_v55  ;;  %v777_v2 = vmul.f32 %v745_v63, %v4054_v56 }
  0xea   : > { %v802_v3 = vadd.f32 %v801_v0, %v800_v61 }
  0xeb   : > { %v803_v8 = vsel %vm783_vm0, %v777_v2, 0.0  ;;  %v805_v13 = vsel %vm783_vm0, %v778_v1, 0.0 }
  0xec   : > { %v804_v10 = vadd.f32 %v803_v8, %v802_v3  ;;  %v757_v11 = vpop.permute.xlu1 %756  ;;  %v753_v12 = vpop.permute.xlu0 %752  ;;  %v3408_v3 = vld [vmem:[%s5174_s0 + $0x54] ss:$0 sm:$0xff] }
  0xed   : > { %v780_v14 = vmul.f32 %v757_v11, %v4061_v6  ;;  %v779_v17 = vmul.f32 %v753_v12, %v4063_v7 }
  0xee   : > { %v806_v18 = vadd.f32 %v805_v13, %v804_v10 }
  0xef   : > { %v807_v23 = vsel %vm783_vm0, %v779_v17, 0.0  ;;  %v809_v31 = vsel %vm783_vm0, %v780_v14, 0.0 }
  0xf0   : > { %v808_v26 = vadd.f32 %v807_v23, %v806_v18  ;;  %v765_v27 = vpop.permute.xlu1 %764  ;;  %v761_v30 = vpop.permute.xlu0 %760  ;;  %v3500_v18 = vld [vmem:[%s5174_s0 + $0x80] ss:$0 sm:$0xff] }
  0xf1   : > { %v782_v38 = vmul.f32 %v765_v27, %v4070_v19  ;;  %v781_v39 = vmul.f32 %v761_v30, %v4072_v22 }
  0xf2   : > { %v810_v42 = vadd.f32 %v809_v31, %v808_v26 }
  0xf3   : > { %v811_v43 = vsel %vm783_vm0, %v781_v39, 0.0  ;;  %v813_v51 = vsel %vm783_vm0, %v782_v38, 0.0  ;;  %vm2056_vm0 = vcmask 58368  }
  0xf4   : > { %v812_v46 = vadd.f32 %v811_v43, %v810_v42  ;;  %v919_v47 = vpop.permute.xlu1 %918  ;;  %v923_v48 = vpop.permute.xlu0 %922  ;;  %v3409_v43 = vld [vmem:[%s5174_s0 + $0x55] ss:$0 sm:$0xff] }
  0xf5   : > { %v981_v54 = vmul.f32 %v919_v47, %v4010_v52  ;;  %v982_v57 = vmul.f32 %v923_v48, %v4012_v53 }
  0xf6   : > { %v814_v60 = vadd.f32 %v813_v51, %v812_v46 }
  0xf7   : > { %v998_v61 = vsel %vm997_vm1, %v981_v54, 0.0  ;;  %v999_v62 = vsel %vm997_vm1, %v982_v57, 0.0 }
  0xf8   : > { %v927_v63 = vpop.permute.xlu1 %926  ;;  %v931_v0 = vpop.permute.xlu0 %930  ;;  %816 = vrot.lane.b32.xlu0 %v814_v60, %s3645_s24  ;;  %v1000_v8 = vadd.f32 %v999_v62, %v998_v61  ;;  %v3502_v62 = vld [vmem:[%s5174_s0 + $0x82] ss:$0 sm:$0xff] }
  0xf9   : > { %v983_v1 = vmul.f32 %v927_v63, %v4016_v58  ;;  %v984_v2 = vmul.f32 %v931_v0, %v4018_v59 }
  0xfb   : > { %v1001_v9 = vsel %vm997_vm1, %v983_v1, 0.0  ;;  %v1003_v13 = vsel %vm997_vm1, %v984_v2, 0.0 }
  0xfc   : > { %v1002_v10 = vadd.f32 %v1001_v9, %v1000_v8  ;;  %v935_v11 = vpop.permute.xlu1 %934  ;;  %v939_v12 = vpop.permute.xlu0 %938  ;;  %1679 = vperm.xlu0 %3614, %v3408_v3  }
  0xfd   : > { %v985_v14 = vmul.f32 %v935_v11, %v4027_v5  ;;  %v986_v17 = vmul.f32 %v939_v12, %v4025_v4  ;;  %v3472_v11 = vld [vmem:[%s5174_s0 + $0x74] ss:$0 sm:$0xff] }
  0xfe   : > { %v1004_v23 = vadd.f32 %v1003_v13, %v1002_v10 }
  0xff   : > { %v1005_v26 = vsel %vm997_vm1, %v985_v14, 0.0  ;;  %v1007_v38 = vsel %vm997_vm1, %v986_v17, 0.0 }
 0x100   : > { %v1006_v27 = vadd.f32 %v1005_v26, %v1004_v23  ;;  %v943_v30 = vpop.permute.xlu1 %942  ;;  %v947_v31 = vpop.permute.xlu0 %946  ;;  %2460 = vperm.xlu0 %3614, %v3500_v18  }
 0x101   : > { %v987_v39 = vmul.f32 %v943_v30, %v4036_v16  ;;  %v988_v42 = vmul.f32 %v947_v31, %v4034_v15  ;;  %v3411_v30 = vld [vmem:[%s5174_s0 + $0x57] ss:$0 sm:$0xff] }
 0x102   : > { %v1008_v46 = vadd.f32 %v1007_v38, %v1006_v27 }
 0x103   : > { %v1009_v47 = vsel %vm997_vm1, %v987_v39, 0.0  ;;  %v1011_v57 = vsel %vm997_vm1, %v988_v42, 0.0 }
 0x104   : > { %v1010_v48 = vadd.f32 %v1009_v47, %v1008_v46  ;;  %v951_v51 = vpop.permute.xlu1 %950  ;;  %v955_v54 = vpop.permute.xlu0 %954  ;;  %1683 = vperm.xlu0 %3614, %v3409_v43  }
 0x105   : > { %v989_v60 = vmul.f32 %v951_v51, %v4045_v35  ;;  %v990_v61 = vmul.f32 %v955_v54, %v4043_v34  ;;  %v3504_v51 = vld [vmem:[%s5174_s0 + $0x84] ss:$0 sm:$0xff] }
 0x106   : > { %v1012_v63 = vadd.f32 %v1011_v57, %v1010_v48 }
 0x107   : > { %v1013_v0 = vsel %vm997_vm1, %v989_v60, 0.0  ;;  %v1015_v8 = vsel %vm997_vm1, %v990_v61, 0.0 }
 0x108   : > { %v1014_v1 = vadd.f32 %v1013_v0, %v1012_v63  ;;  %v959_v2 = vpop.permute.xlu1 %958  ;;  %v963_v3 = vpop.permute.xlu0 %962  ;;  %2468 = vperm.xlu0 %3614, %v3502_v62   ;;  %v3474_v0 = vld [vmem:[%s5174_s0 + $0x76] ss:$0 sm:$0xff] }
 0x109   : > { %v991_v9 = vmul.f32 %v959_v2, %v4054_v56  ;;  %v992_v10 = vmul.f32 %v963_v3, %v4052_v55 }
 0x10a   : > { %v1016_v12 = vadd.f32 %v1015_v8, %v1014_v1  ;;  %v3470_v8 = vld [vmem:[%s5174_s0 + $0x72] ss:$0 sm:$0xff] }
 0x10b   : > { %v1017_v13 = vsel %vm997_vm1, %v991_v9, 0.0  ;;  %v1019_v23 = vsel %vm997_vm1, %v992_v10, 0.0  ;;  %v3382_v9 = vld [vmem:[%s5174_s0 + $0x4a] ss:$0 sm:$0xff] }
 0x10c   : > { %v1018_v14 = vadd.f32 %v1017_v13, %v1016_v12  ;;  %v967_v17 = vpop.permute.xlu1 %966  ;;  %v971_v18 = vpop.permute.xlu0 %970  ;;  %2210 = vperm.xlu0 %3614, %v3472_v11   ;;  %v3501_v12 = vld [vmem:[%s5174_s0 + $0x81] ss:$0 sm:$0xff]  ;;  %v3475_v13 = vld [vmem:[%s5174_s0 + $0x77] ss:$0 sm:$0xff] }
 0x10d   : > { %v993_v26 = vmul.f32 %v967_v17, %v4063_v7  ;;  %v994_v27 = vmul.f32 %v971_v18, %v4061_v6  ;;  %v3471_v18 = vld [vmem:[%s5174_s0 + $0x73] ss:$0 sm:$0xff] }
 0x10e   : > { %v1020_v31 = vadd.f32 %v1019_v23, %v1018_v14  ;;  %v3383_v23 = vld [vmem:[%s5174_s0 + $0x4b] ss:$0 sm:$0xff] }
 0x10f   : > { %v1021_v38 = vsel %vm997_vm1, %v993_v26, 0.0  ;;  %v1023_v46 = vsel %vm997_vm1, %v994_v27, 0.0 }
 0x110   : > { %v1022_v39 = vadd.f32 %v1021_v38, %v1020_v31  ;;  %v975_v42 = vpop.permute.xlu1 %974  ;;  %v979_v43 = vpop.permute.xlu0 %978  ;;  %1691 = vperm.xlu0 %3614, %v3411_v30   ;;  %v3410_v30 = vld [vmem:[%s5174_s0 + $0x56] ss:$0 sm:$0xff]  ;;  %v3476_v31 = vld [vmem:[%s5174_s0 + $0x78] ss:$0 sm:$0xff] }
 0x111   : > { %v995_v47 = vmul.f32 %v975_v42, %v4072_v22  ;;  %v996_v48 = vmul.f32 %v979_v43, %v4070_v19  ;;  %v3503_v42 = vld [vmem:[%s5174_s0 + $0x83] ss:$0 sm:$0xff]  ;;  %v3384_v43 = vld [vmem:[%s5174_s0 + $0x4c] ss:$0 sm:$0xff] }
 0x112   : > { %v1024_v54 = vadd.f32 %v1023_v46, %v1022_v39 }
 0x113   : > { %v1025_v57 = vsel %vm997_vm1, %v995_v47, 0.0  ;;  %v1027_v63 = vsel %vm997_vm1, %v996_v48, 0.0  ;;  %v3473_v48 = vld [vmem:[%s5174_s0 + $0x75] ss:$0 sm:$0xff]  ;;  %vm2778_vm1 = vsmask.f32 3328 }
 0x114   : > { %v1026_v60 = vadd.f32 %v1025_v57, %v1024_v54  ;;  %v4133_v61 = vpop.permute.xlu1 %1136  ;;  %v4135_v62 = vpop.permute.xlu0 %1132  ;;  %2476 = vperm.xlu0 %3614, %v3504_v51   ;;  %v3477_v51 = vld [vmem:[%s5174_s0 + $0x79] ss:$0 sm:$0xff]  ;;  %v336_v54 = vld [vmem:[%s4002_s23 + $0xc] sm:$0x1]  ;;  %v334_v57 = vld [vmem:[%s4002_s23 + $0x4] sm:$0x1] }
 0x115   : > { %5211 = vst [vmem:[#allocation8_spill] sm:$0xff] %v4135_v62 }
 0x116   : > { %v1028_v1 = vadd.f32 %v1027_v63, %v1026_v60 }
 0x118   : > { %v4141_v2 = vpop.permute.xlu1 %1144  ;;  %v4143_v3 = vpop.permute.xlu0 %1140  ;;  %1030 = vrot.lane.b32.xlu1 %v1028_v1, %s3646_s19  ;;  %2218 = vperm.xlu0 %3614, %v3474_v0   ;;  %v3412_v0 = vld [vmem:[%s5174_s0 + $0x58] ss:$0 sm:$0xff]  ;;  %v3385_v1 = vld [vmem:[%s5174_s0 + $0x4d] ss:$0 sm:$0xff] }
 0x119   : > { %5212 = vst [vmem:[#allocation9_spill] sm:$0xff] %v4141_v2  ;;  %5213 = vst [vmem:[#allocation10_spill] sm:$0xff] %v4143_v3 }
 0x11c   : > { %v4152_v10 = vpop.permute.xlu1 %1152  ;;  %v4154_v11 = vpop.permute.xlu0 %1148  ;;  %2202 = vperm.xlu1 %3615, %v3470_v8   ;;  %1437 = vperm.xlu0 %3614, %v3382_v9   ;;  %v4214_v8 = vunpack.c.l.bf16 %v336_v54  ;;  %v4216_v9 = vunpack.c.l.bf16 %v334_v57 }
 0x11d   : > { %5214 = vst [vmem:[#allocation11_spill] sm:$0xff] %v4152_v10  ;;  %5215 = vst [vmem:[#allocation12_spill] sm:$0xff] %v4154_v11 }
 0x11e   : > { %5226 = vst [vmem:[#allocation23_spill] sm:$0xff] %v4216_v9 }
 0x120   : > { %v4162_v14 = vpop.permute.xlu1 %1160  ;;  %v4164_v17 = vpop.permute.xlu0 %1156  ;;  %2464 = vperm.xlu1 %3615, %v3501_v12   ;;  %2222 = vperm.xlu0 %3614, %v3475_v13   ;;  %v340_v12 = vld [vmem:[%s4002_s23 + $0x1c] sm:$0x1]  ;;  %v338_v13 = vld [vmem:[%s4002_s23 + $0x14] sm:$0x1] }
 0x121   : > { %5216 = vst [vmem:[#allocation13_spill] sm:$0xff] %v4162_v14  ;;  %5217 = vst [vmem:[#allocation14_spill] sm:$0xff] %v4164_v17  ;;  %v4230_v54 = vunpack.c.l.bf16 %v340_v12  ;;  %v4232_v57 = vunpack.c.l.bf16 %v338_v13 }
 0x123   : > { %5227 = vst [vmem:[#allocation24_spill] sm:$0xff] %v4230_v54  ;;  %5228 = vst [vmem:[#allocation25_spill] sm:$0xff] %v4232_v57 }
 0x124   : > { %v4172_v26 = vpop.permute.xlu1 %1168  ;;  %v4174_v27 = vpop.permute.xlu0 %1164  ;;  %2206 = vperm.xlu1 %3615, %v3471_v18   ;;  %1441 = vperm.xlu0 %3614, %v3383_v23  }
 0x125   : > { %5218 = vst [vmem:[#allocation15_spill] sm:$0xff] %v4172_v26  ;;  %5219 = vst [vmem:[#allocation16_spill] sm:$0xff] %v4174_v27  ;;  %v348_v27 = vld [vmem:[%s4002_s23 + $0x3c] sm:$0x1] }
 0x128   : > { %v4182_v38 = vpop.permute.xlu1 %1176  ;;  %v4184_v39 = vpop.permute.xlu0 %1172  ;;  %1687 = vperm.xlu1 %3615, %v3410_v30   ;;  %2226 = vperm.xlu0 %3614, %v3476_v31  }
 0x129   : > { %5220 = vst [vmem:[#allocation17_spill] sm:$0xff] %v4182_v38  ;;  %5221 = vst [vmem:[#allocation18_spill] sm:$0xff] %v4184_v39 }
 0x12c   : > { %v4192_v46 = vpop.permute.xlu1 %1184  ;;  %v4194_v47 = vpop.permute.xlu0 %1180  ;;  %2472 = vperm.xlu1 %3615, %v3503_v42   ;;  %1445 = vperm.xlu0 %3614, %v3384_v43  }
 0x12d   : > { %5222 = vst [vmem:[#allocation19_spill] sm:$0xff] %v4192_v46  ;;  %5223 = vst [vmem:[#allocation20_spill] sm:$0xff] %v4194_v47 }
 0x130   : > { %v4204_v60 = vpop.permute.xlu1 %1192  ;;  %v4206_v63 = vpop.permute.xlu0 %1188  ;;  %2214 = vperm.xlu1 %3615, %v3473_v48   ;;  %2230 = vperm.xlu0 %3614, %v3477_v51   ;;  %v3505_v48 = vld [vmem:[%s5174_s0 + $0x85] ss:$0 sm:$0xff]  ;;  %v3478_v51 = vld [vmem:[%s5174_s0 + $0x7a] ss:$0 sm:$0xff] }
 0x131   : > { %5224 = vst [vmem:[#allocation21_spill] sm:$0xff] %v4204_v60  ;;  %5225 = vst [vmem:[#allocation22_spill] sm:$0xff] %v4206_v63  ;;  %v344_v60 = vld [vmem:[%s4002_s23 + $0x2c] sm:$0x1]  ;;  %v342_v63 = vld [vmem:[%s4002_s23 + $0x24] sm:$0x1] }
 0x134   : > { %v1402_v18 = vpop.permute.xlu1 %1401  ;;  %v1398_v23 = vpop.permute.xlu0 %1397  ;;  %1695 = vperm.xlu1 %3615, %v3412_v0   ;;  %1449 = vperm.xlu0 %3614, %v3385_v1  }
 0x135   : > { %v1462_v30 = vmul.f32 %v1402_v18, %v4012_v53  ;;  %v1463_v31 = vmul.f32 %v1402_v18, %v4214_v8  ;;  %v1460_v42 = vmul.f32 %v1398_v23, %v4010_v52  ;;  %v1461_v43 = vmul.f32 %v1398_v23, %v4216_v9 }
 0x137   : > { %v1494_v0 = vsel %vm1492_vm2, %v1462_v30, 0.0  ;;  %v1526_v1 = vsel %vm1524_vm3, %v1463_v31, 0.0  ;;  %v1493_v18 = vsel %vm1492_vm2, %v1460_v42, 0.0  ;;  %v1525_v23 = vsel %vm1524_vm3, %v1461_v43, 0.0  ;;  %v3413_v42 = vld [vmem:[%s5174_s0 + $0x59] ss:$0 sm:$0xff] }
 0x138   : > { %v1410_v46 = vpop.permute.xlu1 %1409  ;;  %v1406_v47 = vpop.permute.xlu0 %1405  ;;  %2480 = vperm.xlu1 %3615, %v3505_v48   ;;  %2234 = vperm.xlu0 %3614, %v3478_v51   ;;  %v3386_v43 = vld [vmem:[%s5174_s0 + $0x4e] ss:$0 sm:$0xff]  ;;  %v1495_v38 = vadd.f32 %v1494_v0, %v1493_v18  ;;  %v1527_v39 = vadd.f32 %v1526_v1, %v1525_v23  ;;  %v4250_v48 = vunpack.c.l.bf16 %v344_v60  ;;  %v4252_v51 = vunpack.c.l.bf16 %v342_v63  ;;  %v3506_v23 = vld [vmem:[%s5174_s0 + $0x86] ss:$0 sm:$0xff] }
 0x139   : > { %v1466_v12 = vmul.f32 %v1410_v46, %v4018_v59  ;;  %v1467_v13 = vmul.f32 %v1410_v46, %v4230_v54  ;;  %v1464_v30 = vmul.f32 %v1406_v47, %v4016_v58  ;;  %v1465_v31 = vmul.f32 %v1406_v47, %v4232_v57  ;;  %v346_v47 = vld [vmem:[%s4002_s23 + $0x34] sm:$0x1] }
 0x13a   : > { %5229 = vst [vmem:[#allocation26_spill] sm:$0xff] %v4252_v51 }
 0x13b   : > { %v1496_v46 = vsel %vm1492_vm2, %v1464_v30, 0.0  ;;  %v1528_v26 = vsel %vm1524_vm3, %v1465_v31, 0.0  ;;  %v1498_v14 = vsel %vm1492_vm2, %v1466_v12, 0.0  ;;  %v1530_v17 = vsel %vm1524_vm3, %v1467_v13, 0.0  ;;  %v350_v31 = vld [vmem:[%s4002_s23 + $0x44] sm:$0x1] }
 0x13c   : > { %v1497_v10 = vadd.f32 %v1496_v46, %v1495_v38  ;;  %v1529_v11 = vadd.f32 %v1528_v26, %v1527_v39  ;;  %v1418_v2 = vpop.permute.xlu1 %1417  ;;  %v1414_v0 = vpop.permute.xlu0 %1413  ;;  %1699 = vperm.xlu1 %3615, %v3413_v42   ;;  %1453 = vperm.xlu0 %3614, %v3386_v43   ;;  %v3479_v26 = vld [vmem:[%s5174_s0 + $0x7b] ss:$0 sm:$0xff]  ;;  %v4270_v12 = vunpack.c.l.bf16 %v348_v27  ;;  %v4272_v13 = vunpack.c.l.bf16 %v346_v47  ;;  %v3414_v27 = vld [vmem:[%s5174_s0 + $0x5a] ss:$0 sm:$0xff]  ;;  %v3387_v47 = vld [vmem:[%s5174_s0 + $0x4f] ss:$0 sm:$0xff] }
 0x13d   : > { %v1470_v60 = vmul.f32 %v1418_v2, %v4025_v4  ;;  %v1471_v63 = vmul.f32 %v1418_v2, %v4250_v48  ;;  %v1468_v1 = vmul.f32 %v1414_v0, %v4027_v5  ;;  %v1469_v18 = vmul.f32 %v1414_v0, %v4252_v51 }
 0x13e   : > { %v1499_v38 = vadd.f32 %v1498_v14, %v1497_v10  ;;  %v1531_v39 = vadd.f32 %v1530_v17, %v1529_v11 }
 0x13f   : > { %v1500_v2 = vsel %vm1492_vm2, %v1468_v1, 0.0  ;;  %v1532_v30 = vsel %vm1524_vm3, %v1469_v18, 0.0  ;;  %v1502_v42 = vsel %vm1492_vm2, %v1470_v60, 0.0  ;;  %v1534_v43 = vsel %vm1524_vm3, %v1471_v63, 0.0 }
 0x140   : > { %v1501_v46 = vadd.f32 %v1500_v2, %v1499_v38  ;;  %v1533_v0 = vadd.f32 %v1532_v30, %v1531_v39  ;;  %v1426_v3 = vpop.permute.xlu1 %1425  ;;  %v1422_v62 = vpop.permute.xlu0 %1421  ;;  %2484 = vperm.xlu1 %3615, %v3506_v23   ;;  %2238 = vperm.xlu0 %3614, %v3479_v26   ;;  %v4289_v1 = vunpack.c.l.bf16 %v350_v31 }
 0x141   : > { %v1474_v10 = vmul.f32 %v1426_v3, %v4034_v15  ;;  %v1475_v11 = vmul.f32 %v1426_v3, %v4270_v12  ;;  %v1472_v14 = vmul.f32 %v1422_v62, %v4036_v16  ;;  %v1473_v17 = vmul.f32 %v1422_v62, %v4272_v13 }
 0x142   : > { %v1503_v60 = vadd.f32 %v1502_v42, %v1501_v46  ;;  %v1535_v63 = vadd.f32 %v1534_v43, %v1533_v0  ;;  %v3507_v42 = vld [vmem:[%s5174_s0 + $0x87] ss:$0 sm:$0xff]  ;;  %v3480_v43 = vld [vmem:[%s5174_s0 + $0x7c] ss:$0 sm:$0xff]  ;;  %v558_v46 = vmul.f32 %v3941_v25, %v4012_v53 }
 0x143   : > { %v1504_v18 = vsel %vm1492_vm2, %v1472_v14, 0.0  ;;  %v1536_v3 = vsel %vm1524_vm3, %v1473_v17, 0.0  ;;  %v1506_v39 = vsel %vm1492_vm2, %v1474_v10, 0.0  ;;  %v1538_v2 = vsel %vm1524_vm3, %v1475_v11, 0.0 }
 0x144   : > { %v1505_v23 = vadd.f32 %v1504_v18, %v1503_v60  ;;  %v1537_v26 = vadd.f32 %v1536_v3, %v1535_v63  ;;  %v4293_v38 = vpop.permute.xlu1 %1433  ;;  %v1430_v62 = vpop.permute.xlu0 %1429  ;;  %1703 = vperm.xlu1 %3615, %v3414_v27   ;;  %1457 = vperm.xlu0 %3614, %v3387_v47   ;;  %v557_v10 = vmul.f32 %v3931_v21, %v4010_v52 }
 0x145   : > { %v1476_v30 = vmul.f32 %v1430_v62, %v4045_v35  ;;  %v1477_v31 = vmul.f32 %v1430_v62, %v4289_v1  ;;  %v559_v62 = vmul.f32 %v3929_v20, %v4016_v58 }
 0x146   : > { %v1507_v0 = vadd.f32 %v1506_v39, %v1505_v23  ;;  %v1539_v14 = vadd.f32 %v1538_v2, %v1537_v26  ;;  %v3415_v23 = vld [vmem:[%s5174_s0 + $0x5b] ss:$0 sm:$0xff]  ;;  %v3419_v26 = vld [vmem:[%s5174_s0 + $0x5f] ss:$0 sm:$0xff]  ;;  %v575_v39 = vsel %vm573_vm4, %v558_v46, 0.0 }
 0x147   : > { %v1508_v11 = vsel %vm1492_vm2, %v1476_v30, 0.0  ;;  %v1540_v17 = vsel %vm1524_vm3, %v1477_v31, 0.0  ;;  %v3508_v46 = vld [vmem:[%s5174_s0 + $0x88] ss:$0 sm:$0xff] }
 0x148   : > { %v4311_v27 = vadd.f32 %v1508_v11, %v1507_v0  ;;  %v4313_v47 = vadd.f32 %v1540_v17, %v1539_v14  ;;  %v1668_v60 = vpop.permute.xlu1 %1667  ;;  %v1664_v63 = vpop.permute.xlu0 %1663  ;;  %2488 = vperm.xlu1 %3615, %v3507_v42   ;;  %2242 = vperm.xlu0 %3614, %v3480_v43   ;;  %v574_v14 = vsel %vm573_vm4, %v557_v10, 0.0  ;;  %v3512_v17 = vld [vmem:[%s5174_s0 + $0x8c] ss:$0 sm:$0xff] }
 0x149   : > { %v1728_v25 = vmul.f32 %v1668_v60, %v4012_v53  ;;  %v1729_v18 = vmul.f32 %v1668_v60, %v4214_v8  ;;  %v1726_v21 = vmul.f32 %v1664_v63, %v4010_v52  ;;  %v1727_v3 = vmul.f32 %v1664_v63, %v4216_v9 }
 0x14a   : > { %v576_v60 = vadd.f32 %v575_v39, %v574_v14  ;;  %v560_v14 = vmul.f32 %v3939_v24, %v4018_v59  ;;  %v3514_v24 = vld [vmem:[%s5174_s0 + $0x8e] ss:$0 sm:$0xff] }
 0x14b   : > { %v1760_v2 = vsel %vm1758_vm5, %v1728_v25, 0.0  ;;  %v1792_v30 = vsel %vm1790_vm6, %v1729_v18, 0.0  ;;  %v1759_v31 = vsel %vm1758_vm5, %v1726_v21, 0.0  ;;  %v1791_v42 = vsel %vm1790_vm6, %v1727_v3, 0.0 }
 0x14c   : > { %v4332_v43 = vpop.permute.xlu1 %1675  ;;  %v1672_v0 = vpop.permute.xlu0 %1671  ;;  %1707 = vperm.xlu1 %3615, %v3415_v23   ;;  %1723 = vperm.xlu0 %3614, %v3419_v26   ;;  %v1761_v63 = vadd.f32 %v1760_v2, %v1759_v31  ;;  %v1793_v25 = vadd.f32 %v1792_v30, %v1791_v42  ;;  %v577_v18 = vsel %vm573_vm4, %v559_v62, 0.0  ;;  %v3416_v31 = vld [vmem:[%s5174_s0 + $0x5c] ss:$0 sm:$0xff]  ;;  %v3513_v42 = vld [vmem:[%s5174_s0 + $0x8d] ss:$0 sm:$0xff] }
 0x14d   : > { %v1730_v11 = vmul.f32 %v1672_v0, %v4016_v58  ;;  %v1731_v20 = vmul.f32 %v1672_v0, %v4232_v57 }
 0x14f   : > { %v1762_v21 = vsel %vm1758_vm5, %v1730_v11, 0.0  ;;  %v1794_v10 = vsel %vm1790_vm6, %v1731_v20, 0.0  ;;  %v578_v11 = vadd.f32 %v577_v18, %v576_v60  ;;  %v579_v60 = vsel %vm573_vm4, %v560_v14, 0.0 }
 0x150   : > { %v4346_v3 = vadd.f32 %v1762_v21, %v1761_v63  ;;  %v4348_v23 = vadd.f32 %v1794_v10, %v1793_v25  ;;  %v2199_v26 = vpop.permute.xlu1 %2198  ;;  %v2195_v0 = vpop.permute.xlu0 %2194  ;;  %2492 = vperm.xlu1 %3615, %v3508_v46   ;;  %2508 = vperm.xlu0 %3614, %v3512_v17   ;;  %v3509_v10 = vld [vmem:[%s5174_s0 + $0x89] ss:$0 sm:$0xff]  ;;  %v561_v18 = vmul.f32 %v3951_v29, %v4027_v5  ;;  %v3510_v29 = vld [vmem:[%s5174_s0 + $0x8a] ss:$0 sm:$0xff] }
 0x151   : > { %v2259_v39 = vmul.f32 %v2199_v26, %v4012_v53  ;;  %v2260_v2 = vmul.f32 %v2199_v26, %v4214_v8  ;;  %v2257_v62 = vmul.f32 %v2195_v0, %v4010_v52  ;;  %v2258_v30 = vmul.f32 %v2195_v0, %v4216_v9  ;;  %v3417_v0 = vld [vmem:[%s5174_s0 + $0x5d] ss:$0 sm:$0xff] }
 0x152   : > { %v580_v26 = vadd.f32 %v579_v60, %v578_v11  ;;  %v563_v14 = vmul.f32 %v3961_v33, %v4036_v16  ;;  %v3511_v33 = vld [vmem:[%s5174_s0 + $0x8b] ss:$0 sm:$0xff]  ;;  %v565_v60 = vmul.f32 %v3971_v37, %v4045_v35  ;;  %v3482_v37 = vld [vmem:[%s5174_s0 + $0x7e] ss:$0 sm:$0xff] }
 0x153   : > { %v2291_v20 = vsel %vm2289_vm7, %v2259_v39, 0.0  ;;  %v2323_v46 = vsel %vm2321_vm8, %v2260_v2, 0.0  ;;  %v2290_v17 = vsel %vm2289_vm7, %v2257_v62, 0.0  ;;  %v2322_v63 = vsel %vm2321_vm8, %v2258_v30, 0.0  ;;  %v3436_v39 = vld [vmem:[%s5174_s0 + $0x60] ss:$0 sm:$0xff] }
 0x154   : > { %v4366_v25 = vadd.f32 %v2291_v20, %v2290_v17  ;;  %v4368_v21 = vadd.f32 %v2323_v46, %v2322_v63  ;;  %1711 = vperm.xlu1 %3615, %v3416_v31   ;;  %2512 = vperm.xlu0 %3614, %v3513_v42   ;;  %v562_v2 = vmul.f32 %v3949_v28, %v4025_v4  ;;  %v581_v62 = vsel %vm573_vm4, %v561_v18, 0.0  ;;  %v3438_v31 = vld [vmem:[%s5174_s0 + $0x62] ss:$0 sm:$0xff]  ;;  %v3418_v28 = vld [vmem:[%s5174_s0 + $0x5e] ss:$0 sm:$0xff] }
 0x155   : > { %v582_v30 = vadd.f32 %v581_v62, %v580_v26  ;;  %v3440_v20 = vld [vmem:[%s5174_s0 + $0x64] ss:$0 sm:$0xff]  ;;  %v564_v46 = vmul.f32 %v3959_v32, %v4034_v15  ;;  %v585_v17 = vsel %vm573_vm4, %v563_v14, 0.0  ;;  %v3481_v32 = vld [vmem:[%s5174_s0 + $0x7d] ss:$0 sm:$0xff]  ;;  %v568_v14 = vmul.f32 %v3979_v40, %v4052_v55 }
 0x156   : > { %v583_v42 = vsel %vm573_vm4, %v562_v2, 0.0  ;;  %v3444_v26 = vld [vmem:[%s5174_s0 + $0x68] ss:$0 sm:$0xff]  ;;  %v3446_v62 = vld [vmem:[%s5174_s0 + $0x6a] ss:$0 sm:$0xff] }
 0x157   : > { %v584_v11 = vadd.f32 %v583_v42, %v582_v30  ;;  %v3448_v42 = vld [vmem:[%s5174_s0 + $0x6c] ss:$0 sm:$0xff] }
 0x158   : > { %2496 = vperm.xlu1 %3615, %v3509_v10   ;;  %2516 = vperm.xlu0 %3614, %v3514_v24   ;;  %v3442_v10 = vld [vmem:[%s5174_s0 + $0x66] ss:$0 sm:$0xff]  ;;  %v587_v24 = vsel %vm573_vm4, %v564_v46, 0.0  ;;  %v595_v46 = vsel %vm573_vm4, %v568_v14, 0.0 }
 0x159   : > { %v586_v63 = vadd.f32 %v585_v17, %v584_v11  ;;  %v569_v17 = vmul.f32 %v3994_v45, %v4063_v7 }
 0x15b   : > { %v588_v18 = vadd.f32 %v587_v24, %v586_v63  ;;  %v3437_v24 = vld [vmem:[%s5174_s0 + $0x61] ss:$0 sm:$0xff] }
 0x15c   : > { %1715 = vperm.xlu1 %3615, %v3417_v0   ;;  %1929 = vperm.xlu0 %3614, %v3436_v39   ;;  %v566_v0 = vmul.f32 %v3969_v36, %v4043_v34  ;;  %v589_v39 = vsel %vm573_vm4, %v565_v60, 0.0  ;;  %v3483_v36 = vld [vmem:[%s5174_s0 + $0x7f] ss:$0 sm:$0xff]  ;;  %v570_v60 = vmul.f32 %v3992_v44, %v4061_v6  ;;  %v3439_v44 = vld [vmem:[%s5174_s0 + $0x63] ss:$0 sm:$0xff] }
 0x15d   : > { %v590_v2 = vadd.f32 %v589_v39, %v588_v18  ;;  %v597_v18 = vsel %vm573_vm4, %v569_v17, 0.0  ;;  %v3443_v17 = vld [vmem:[%s5174_s0 + $0x67] ss:$0 sm:$0xff] }
 0x15e   : > { %v591_v30 = vsel %vm573_vm4, %v566_v0, 0.0 }
 0x160   : > { %2500 = vperm.xlu1 %3615, %v3510_v29   ;;  %1937 = vperm.xlu0 %3614, %v3438_v31   ;;  %v567_v29 = vmul.f32 %v3981_v41, %v4054_v56  ;;  %v592_v31 = vadd.f32 %v591_v30, %v590_v2  ;;  %v3515_v41 = vld [vmem:[%s5174_s0 + $0x8f] ss:$0 sm:$0xff]  ;;  %v571_v30 = vmul.f32 %v4007_v50, %v4072_v22 }
 0x162   : > { %v593_v11 = vsel %vm573_vm4, %v567_v29, 0.0 }
 0x164   : > { %1719 = vperm.xlu1 %3615, %v3418_v28   ;;  %1945 = vperm.xlu0 %3614, %v3440_v20   ;;  %v594_v28 = vadd.f32 %v593_v11, %v592_v31  ;;  %v3450_v20 = vld [vmem:[%s5174_s0 + $0x6e] ss:$0 sm:$0xff] }
 0x166   : > { %v596_v63 = vadd.f32 %v595_v46, %v594_v28  ;;  %v601_v28 = vsel %vm573_vm4, %v571_v30, 0.0 }
 0x168   : > { %2504 = vperm.xlu1 %3615, %v3511_v33   ;;  %1953 = vperm.xlu0 %3614, %v3442_v10   ;;  %v1732_v33 = vmul.f32 %v4332_v43, %v4018_v59  ;;  %v1733_v10 = vmul.f32 %v4332_v43, %v4230_v54  ;;  %v598_v45 = vadd.f32 %v597_v18, %v596_v63 }
 0x16a   : > { %v817_v40 = vpop.permute.xlu0 %816  ;;  %v1796_v0 = vsel %vm1790_vm6, %v1733_v10, 0.0 }
 0x16c   : > { %2246 = vperm.xlu1 %3615, %v3481_v32   ;;  %1961 = vperm.xlu0 %3614, %v3444_v26   ;;  %v1764_v26 = vsel %vm1758_vm5, %v1732_v33, 0.0 }
 0x16d   : > { %v1765_v2 = vadd.f32 %v1764_v26, %v4346_v3  ;;  %v3441_v3 = vld [vmem:[%s5174_s0 + $0x65] ss:$0 sm:$0xff] }
 0x170   : > { %2250 = vperm.xlu1 %3615, %v3482_v37   ;;  %1969 = vperm.xlu0 %3614, %v3446_v62   ;;  %v1797_v37 = vadd.f32 %v1796_v0, %v4348_v23  ;;  %v599_v62 = vsel %vm573_vm4, %v570_v60, 0.0  ;;  %v572_v23 = vmul.f32 %v4005_v49, %v4070_v19 }
 0x172   : > { %v603_v63 = vsel %vm573_vm4, %v572_v23, 0.0  ;;  %vm3053_vm4 = vcmask 60416  }
 0x174   : > { %2254 = vperm.xlu1 %3615, %v3483_v36   ;;  %1977 = vperm.xlu0 %3614, %v3448_v42   ;;  %v600_v36 = vadd.f32 %v599_v62, %v598_v45 }
 0x178   : > { %2520 = vperm.xlu1 %3615, %v3515_v41   ;;  %1985 = vperm.xlu0 %3614, %v3450_v20   ;;  %v602_v41 = vadd.f32 %v601_v28, %v600_v36 }
 0x17a   : > { %v604_v49 = vadd.f32 %v603_v63, %v602_v41 }
 0x17b   : > { %v1680_v32 = vpop.permute.xlu0 %1679 }
 0x17c   : > { %v1734_v39 = vmul.f32 %v1680_v32, %v4027_v5  ;;  %v1735_v43 = vmul.f32 %v1680_v32, %v4252_v51  ;;  %1933 = vperm.xlu1 %3615, %v3437_v24   ;;  %v819_v45 = vadd.f32 %v817_v40, %v604_v49  ;;  %v3445_v32 = vld [vmem:[%s5174_s0 + $0x69] ss:$0 sm:$0xff] }
 0x17e   : > { %v1766_v29 = vsel %vm1758_vm5, %v1734_v39, 0.0  ;;  %v1798_v31 = vsel %vm1790_vm6, %v1735_v43, 0.0  ;;  %v3447_v43 = vld [vmem:[%s5174_s0 + $0x6b] ss:$0 sm:$0xff] }
 0x17f   : > { %v1767_v42 = vadd.f32 %v1766_v29, %v1765_v2  ;;  %v1799_v14 = vadd.f32 %v1798_v31, %v1797_v37  ;;  %v2461_v11 = vpop.permute.xlu0 %2460  ;;  %v3449_v37 = vld [vmem:[%s5174_s0 + $0x6d] ss:$0 sm:$0xff] }
 0x180   : > { %1941 = vperm.xlu1 %3615, %v3439_v44   ;;  %v3451_v44 = vld [vmem:[%s5174_s0 + $0x6f] ss:$0 sm:$0xff]  ;;  %v2523_v31 = vmul.f32 %v2461_v11, %v4010_v52  ;;  %v2524_v36 = vmul.f32 %v2461_v11, %v4216_v9 }
 0x182   : > { %v2588_v11 = vsel %vm2587_vm10, %v2524_v36, 0.0 }
 0x183   : > { %v1684_v50 = vpop.permute.xlu0 %1683 }
 0x184   : > { %v1736_v20 = vmul.f32 %v1684_v50, %v4025_v4  ;;  %v1737_v46 = vmul.f32 %v1684_v50, %v4250_v48  ;;  %1949 = vperm.xlu1 %3615, %v3441_v3  }
 0x186   : > { %v1768_v33 = vsel %vm1758_vm5, %v1736_v20, 0.0  ;;  %v1800_v10 = vsel %vm1790_vm6, %v1737_v46, 0.0  ;;  %v2556_v46 = vsel %vm2555_vm9, %v2523_v31, 0.0 }
 0x187   : > { %v4489_v24 = vadd.f32 %v1768_v33, %v1767_v42  ;;  %v4491_v60 = vadd.f32 %v1800_v10, %v1799_v14  ;;  %v2469_v18 = vpop.permute.xlu0 %2468 }
 0x188   : > { %1957 = vperm.xlu1 %3615, %v3443_v17   ;;  %v2527_v28 = vmul.f32 %v2469_v18, %v4016_v58  ;;  %v2528_v41 = vmul.f32 %v2469_v18, %v4232_v57 }
 0x18a   : > { %v1031_v26 = vpop.permute.xlu1 %1030 }
 0x18b   : > { %v4496_v0 = vadd.f32 %v1031_v26, %v819_v45  ;;  %v2211_v39 = vpop.permute.xlu0 %2210 }
 0x18c   : > { %1965 = vperm.xlu1 %3615, %v3445_v32   ;;  %v2265_v49 = vmul.f32 %v2211_v39, %v4027_v5  ;;  %v2266_v18 = vmul.f32 %v2211_v39, %v4252_v51 }
 0x18d   : > { %5230 = vst [vmem:[#allocation27_spill] sm:$0xff] %v4496_v0 }
 0x18f   : > { %v1692_v2 = vpop.permute.xlu0 %1691 }
 0x190   : > { %1973 = vperm.xlu1 %3615, %v3447_v43  }
 0x193   : > { %v2477_v40 = vpop.permute.xlu0 %2476 }
 0x194   : > { %1981 = vperm.xlu1 %3615, %v3449_v37   ;;  %v2559_v37 = vsel %vm2555_vm9, %v2527_v28, 0.0  ;;  %v2329_v28 = vsel %vm2321_vm8, %v2266_v18, 0.0  ;;  %v2531_v18 = vmul.f32 %v2477_v40, %v4027_v5 }
 0x197   : > { %v4507_v62 = vpop.permute.xlu0 %2218 }
 0x198   : > { %1989 = vperm.xlu1 %3615, %v3451_v44   ;;  %v2591_v44 = vsel %vm2587_vm10, %v2528_v41, 0.0 }
 0x19b   : > { %v2203_v30 = vpop.permute.xlu1 %2202  ;;  %v4509_v29 = vpop.permute.xlu0 %1437 }
 0x19c   : > { %v2261_v42 = vmul.f32 %v2203_v30, %v4016_v58  ;;  %v2262_v14 = vmul.f32 %v2203_v30, %v4232_v57 }
 0x19e   : > { %v2293_v17 = vsel %vm2289_vm7, %v2261_v42, 0.0  ;;  %v2325_v63 = vsel %vm2321_vm8, %v2262_v14, 0.0 }
 0x19f   : > { %v2465_v3 = vpop.permute.xlu1 %2464  ;;  %v4515_v23 = vpop.permute.xlu0 %2222  ;;  %v2294_v36 = vadd.f32 %v2293_v17, %v4366_v25  ;;  %v2326_v42 = vadd.f32 %v2325_v63, %v4368_v21  ;;  %v1741_v25 = vmul.f32 %v1692_v2, %v4270_v12 }
 0x1a0   : > { %v2525_v50 = vmul.f32 %v2465_v3, %v4012_v53  ;;  %v2526_v20 = vmul.f32 %v2465_v3, %v4214_v8 }
 0x1a2   : > { %v2557_v33 = vsel %vm2555_vm9, %v2525_v50, 0.0  ;;  %v2589_v10 = vsel %vm2587_vm10, %v2526_v20, 0.0  ;;  %v2297_v20 = vsel %vm2289_vm7, %v2265_v49, 0.0 }
 0x1a3   : > { %v2558_v45 = vadd.f32 %v2557_v33, %v2556_v46  ;;  %v2590_v32 = vadd.f32 %v2589_v10, %v2588_v11  ;;  %v2207_v26 = vpop.permute.xlu1 %2206  ;;  %v4529_v43 = vpop.permute.xlu0 %1441  ;;  %v1740_v10 = vmul.f32 %v1692_v2, %v4034_v15 }
 0x1a4   : > { %v2263_v30 = vmul.f32 %v2207_v26, %v4018_v59  ;;  %v2264_v31 = vmul.f32 %v2207_v26, %v4230_v54  ;;  %v2532_v26 = vmul.f32 %v2477_v40, %v4252_v51  ;;  %v2563_v40 = vsel %vm2555_vm9, %v2531_v18, 0.0 }
 0x1a5   : > { %v2560_v14 = vadd.f32 %v2559_v37, %v2558_v45  ;;  %v2592_v3 = vadd.f32 %v2591_v44, %v2590_v32 }
 0x1a6   : > { %v2295_v39 = vsel %vm2289_vm7, %v2263_v30, 0.0  ;;  %v2327_v50 = vsel %vm2321_vm8, %v2264_v31, 0.0  ;;  %v1772_v31 = vsel %vm1758_vm5, %v1740_v10, 0.0 }
 0x1a7   : > { %v2296_v46 = vadd.f32 %v2295_v39, %v2294_v36  ;;  %v2328_v41 = vadd.f32 %v2327_v50, %v2326_v42  ;;  %v1688_v11 = vpop.permute.xlu1 %1687  ;;  %v4541_v33 = vpop.permute.xlu0 %2226  ;;  %v1804_v36 = vsel %vm1790_vm6, %v1741_v25, 0.0  ;;  %v2269_v25 = vmul.f32 %v4507_v62, %v4036_v16 }
 0x1a8   : > { %v1738_v21 = vmul.f32 %v1688_v11, %v4036_v16  ;;  %v1739_v17 = vmul.f32 %v1688_v11, %v4272_v13 }
 0x1a9   : > { %v2298_v63 = vadd.f32 %v2297_v20, %v2296_v46  ;;  %v2330_v45 = vadd.f32 %v2329_v28, %v2328_v41  ;;  %v2595_v28 = vsel %vm2587_vm10, %v2532_v26, 0.0  ;;  %v2271_v26 = vmul.f32 %v4515_v23, %v4034_v15 }
 0x1aa   : > { %v1770_v32 = vsel %vm1758_vm5, %v1738_v21, 0.0  ;;  %v1802_v49 = vsel %vm1790_vm6, %v1739_v17, 0.0  ;;  %v2270_v21 = vmul.f32 %v4507_v62, %v4272_v13 }
 0x1ab   : > { %v1771_v37 = vadd.f32 %v1770_v32, %v4489_v24  ;;  %v1803_v44 = vadd.f32 %v1802_v49, %v4491_v60  ;;  %v2473_v30 = vpop.permute.xlu1 %2472  ;;  %v1446_v2 = vpop.permute.xlu0 %1445  ;;  %v352_v49 = vld [vmem:[%s4002_s23 + $0x4c] sm:$0x1] }
 0x1ac   : > { %v2529_v42 = vmul.f32 %v2473_v30, %v4018_v59  ;;  %v2530_v39 = vmul.f32 %v2473_v30, %v4230_v54 }
 0x1ad   : > { %v4557_v50 = vadd.f32 %v1772_v31, %v1771_v37  ;;  %v4559_v20 = vadd.f32 %v1804_v36, %v1803_v44  ;;  %v2272_v44 = vmul.f32 %v4515_v23, %v4270_v12 }
 0x1ae   : > { %v2561_v24 = vsel %vm2555_vm9, %v2529_v42, 0.0  ;;  %v2593_v60 = vsel %vm2587_vm10, %v2530_v39, 0.0 }
 0x1af   : > { %v2562_v46 = vadd.f32 %v2561_v24, %v2560_v14  ;;  %v2594_v41 = vadd.f32 %v2593_v60, %v2592_v3  ;;  %v2215_v11 = vpop.permute.xlu1 %2214  ;;  %v4565_v10 = vpop.permute.xlu0 %2230  ;;  %v356_v14 = vld [vmem:[%s4002_s23 + $0x5c] sm:$0x1]  ;;  %v354_v3 = vld [vmem:[%s4002_s23 + $0x54] sm:$0x1]  ;;  %v4588_v24 = vunpack.c.l.bf16 %v352_v49  ;;  %v2301_v60 = vsel %vm2289_vm7, %v2269_v25, 0.0 }
 0x1b0   : > { %v2267_v17 = vmul.f32 %v2215_v11, %v4025_v4  ;;  %v2268_v32 = vmul.f32 %v2215_v11, %v4250_v48  ;;  %v358_v11 = vld [vmem:[%s4002_s23 + $0x64] sm:$0x1]  ;;  %v2335_v25 = vsel %vm2321_vm8, %v2272_v44, 0.0  ;;  %v1482_v44 = vmul.f32 %v4529_v43, %v4052_v55 }
 0x1b1   : > { %v4574_v37 = vadd.f32 %v2563_v40, %v2562_v46  ;;  %v4576_v18 = vadd.f32 %v2595_v28, %v2594_v41  ;;  %v2333_v40 = vsel %vm2321_vm8, %v2270_v21, 0.0  ;;  %v4592_v28 = vunpack.c.l.bf16 %v356_v14 }
 0x1b2   : > { %v2299_v62 = vsel %vm2289_vm7, %v2267_v17, 0.0  ;;  %v2331_v30 = vsel %vm2321_vm8, %v2268_v32, 0.0  ;;  %v4594_v46 = vunpack.c.l.bf16 %v354_v3  ;;  %v2303_v17 = vsel %vm2289_vm7, %v2271_v26, 0.0  ;;  %v360_v32 = vld [vmem:[%s4002_s23 + $0x6c] sm:$0x1] }
 0x1b3   : > { %v2300_v31 = vadd.f32 %v2299_v62, %v2298_v63  ;;  %v2332_v36 = vadd.f32 %v2331_v30, %v2330_v45  ;;  %v4586_v42 = vpop.permute.xlu1 %1695  ;;  %v1450_v39 = vpop.permute.xlu0 %1449  ;;  %v1478_v63 = vmul.f32 %v4293_v38, %v4043_v34  ;;  %v1479_v45 = vmul.f32 %v4293_v38, %v4588_v24  ;;  %v362_v26 = vld [vmem:[%s4002_s23 + $0x74] sm:$0x1] }
 0x1b4   : > { %v1480_v21 = vmul.f32 %v4509_v29, %v4054_v56  ;;  %v1481_v49 = vmul.f32 %v4509_v29, %v4594_v46  ;;  %v4616_v38 = vunpack.c.l.bf16 %v358_v11  ;;  %v4633_v0 = vunpack.c.l.bf16 %v362_v26 }
 0x1b5   : > { %v2302_v23 = vadd.f32 %v2301_v60, %v2300_v31  ;;  %v2334_v41 = vadd.f32 %v2333_v40, %v2332_v36  ;;  %v1483_v31 = vmul.f32 %v4529_v43, %v4592_v28  ;;  %v4623_v36 = vunpack.c.l.bf16 %v360_v32 }
 0x1b6   : > { %v1510_v29 = vsel %vm1492_vm2, %v1478_v63, 0.0  ;;  %v1542_v60 = vsel %vm1524_vm3, %v1479_v45, 0.0  ;;  %v1512_v40 = vsel %vm1492_vm2, %v1480_v21, 0.0  ;;  %v1485_v11 = vmul.f32 %v1446_v2, %v4616_v38 }
 0x1b7   : > { %v4608_v14 = vadd.f32 %v2303_v17, %v2302_v23  ;;  %v4610_v3 = vadd.f32 %v2335_v25, %v2334_v41  ;;  %v4612_v62 = vpop.permute.xlu1 %2480  ;;  %v4614_v30 = vpop.permute.xlu0 %2234  ;;  %v1544_v23 = vsel %vm1524_vm3, %v1481_v49, 0.0  ;;  %v1484_v41 = vmul.f32 %v1446_v2, %v4063_v7 }
 0x1b8   : > { %v1511_v43 = vadd.f32 %v1510_v29, %v4311_v27  ;;  %v1543_v63 = vadd.f32 %v1542_v60, %v4313_v47  ;;  %v1514_v45 = vsel %vm1492_vm2, %v1482_v44, 0.0  ;;  %v1546_v32 = vsel %vm1524_vm3, %v1483_v31, 0.0  ;;  %v364_v44 = vld [vmem:[%s4002_s23 + $0x7c] sm:$0x1]  ;;  %s3647_s23 = smov 1  }
 0x1b9   : > { %v1486_v21 = vmul.f32 %v1450_v39, %v4061_v6  ;;  %v1487_v49 = vmul.f32 %v1450_v39, %v4623_v36  ;;  %v1516_v5 = vsel %vm1492_vm2, %v1484_v41, 0.0  ;;  %v1548_v54 = vsel %vm1524_vm3, %v1485_v11, 0.0 }
 0x1ba   : > { %v1513_v51 = vadd.f32 %v1512_v40, %v1511_v43  ;;  %v1545_v2 = vadd.f32 %v1544_v23, %v1543_v63  ;;  %v4650_v43 = vunpack.c.l.bf16 %v364_v44 }
 0x1bb   : > { %v4631_v17 = vpop.permute.xlu1 %1699  ;;  %v1454_v25 = vpop.permute.xlu0 %1453  ;;  %v1518_v59 = vsel %vm1492_vm2, %v1486_v21, 0.0  ;;  %v1550_v39 = vsel %vm1524_vm3, %v1487_v49, 0.0 }
 0x1bc   : > { %v1488_v26 = vmul.f32 %v1454_v25, %v4072_v22  ;;  %v1489_v27 = vmul.f32 %v1454_v25, %v4633_v0  ;;  %v1515_v60 = vadd.f32 %v1514_v45, %v1513_v51  ;;  %v1547_v31 = vadd.f32 %v1546_v32, %v1545_v2 }
 0x1be   : > { %v1517_v40 = vadd.f32 %v1516_v5, %v1515_v60  ;;  %v1549_v23 = vadd.f32 %v1548_v54, %v1547_v31  ;;  %v1520_v41 = vsel %vm1492_vm2, %v1488_v26, 0.0  ;;  %v1552_v11 = vsel %vm1524_vm3, %v1489_v27, 0.0 }
 0x1bf   : > { %v2485_v29 = vpop.permute.xlu1 %2484  ;;  %v4645_v47 = vpop.permute.xlu0 %2238  ;;  %v2274_v60 = vmul.f32 %v4541_v33, %v4289_v1  ;;  %v2275_v31 = vmul.f32 %v4565_v10, %v4043_v34 }
 0x1c0   : > { %v1519_v57 = vadd.f32 %v1518_v59, %v1517_v40  ;;  %v1551_v58 = vadd.f32 %v1550_v39, %v1549_v23  ;;  %v2273_v59 = vmul.f32 %v4541_v33, %v4045_v35  ;;  %v2276_v39 = vmul.f32 %v4565_v10, %v4588_v24  ;;  %v3516_v23 = vld [vmem:[#allocation2] ss:$0 sm:$0xff] }
 0x1c1   : > { %v2533_v33 = vmul.f32 %v4612_v62, %v4025_v4 }
 0x1c2   : > { %v1521_v45 = vadd.f32 %v1520_v41, %v1519_v57  ;;  %v1553_v32 = vadd.f32 %v1552_v11, %v1551_v58  ;;  %v1742_v58 = vmul.f32 %v4586_v42, %v4045_v35  ;;  %v2534_v41 = vmul.f32 %v4612_v62, %v4250_v48 }
 0x1c3   : > { %v1704_v63 = vpop.permute.xlu1 %1703  ;;  %v1458_v25 = vpop.permute.xlu0 %1457  ;;  %v2305_v11 = vsel %vm2289_vm7, %v2273_v59, 0.0  ;;  %v1744_v62 = vmul.f32 %v4631_v17, %v4043_v34 }
 0x1c4   : > { %v1490_v9 = vmul.f32 %v1458_v25, %v4070_v19  ;;  %v1491_v51 = vmul.f32 %v1458_v25, %v4650_v43  ;;  %v2306_v25 = vadd.f32 %v2305_v11, %v4608_v14  ;;  %v2565_v14 = vsel %vm2555_vm9, %v2533_v33, 0.0 }
 0x1c5   : > { %v2280_v11 = vmul.f32 %v4645_v47, %v4592_v28 }
 0x1c6   : > { %v1522_v21 = vsel %vm1492_vm2, %v1490_v9, 0.0  ;;  %v1554_v5 = vsel %vm1524_vm3, %v1491_v51, 0.0  ;;  %v1743_v9 = vmul.f32 %v4586_v42, %v4289_v1  ;;  %v2337_v42 = vsel %vm2321_vm8, %v2274_v60, 0.0 }
 0x1c7   : > { %v2489_v54 = vpop.permute.xlu1 %2488  ;;  %v1523_v49 = vadd.f32 %v1522_v21, %v1521_v45  ;;  %v1555_v2 = vadd.f32 %v1554_v5, %v1553_v32  ;;  %v2338_v51 = vadd.f32 %v2337_v42, %v4610_v3  ;;  %v1774_v45 = vsel %vm1758_vm5, %v1742_v58, 0.0 }
 0x1c8   : > { %v1806_v10 = vsel %vm1790_vm6, %v1743_v9, 0.0  ;;  %v2307_v32 = vsel %vm2289_vm7, %v2275_v31, 0.0  ;;  %v2339_v21 = vsel %vm2321_vm8, %v2276_v39, 0.0  ;;  %v1745_v5 = vmul.f32 %v4631_v17, %v4588_v24 }
 0x1c9   : > { %v1558_v26 = vrot.slane %v1523_v49, 1  ;;  %v1559_v44 = vrot.slane %v1555_v2, 1  ;;  %v2597_v3 = vsel %vm2587_vm10, %v2534_v41, 0.0  ;;  %v2535_v2 = vmul.f32 %v2485_v29, %v4036_v16 }
 0x1ca   : > { %v1807_v59 = vadd.f32 %v1806_v10, %v4559_v20  ;;  %v2277_v60 = vmul.f32 %v4614_v30, %v4054_v56  ;;  %v4700_v17 = vadd.f32 %v2307_v32, %v2306_v25  ;;  %v4702_v58 = vadd.f32 %v2339_v21, %v2338_v51 }
 0x1cb   : > { %v1708_v27 = vpop.permute.xlu1 %1707  ;;  %v1560_v57 = vsel %vm1293_vm11, %v1558_v26, %v1559_v44  ;;  %v2536_v26 = vmul.f32 %v2485_v29, %v4272_v13  ;;  %v1775_v44 = vadd.f32 %v1774_v45, %v4557_v50  ;;  %v1746_v9 = vmul.f32 %v1704_v63, %v4054_v56 }
 0x1cc   : > { %1561 = vrot.lane.b32.xlu0 %v1560_v57, %s3645_s24  ;;  %v2278_v57 = vmul.f32 %v4614_v30, %v4594_v46  ;;  %v1747_v31 = vmul.f32 %v1704_v63, %v4594_v46  ;;  %v2566_v29 = vadd.f32 %v2565_v14, %v4574_v37  ;;  %v2598_v50 = vadd.f32 %v2597_v3, %v4576_v18  ;;  %v2243_v63 = vpop.permute.xlu0 %2242 }
 0x1cd   : > { %v1776_v20 = vsel %vm1758_vm5, %v1744_v62, 0.0  ;;  %v1808_v39 = vsel %vm1790_vm6, %v1745_v5, 0.0  ;;  %v2567_v33 = vsel %vm2555_vm9, %v2535_v2, 0.0  ;;  %v2599_v30 = vsel %vm2587_vm10, %v2536_v26, 0.0 }
 0x1ce   : > { %v2279_v41 = vmul.f32 %v4645_v47, %v4052_v55  ;;  %v4717_v37 = vsel %vm2289_vm7, %v2277_v60, 0.0  ;;  %v4720_v18 = vsel %vm2321_vm8, %v2278_v57, 0.0  ;;  %v2537_v42 = vmul.f32 %v2489_v54, %v4034_v15 }
 0x1cf   : > { %v4672_v40 = vpop.permute.xlu1 %2492  ;;  %v2538_v25 = vmul.f32 %v2489_v54, %v4270_v12  ;;  %v1778_v51 = vsel %vm1758_vm5, %v1746_v9, 0.0  ;;  %v1810_v45 = vsel %vm1790_vm6, %v1747_v31, 0.0  ;;  %v1748_v10 = vmul.f32 %v1708_v27, %v4052_v55 }
 0x1d0   : > { %2635 = vperm.xlu0 %3614, %v3516_v23   ;;  %v1749_v32 = vmul.f32 %v1708_v27, %v4592_v28  ;;  %v1777_v47 = vadd.f32 %v1776_v20, %v1775_v44  ;;  %v1809_v21 = vadd.f32 %v1808_v39, %v1807_v59  ;;  %v2568_v62 = vadd.f32 %v2567_v33, %v2566_v29  ;;  %v1724_v31 = vpop.permute.xlu0 %1723 }
 0x1d1   : > { %v2600_v5 = vadd.f32 %v2599_v30, %v2598_v50  ;;  %v4729_v3 = vsel %vm2289_vm7, %v2279_v41, 0.0  ;;  %v4732_v2 = vsel %vm2321_vm8, %v2280_v11, 0.0  ;;  %v2569_v9 = vsel %vm2555_vm9, %v2537_v42, 0.0 }
 0x1d2   : > { %v1779_v60 = vadd.f32 %v1778_v51, %v1777_v47  ;;  %v1811_v57 = vadd.f32 %v1810_v45, %v1809_v21  ;;  %v2601_v27 = vsel %vm2587_vm10, %v2538_v25, 0.0  ;;  %v1780_v44 = vsel %vm1758_vm5, %v1748_v10, 0.0 }
 0x1d3   : > { %v1712_v49 = vpop.permute.xlu1 %1711  ;;  %v1812_v59 = vsel %vm1790_vm6, %v1749_v32, 0.0  ;;  %v4743_v20 = vmul.f32 %v2243_v63, %v4063_v7  ;;  %v2539_v39 = vmul.f32 %v4672_v40, %v4045_v35  ;;  %v2540_v33 = vmul.f32 %v4672_v40, %v4289_v1 }
 0x1d4   : > { %v1750_v54 = vmul.f32 %v1712_v49, %v4063_v7  ;;  %v1751_v26 = vmul.f32 %v1712_v49, %v4616_v38  ;;  %v4746_v49 = vmul.f32 %v2243_v63, %v4616_v38  ;;  %v2570_v41 = vadd.f32 %v2569_v9, %v2568_v62 }
 0x1d5   : > { %v2602_v11 = vadd.f32 %v2601_v27, %v2600_v5  ;;  %v1781_v51 = vadd.f32 %v1780_v44, %v1779_v60  ;;  %v1813_v45 = vadd.f32 %v1812_v59, %v1811_v57  ;;  %v1756_v10 = vmul.f32 %v1724_v31, %v4070_v19  ;;  %v2509_v59 = vpop.permute.xlu0 %2508 }
 0x1d6   : > { %v1782_v42 = vsel %vm1758_vm5, %v1750_v54, 0.0  ;;  %v1814_v25 = vsel %vm1790_vm6, %v1751_v26, 0.0  ;;  %v1757_v63 = vmul.f32 %v1724_v31, %v4650_v43  ;;  %v2571_v62 = vsel %vm2555_vm9, %v2539_v39, 0.0 }
 0x1d7   : > { %v2497_v23 = vpop.permute.xlu1 %2496  ;;  %v2603_v5 = vsel %vm2587_vm10, %v2540_v33, 0.0  ;;  %v1815_v54 = vadd.f32 %v1814_v25, %v1813_v45  ;;  %vm2779_vm2 = vsmask.f32 7440 }
 0x1d8   : > { %v2541_v32 = vmul.f32 %v2497_v23, %v4043_v34  ;;  %v2542_v47 = vmul.f32 %v2497_v23, %v4588_v24  ;;  %v1788_v23 = vsel %vm1758_vm5, %v1756_v10, 0.0  ;;  %v1820_v44 = vsel %vm1790_vm6, %v1757_v63, 0.0  ;;  %vm5005_vm3 = vmor %vm2778_vm1, %vm2779_vm2 }
 0x1d9   : > { %v2604_v25 = vadd.f32 %v2603_v5, %v2602_v11  ;;  %v2513_v5 = vpop.permute.xlu0 %2512 }
 0x1da   : > { %v2605_v39 = vsel %vm2587_vm10, %v2542_v47, 0.0 }
 0x1db   : > { %v1716_v14 = vpop.permute.xlu1 %1715 }
 0x1dc   : > { %v1752_v29 = vmul.f32 %v1716_v14, %v4061_v6  ;;  %v1753_v50 = vmul.f32 %v1716_v14, %v4623_v36  ;;  %v1783_v14 = vadd.f32 %v1782_v42, %v1781_v51 }
 0x1de   : > { %v1784_v21 = vsel %vm1758_vm5, %v1752_v29, 0.0  ;;  %v1816_v40 = vsel %vm1790_vm6, %v1753_v50, 0.0  ;;  %v2573_v50 = vsel %vm2555_vm9, %v2541_v32, 0.0 }
 0x1df   : > { %v2501_v30 = vpop.permute.xlu1 %2500  ;;  %v1785_v31 = vadd.f32 %v1784_v21, %v1783_v14  ;;  %v1817_v29 = vadd.f32 %v1816_v40, %v1815_v54  ;;  %v2606_v14 = vadd.f32 %v2605_v39, %v2604_v25 }
 0x1e0   : > { %v2543_v60 = vmul.f32 %v2501_v30, %v4054_v56  ;;  %v2544_v57 = vmul.f32 %v2501_v30, %v4594_v46  ;;  %v2572_v30 = vadd.f32 %v2571_v62, %v2570_v41  ;;  %v2548_v41 = vmul.f32 %v2509_v59, %v4616_v38 }
 0x1e2   : > { %v2575_v10 = vsel %vm2555_vm9, %v2543_v60, 0.0  ;;  %v2607_v63 = vsel %vm2587_vm10, %v2544_v57, 0.0  ;;  %v2574_v32 = vadd.f32 %v2573_v50, %v2572_v30  ;;  %v2310_v50 = vadd.f32 %v4717_v37, %v4700_v17 }
 0x1e3   : > { %v1720_v26 = vpop.permute.xlu1 %1719  ;;  %v2345_v17 = vsel %vm2321_vm8, %v4746_v49, 0.0  ;;  %v2611_v37 = vsel %vm2587_vm10, %v2548_v41, 0.0 }
 0x1e4   : > { %v1754_v9 = vmul.f32 %v1720_v26, %v4072_v22  ;;  %v1755_v27 = vmul.f32 %v1720_v26, %v4633_v0  ;;  %v2576_v60 = vadd.f32 %v2575_v10, %v2574_v32  ;;  %v2312_v30 = vadd.f32 %v4729_v3, %v2310_v50 }
 0x1e6   : > { %v1786_v33 = vsel %vm1758_vm5, %v1754_v9, 0.0  ;;  %v1818_v42 = vsel %vm1790_vm6, %v1755_v27, 0.0  ;;  %v2547_v9 = vmul.f32 %v2509_v59, %v4063_v7  ;;  %v2608_v27 = vadd.f32 %v2607_v63, %v2606_v14 }
 0x1e7   : > { %v1787_v51 = vadd.f32 %v1786_v33, %v1785_v31  ;;  %v1819_v45 = vadd.f32 %v1818_v42, %v1817_v29  ;;  %v2505_v26 = vpop.permute.xlu1 %2504 }
 0x1e8   : > { %v2545_v21 = vmul.f32 %v2505_v26, %v4052_v55  ;;  %v2546_v40 = vmul.f32 %v2505_v26, %v4592_v28 }
 0x1e9   : > { %v1789_v47 = vadd.f32 %v1788_v23, %v1787_v51  ;;  %v1821_v54 = vadd.f32 %v1820_v44, %v1819_v45  ;;  %v2342_v23 = vadd.f32 %v4720_v18, %v4702_v58  ;;  %v2313_v51 = vsel %vm2289_vm7, %v4743_v20, 0.0 }
 0x1ea   : > { %v2577_v11 = vsel %vm2555_vm9, %v2545_v21, 0.0  ;;  %v2609_v62 = vsel %vm2587_vm10, %v2546_v40, 0.0  ;;  %v2579_v58 = vsel %vm2555_vm9, %v2547_v9, 0.0  ;;  %v2549_v18 = vmul.f32 %v2513_v5, %v4061_v6  ;;  %v2517_v21 = vpop.permute.xlu0 %2516 }
 0x1eb   : > { %v1824_v57 = vrot.slane %v1789_v47, 1  ;;  %v1825_v31 = vrot.slane %v1821_v54, 1  ;;  %v2247_v29 = vpop.permute.xlu1 %2246  ;;  %v2578_v39 = vadd.f32 %v2577_v11, %v2576_v60  ;;  %v2610_v33 = vadd.f32 %v2609_v62, %v2608_v27 }
 0x1ec   : > { %v2283_v44 = vmul.f32 %v2247_v29, %v4061_v6  ;;  %v2284_v59 = vmul.f32 %v2247_v29, %v4623_v36  ;;  %v2344_v25 = vadd.f32 %v4732_v2, %v2342_v23  ;;  %v2550_v45 = vmul.f32 %v2513_v5, %v4623_v36 }
 0x1ed   : > { %v1826_v42 = vsel %vm1293_vm11, %v1824_v57, %v1825_v31  ;;  %v2314_v49 = vadd.f32 %v2313_v51, %v2312_v30  ;;  %v2580_v40 = vadd.f32 %v2579_v58, %v2578_v39  ;;  %v2612_v32 = vadd.f32 %v2611_v37, %v2610_v33 }
 0x1ee   : > { %1827 = vrot.lane.b32.xlu1 %v1826_v42, %s3646_s19  ;;  %v2315_v3 = vsel %vm2289_vm7, %v2283_v44, 0.0  ;;  %v2347_v2 = vsel %vm2321_vm8, %v2284_v59, 0.0  ;;  %v2346_v63 = vadd.f32 %v2345_v17, %v2344_v25  ;;  %v2581_v54 = vsel %vm2555_vm9, %v2549_v18, 0.0 }
 0x1ef   : > { %v2251_v26 = vpop.permute.xlu1 %2250  ;;  %v2613_v9 = vsel %vm2587_vm10, %v2550_v45, 0.0  ;;  %v2316_v41 = vadd.f32 %v2315_v3, %v2314_v49  ;;  %v2551_v5 = vmul.f32 %v2517_v21, %v4072_v22  ;;  %v2552_v60 = vmul.f32 %v2517_v21, %v4633_v0 }
 0x1f0   : > { %v2285_v20 = vmul.f32 %v2251_v26, %v4072_v22  ;;  %v2286_v10 = vmul.f32 %v2251_v26, %v4633_v0  ;;  %v2348_v11 = vadd.f32 %v2347_v2, %v2346_v63  ;;  %v2582_v50 = vadd.f32 %v2581_v54, %v2580_v40  ;;  %v5232_v54 = vld [vmem:[#allocation23_spill] sm:$0xff] }
 0x1f1   : > { %v2614_v23 = vadd.f32 %v2613_v9, %v2612_v32  ;;  %v2583_v30 = vsel %vm2555_vm9, %v2551_v5, 0.0  ;;  %v2615_v25 = vsel %vm2587_vm10, %v2552_v60, 0.0  ;;  %v1197_v40 = vmul.f32 %v4133_v61, %v4012_v53  ;;  %v5234_v5 = vld [vmem:[#allocation10_spill] sm:$0xff] }
 0x1f2   : > { %v2317_v14 = vsel %vm2289_vm7, %v2285_v20, 0.0  ;;  %v2349_v47 = vsel %vm2321_vm8, %v2286_v10, 0.0  ;;  %v2584_v18 = vadd.f32 %v2583_v30, %v2582_v50  ;;  %v1198_v32 = vmul.f32 %v4133_v61, %v4214_v8 }
 0x1f3   : > { %v2255_v62 = vpop.permute.xlu1 %2254  ;;  %v2318_v31 = vadd.f32 %v2317_v14, %v2316_v41  ;;  %v2350_v29 = vadd.f32 %v2349_v47, %v2348_v11  ;;  %v2616_v45 = vadd.f32 %v2615_v25, %v2614_v23  ;;  %v5231_v14 = vld [vmem:[#allocation8_spill] sm:$0xff]  ;;  %v1930_v41 = vpop.permute.xlu0 %1929 }
 0x1f4   : > { %v2287_v27 = vmul.f32 %v2255_v62, %v4070_v19  ;;  %v2288_v57 = vmul.f32 %v2255_v62, %v4650_v43  ;;  %v1195_v47 = vmul.f32 %v5231_v14, %v4010_v52  ;;  %v1196_v9 = vmul.f32 %v5231_v14, %v5232_v54  ;;  %v5233_v62 = vld [vmem:[#allocation5_spill] sm:$0xff] }
 0x1f5   : > { %v1199_v60 = vmul.f32 %v5234_v5, %v5233_v62  ;;  %v1261_v61 = vsel %vm1259_vm14, %v1198_v32, 0.0 }
 0x1f6   : > { %v2319_v44 = vsel %vm2289_vm7, %v2287_v27, 0.0  ;;  %v2351_v59 = vsel %vm2321_vm8, %v2288_v57, 0.0  ;;  %v5235_v27 = vld [vmem:[#allocation25_spill] sm:$0xff]  ;;  %v1260_v50 = vsel %vm1259_vm14, %v1196_v9, 0.0 }
 0x1f7   : > { %v2320_v39 = vadd.f32 %v2319_v44, %v2318_v31  ;;  %v2352_v33 = vadd.f32 %v2351_v59, %v2350_v29  ;;  %v2521_v42 = vpop.permute.xlu1 %2520  ;;  %v1200_v57 = vmul.f32 %v5234_v5, %v5235_v27  ;;  %v1229_v31 = vsel %vm1227_vm13, %v1197_v40, 0.0 }
 0x1f8   : > { %v2553_v51 = vmul.f32 %v2521_v42, %v4070_v19  ;;  %v2554_v17 = vmul.f32 %v2521_v42, %v4650_v43  ;;  %v1228_v29 = vsel %vm1227_vm13, %v1195_v47, 0.0  ;;  %v1231_v59 = vsel %vm1227_vm13, %v1199_v60, 0.0 }
 0x1f9   : > { %v2355_v58 = vrot.slane %v2320_v39, 2  ;;  %v2356_v37 = vrot.slane %v2352_v33, 2  ;;  %v1263_v39 = vsel %vm1259_vm14, %v1200_v57, 0.0  ;;  %v1992_v33 = vmul.f32 %v1930_v41, %v4010_v52 }
 0x1fa   : > { %v2585_v26 = vsel %vm2555_vm9, %v2553_v51, 0.0  ;;  %v2617_v3 = vsel %vm2587_vm10, %v2554_v17, 0.0  ;;  %v1993_v42 = vmul.f32 %v1930_v41, %v5232_v54  ;;  %v1230_v30 = vadd.f32 %v1229_v31, %v1228_v29  ;;  %v1938_v51 = vpop.permute.xlu0 %1937  ;;  %v5236_v17 = vld [vmem:[#allocation6_spill] sm:$0xff] }
 0x1fb   : > { %v2586_v2 = vadd.f32 %v2585_v26, %v2584_v18  ;;  %v2618_v20 = vadd.f32 %v2617_v3, %v2616_v45  ;;  %v2357_v10 = vsel %vm2090_vm12, %v2355_v58, %v2356_v37  ;;  %v1934_v11 = vpop.permute.xlu1 %1933  ;;  %v1262_v25 = vadd.f32 %v1261_v61, %v1260_v50  ;;  %v5237_v58 = vld [vmem:[#allocation9_spill] sm:$0xff]  ;;  %v5238_v18 = vld [vmem:[#allocation24_spill] sm:$0xff] }
 0x1fc   : > { %2358 = vrot.lane.b32.xlu1 %v2357_v10, %s3645_s24  ;;  %v1994_v23 = vmul.f32 %v1934_v11, %v4012_v53  ;;  %v1995_v44 = vmul.f32 %v1934_v11, %v4214_v8  ;;  %v1201_v37 = vmul.f32 %v5237_v58, %v5236_v17  ;;  %v1202_v45 = vmul.f32 %v5237_v58, %v5238_v18  ;;  %v5239_v10 = vld [vmem:[#allocation7_spill] sm:$0xff] }
 0x1fd   : > { %v2621_v49 = vrot.slane %v2586_v2, 2  ;;  %v2622_v63 = vrot.slane %v2618_v20, 2  ;;  %v1232_v2 = vadd.f32 %v1231_v59, %v1230_v30  ;;  %v1264_v20 = vadd.f32 %v1263_v39, %v1262_v25  ;;  %v5242_v25 = vld [vmem:[#allocation11_spill] sm:$0xff] }
 0x1fe   : > { %v2026_v26 = vsel %vm2024_vm15, %v1994_v23, 0.0  ;;  %v2058_v3 = vsel %vm2056_vm0, %v1995_v44, 0.0  ;;  %v2025_v14 = vsel %vm2024_vm15, %v1992_v33, 0.0  ;;  %v2057_v47 = vsel %vm2056_vm0, %v1993_v42, 0.0  ;;  %v1946_v33 = vpop.permute.xlu0 %1945 }
 0x1ff   : > { %v2623_v21 = vsel %vm2090_vm12, %v2621_v49, %v2622_v63  ;;  %v5240_v49 = vld [vmem:[#allocation12_spill] sm:$0xff]  ;;  %v1942_v32 = vpop.permute.xlu1 %1941  ;;  %v1996_v9 = vmul.f32 %v1938_v51, %v5233_v62  ;;  %v1997_v41 = vmul.f32 %v1938_v51, %v5235_v27  ;;  %v2027_v11 = vadd.f32 %v2026_v26, %v2025_v14 }
 0x200   : > { %2624 = vrot.lane.b32.xlu0 %v2623_v21, %s3646_s19  ;;  %v1203_v63 = vmul.f32 %v5240_v49, %v5239_v10  ;;  %v5241_v21 = vld [vmem:[#allocation26_spill] sm:$0xff]  ;;  %v2059_v5 = vadd.f32 %v2058_v3, %v2057_v47  ;;  %v1233_v60 = vsel %vm1227_vm13, %v1201_v37, 0.0  ;;  %v1265_v57 = vsel %vm1259_vm14, %v1202_v45, 0.0  ;;  %s3243_s19 = sshll.u32 %s311_s7, 6 }
 0x201   : > { %v1204_v40 = vmul.f32 %v5240_v49, %v5241_v21  ;;  %v1998_v31 = vmul.f32 %v1942_v32, %v5236_v17  ;;  %v1999_v61 = vmul.f32 %v1942_v32, %v5238_v18  ;;  %v1234_v29 = vadd.f32 %v1233_v60, %v1232_v2  ;;  %s5107_s8 = scalar_lea.vmem [#allocation4], %s3243_s19 }
 0x202   : > { %v1266_v50 = vadd.f32 %v1265_v57, %v1264_v20  ;;  %v1235_v23 = vsel %vm1227_vm13, %v1203_v63, 0.0  ;;  %v2028_v59 = vsel %vm2024_vm15, %v1996_v9, 0.0  ;;  %v2060_v39 = vsel %vm2056_vm0, %v1997_v41, 0.0  ;;  %v5243_v20 = vld [vmem:[#allocation14_spill] sm:$0xff] }
 0x203   : > { %v1267_v44 = vsel %vm1259_vm14, %v1204_v40, 0.0  ;;  %v2029_v42 = vadd.f32 %v2028_v59, %v2027_v11  ;;  %v2061_v30 = vadd.f32 %v2060_v39, %v2059_v5  ;;  %v1205_v51 = vmul.f32 %v5242_v25, %v4025_v4  ;;  %v1950_v2 = vpop.permute.xlu1 %1949  ;;  %v5244_v39 = vld [vmem:[#allocation13_spill] sm:$0xff] }
 0x204   : > { %v1206_v58 = vmul.f32 %v5242_v25, %v4250_v48  ;;  %v2030_v37 = vsel %vm2024_vm15, %v1998_v31, 0.0  ;;  %v2062_v45 = vsel %vm2056_vm0, %v1999_v61, 0.0  ;;  %v1236_v26 = vadd.f32 %v1235_v23, %v1234_v29  ;;  %v1954_v23 = vpop.permute.xlu0 %1953 }
 0x205   : > { %v1268_v3 = vadd.f32 %v1267_v44, %v1266_v50  ;;  %v1207_v49 = vmul.f32 %v5243_v20, %v4036_v16  ;;  %v1208_v63 = vmul.f32 %v5243_v20, %v4272_v13  ;;  %v2000_v40 = vmul.f32 %v1946_v33, %v5239_v10 }
 0x206   : > { %v2001_v32 = vmul.f32 %v1946_v33, %v5241_v21  ;;  %v2031_v14 = vadd.f32 %v2030_v37, %v2029_v42  ;;  %v2063_v47 = vadd.f32 %v2062_v45, %v2061_v30  ;;  %v1237_v9 = vsel %vm1227_vm13, %v1205_v51, 0.0  ;;  %v5245_v45 = vld [vmem:[#allocation16_spill] sm:$0xff] }
 0x207   : > { %v1269_v41 = vsel %vm1259_vm14, %v1206_v58, 0.0  ;;  %v2002_v11 = vmul.f32 %v1950_v2, %v4025_v4  ;;  %v2003_v5 = vmul.f32 %v1950_v2, %v4250_v48  ;;  %v1238_v60 = vadd.f32 %v1237_v9, %v1236_v26  ;;  %v1958_v37 = vpop.permute.xlu1 %1957 }
 0x208   : > { %v1270_v57 = vadd.f32 %v1269_v41, %v1268_v3  ;;  %v1239_v31 = vsel %vm1227_vm13, %v1207_v49, 0.0  ;;  %v1271_v61 = vsel %vm1259_vm14, %v1208_v63, 0.0  ;;  %v2032_v29 = vsel %vm2024_vm15, %v2000_v40, 0.0 }
 0x209   : > { %v2064_v50 = vsel %vm2056_vm0, %v2001_v32, 0.0  ;;  %v2033_v44 = vadd.f32 %v2032_v29, %v2031_v14  ;;  %v1209_v33 = vmul.f32 %v5244_v39, %v4034_v15  ;;  %v1210_v42 = vmul.f32 %v5244_v39, %v4270_v12 }
 0x20a   : > { %v2065_v59 = vadd.f32 %v2064_v50, %v2063_v47  ;;  %v2034_v30 = vsel %vm2024_vm15, %v2002_v11, 0.0  ;;  %v2066_v25 = vsel %vm2056_vm0, %v2003_v5, 0.0  ;;  %v1240_v51 = vadd.f32 %v1239_v31, %v1238_v60  ;;  %v1962_v31 = vpop.permute.xlu0 %1961  ;;  %v5246_v50 = vld [vmem:[#allocation15_spill] sm:$0xff] }
 0x20b   : > { %v1272_v58 = vadd.f32 %v1271_v61, %v1270_v57  ;;  %v1211_v26 = vmul.f32 %v5245_v45, %v4045_v35  ;;  %v1212_v3 = vmul.f32 %v5245_v45, %v4289_v1  ;;  %v2004_v2 = vmul.f32 %v1954_v23, %v4036_v16 }
 0x20c   : > { %v2005_v20 = vmul.f32 %v1954_v23, %v4272_v13  ;;  %v2035_v49 = vadd.f32 %v2034_v30, %v2033_v44  ;;  %v2067_v63 = vadd.f32 %v2066_v25, %v2065_v59  ;;  %v1241_v40 = vsel %vm1227_vm13, %v1209_v33, 0.0  ;;  %v1966_v30 = vpop.permute.xlu1 %1965  ;;  %v5247_v25 = vld [vmem:[#allocation18_spill] sm:$0xff] }
 0x20d   : > { %v1273_v32 = vsel %vm1259_vm14, %v1210_v42, 0.0  ;;  %v2006_v14 = vmul.f32 %v1958_v37, %v4034_v15  ;;  %v2007_v47 = vmul.f32 %v1958_v37, %v4270_v12  ;;  %v1242_v9 = vadd.f32 %v1241_v40, %v1240_v51 }
 0x20e   : > { %v1274_v41 = vadd.f32 %v1273_v32, %v1272_v58  ;;  %v1243_v11 = vsel %vm1227_vm13, %v1211_v26, 0.0  ;;  %v1275_v5 = vsel %vm1259_vm14, %v1212_v3, 0.0  ;;  %v2036_v60 = vsel %vm2024_vm15, %v2004_v2, 0.0 }
 0x20f   : > { %v2068_v57 = vsel %vm2056_vm0, %v2005_v20, 0.0  ;;  %v2037_v61 = vadd.f32 %v2036_v60, %v2035_v49  ;;  %v1213_v23 = vmul.f32 %v5246_v50, %v4043_v34  ;;  %v1214_v44 = vmul.f32 %v5246_v50, %v4588_v24 }
 0x210   : > { %v2069_v29 = vadd.f32 %v2068_v57, %v2067_v63  ;;  %v2038_v59 = vsel %vm2024_vm15, %v2006_v14, 0.0  ;;  %v2070_v39 = vsel %vm2056_vm0, %v2007_v47, 0.0  ;;  %v1244_v33 = vadd.f32 %v1243_v11, %v1242_v9  ;;  %v1970_v11 = vpop.permute.xlu0 %1969  ;;  %v5248_v57 = vld [vmem:[#allocation17_spill] sm:$0xff] }
 0x211   : > { %v1276_v42 = vadd.f32 %v1275_v5, %v1274_v41  ;;  %v1215_v51 = vmul.f32 %v5247_v25, %v4054_v56  ;;  %v1216_v58 = vmul.f32 %v5247_v25, %v4594_v46  ;;  %v2008_v37 = vmul.f32 %v1962_v31, %v4045_v35 }
 0x212   : > { %v2009_v45 = vmul.f32 %v1962_v31, %v4289_v1  ;;  %v2039_v26 = vadd.f32 %v2038_v59, %v2037_v61  ;;  %v2071_v3 = vadd.f32 %v2070_v39, %v2069_v29  ;;  %v1245_v2 = vsel %vm1227_vm13, %v1213_v23, 0.0  ;;  %v1974_v59 = vpop.permute.xlu1 %1973  ;;  %v5249_v39 = vld [vmem:[#allocation20_spill] sm:$0xff] }
 0x213   : > { %v1277_v20 = vsel %vm1259_vm14, %v1214_v44, 0.0  ;;  %v2010_v49 = vmul.f32 %v1966_v30, %v4043_v34  ;;  %v2011_v63 = vmul.f32 %v1966_v30, %v4588_v24  ;;  %v1246_v40 = vadd.f32 %v1245_v2, %v1244_v33 }
 0x214   : > { %v1278_v32 = vadd.f32 %v1277_v20, %v1276_v42  ;;  %v1247_v14 = vsel %vm1227_vm13, %v1215_v51, 0.0  ;;  %v1279_v47 = vsel %vm1259_vm14, %v1216_v58, 0.0  ;;  %v2040_v9 = vsel %vm2024_vm15, %v2008_v37, 0.0 }
 0x215   : > { %v2072_v41 = vsel %vm2056_vm0, %v2009_v45, 0.0  ;;  %v2041_v5 = vadd.f32 %v2040_v9, %v2039_v26  ;;  %v1217_v31 = vmul.f32 %v5248_v57, %v4052_v55  ;;  %v1218_v61 = vmul.f32 %v5248_v57, %v4592_v28 }
 0x216   : > { %v2073_v60 = vadd.f32 %v2072_v41, %v2071_v3  ;;  %v2042_v29 = vsel %vm2024_vm15, %v2010_v49, 0.0  ;;  %v2074_v50 = vsel %vm2056_vm0, %v2011_v63, 0.0  ;;  %v1248_v23 = vadd.f32 %v1247_v14, %v1246_v40  ;;  %v1978_v14 = vpop.permute.xlu0 %1977  ;;  %v5250_v41 = vld [vmem:[#allocation19_spill] sm:$0xff] }
 0x217   : > { %v1280_v44 = vadd.f32 %v1279_v47, %v1278_v32  ;;  %v1219_v33 = vmul.f32 %v5249_v39, %v4063_v7  ;;  %v1220_v42 = vmul.f32 %v5249_v39, %v4616_v38  ;;  %v2012_v30 = vmul.f32 %v1970_v11, %v4054_v56 }
 0x218   : > { %v2013_v25 = vmul.f32 %v1970_v11, %v4594_v46  ;;  %v2043_v51 = vadd.f32 %v2042_v29, %v2041_v5  ;;  %v2075_v58 = vadd.f32 %v2074_v50, %v2073_v60  ;;  %v1249_v37 = vsel %vm1227_vm13, %v1217_v31, 0.0  ;;  %v1982_v29 = vpop.permute.xlu1 %1981  ;;  %v5251_v50 = vld [vmem:[#allocation22_spill] sm:$0xff] }
 0x219   : > { %v1281_v45 = vsel %vm1259_vm14, %v1218_v61, 0.0  ;;  %v2014_v26 = vmul.f32 %v1974_v59, %v4052_v55  ;;  %v2015_v3 = vmul.f32 %v1974_v59, %v4592_v28  ;;  %v1250_v2 = vadd.f32 %v1249_v37, %v1248_v23 }
 0x21a   : > { %v1282_v20 = vadd.f32 %v1281_v45, %v1280_v44  ;;  %v1251_v49 = vsel %vm1227_vm13, %v1219_v33, 0.0  ;;  %v1283_v63 = vsel %vm1259_vm14, %v1220_v42, 0.0  ;;  %v2044_v40 = vsel %vm2024_vm15, %v2012_v30, 0.0 }
 0x21b   : > { %v2076_v32 = vsel %vm2056_vm0, %v2013_v25, 0.0  ;;  %v2045_v47 = vadd.f32 %v2044_v40, %v2043_v51  ;;  %v1221_v11 = vmul.f32 %v5250_v41, %v4061_v6  ;;  %v1222_v5 = vmul.f32 %v5250_v41, %v4623_v36 }
 0x21c   : > { %v2077_v9 = vadd.f32 %v2076_v32, %v2075_v58  ;;  %v2046_v60 = vsel %vm2024_vm15, %v2014_v26, 0.0  ;;  %v2078_v57 = vsel %vm2056_vm0, %v2015_v3, 0.0  ;;  %v1252_v31 = vadd.f32 %v1251_v49, %v1250_v2  ;;  %v1986_v49 = vpop.permute.xlu0 %1985  ;;  %v5252_v32 = vld [vmem:[#allocation21_spill] sm:$0xff] }
 0x21d   : > { %v1284_v61 = vadd.f32 %v1283_v63, %v1282_v20  ;;  %v1223_v23 = vmul.f32 %v5251_v50, %v4072_v22  ;;  %v1224_v44 = vmul.f32 %v5251_v50, %v4633_v0  ;;  %v2016_v59 = vmul.f32 %v1978_v14, %v4063_v7 }
 0x21e   : > { %v2017_v39 = vmul.f32 %v1978_v14, %v4616_v38  ;;  %v2047_v33 = vadd.f32 %v2046_v60, %v2045_v47  ;;  %v2079_v42 = vadd.f32 %v2078_v57, %v2077_v9  ;;  %v1253_v30 = vsel %vm1227_vm13, %v1221_v11, 0.0  ;;  %v1990_v60 = vpop.permute.xlu1 %1989 }
 0x21f   : > { %v1285_v25 = vsel %vm1259_vm14, %v1222_v5, 0.0  ;;  %v2018_v51 = vmul.f32 %v1982_v29, %v4061_v6  ;;  %v2019_v58 = vmul.f32 %v1982_v29, %v4623_v36  ;;  %v1254_v37 = vadd.f32 %v1253_v30, %v1252_v31 }
 0x220   : > { %v1286_v45 = vadd.f32 %v1285_v25, %v1284_v61  ;;  %v1255_v26 = vsel %vm1227_vm13, %v1223_v23, 0.0  ;;  %v1287_v3 = vsel %vm1259_vm14, %v1224_v44, 0.0  ;;  %v2048_v2 = vsel %vm2024_vm15, %v2016_v59, 0.0 }
 0x221   : > { %v2080_v20 = vsel %vm2056_vm0, %v2017_v39, 0.0  ;;  %v2049_v63 = vadd.f32 %v2048_v2, %v2047_v33  ;;  %v1225_v14 = vmul.f32 %v5252_v32, %v4070_v19  ;;  %v1226_v47 = vmul.f32 %v5252_v32, %v4650_v43 }
 0x222   : > { %v2081_v40 = vadd.f32 %v2080_v20, %v2079_v42  ;;  %v2050_v9 = vsel %vm2024_vm15, %v2018_v51, 0.0  ;;  %v2082_v41 = vsel %vm2056_vm0, %v2019_v58, 0.0  ;;  %v1256_v11 = vadd.f32 %v1255_v26, %v1254_v37 }
 0x223   : > { %v1288_v5 = vadd.f32 %v1287_v3, %v1286_v45  ;;  %v2020_v57 = vmul.f32 %v1986_v49, %v4072_v22  ;;  %v2021_v31 = vmul.f32 %v1986_v49, %v4633_v0  ;;  %v2051_v61 = vadd.f32 %v2050_v9, %v2049_v63  ;;  %v5253_v63 = vld [vmem:[#allocation27_spill] sm:$0xff] }
 0x224   : > { %v2083_v29 = vadd.f32 %v2082_v41, %v2081_v40  ;;  %v1257_v50 = vsel %vm1227_vm13, %v1225_v14, 0.0  ;;  %v1289_v23 = vsel %vm1259_vm14, %v1226_v47, 0.0  ;;  %v2022_v44 = vmul.f32 %v1990_v60, %v4070_v19 }
 0x225   : > { %v2023_v59 = vmul.f32 %v1990_v60, %v4650_v43  ;;  %v1258_v39 = vadd.f32 %v1257_v50, %v1256_v11  ;;  %v1290_v33 = vadd.f32 %v1289_v23, %v1288_v5  ;;  %v2052_v42 = vsel %vm2024_vm15, %v2020_v57, 0.0 }
 0x226   : > { %v2084_v30 = vsel %vm2056_vm0, %v2021_v31, 0.0  ;;  %v2053_v25 = vadd.f32 %v2052_v42, %v2051_v61  ;;  %v2054_v58 = vsel %vm2024_vm15, %v2022_v44, 0.0 }
 0x227   : > { %v2085_v51 = vadd.f32 %v2084_v30, %v2083_v29  ;;  %v2086_v37 = vsel %vm2056_vm0, %v2023_v59, 0.0  ;;  %v1294_v45 = vrot.slane %v1258_v39, 1  ;;  %v1295_v26 = vrot.slane %v1290_v33, 1 }
 0x228   : > { %v2055_v3 = vadd.f32 %v2054_v58, %v2053_v25 }
 0x229   : > { %v2087_v2 = vadd.f32 %v2086_v37, %v2085_v51  ;;  %v1296_v20 = vsel %vm1293_vm11, %v1294_v45, %v1295_v26 }
 0x22a   : > { %v1298_v40 = vadd.f32 %v1296_v20, %v5253_v63  ;;  %v2091_v32 = vrot.slane %v2055_v3, 2 }
 0x22b   : > { %v2092_v14 = vrot.slane %v2087_v2, 2 }
 0x22d   : > { %v2093_v11 = vsel %vm2090_vm12, %v2091_v32, %v2092_v14 }
 0x23e   : > { %v1562_v49 = vpop.permute.xlu0 %1561 }
 0x23f   : > { %v1564_v47 = vadd.f32 %v1562_v49, %v1298_v40 }
 0x24f   : > { %v2636_v60 = vpop.permute.xlu0 %2635 }
 0x260   : > { %v1828_v9 = vpop.permute.xlu1 %1827 }
 0x261   : > { %v1830_v41 = vadd.f32 %v1828_v9, %v1564_v47 }
 0x263   : > { %v2095_v5 = vadd.f32 %v2093_v11, %v1830_v41 }
 0x26e   : > { %v2359_v57 = vpop.permute.xlu1 %2358 }
 0x26f   : > { %v2361_v31 = vadd.f32 %v2359_v57, %v2095_v5 }
 0x272   : > { %v2625_v61 = vpop.permute.xlu0 %2624 }
 0x273   : > { %v2627_v29 = vadd.f32 %v2625_v61, %v2361_v31 }
 0x275   : > { %v2638_v50 = vadd.f32 %v2636_v60, %v2627_v29 }
 0x277   : > { %v2639_v23 = vsub.f32 0.0, %v2638_v50 }
 0x279   : > { %v2640_v44 = vmul.f32 1.442695, %v2639_v23 }
 0x27b   : > { %3616 = vpow2.f32 %v2640_v44 }
 0x285   : > { %v3617_v59 = vpop.eup %3616 }
 0x286   : > { %v2642_v39 = vadd.f32 1.0, %v3617_v59 }
 0x288   : > { %3618 = vrcp.f32 %v2642_v39 }
 0x292   : > { %v3619_v33 = vpop.eup %3618 }
 0x293   : > { %v2646_v42 = vrot.slane %v3619_v33, 7 }
 0x295   : > { %2647 = vrot.lane.b32.xlu1 %v2646_v42, %s3647_s23 }
 0x307   : > { %v4985_v30 = vpop.permute.xlu1 %2647 }
 0x308   : > { %v2652_v25 = vmul.f32 %v4985_v30, %v4012_v53  ;;  %v2653_v51 = vmul.f32 %v4985_v30, %v4214_v8  ;;  %v2650_v58 = vmul.f32 %v4985_v30, %v4010_v52  ;;  %v2651_v37 = vmul.f32 %v4985_v30, %v5232_v54 }
 0x309   : > { %v2656_v45 = vmul.f32 %v4985_v30, %v5236_v17  ;;  %v2657_v26 = vmul.f32 %v4985_v30, %v5238_v18  ;;  %v2654_v3 = vmul.f32 %v4985_v30, %v5233_v62  ;;  %v2655_v53 = vmul.f32 %v4985_v30, %v5235_v27 }
 0x30a   : > { %v3556_v2 = vpack.c.bf16 %v2652_v25, %v2652_v25  ;;  %v3557_v8 = vpack.c.bf16 %v2653_v51, %v2653_v51  ;;  %v3554_v20 = vpack.c.bf16 %v2650_v58, %v2650_v58  ;;  %v3555_v49 = vpack.c.bf16 %v2651_v37, %v2651_v37 }
 0x30b   : > { %v3560_v52 = vpack.c.bf16 %v2656_v45, %v2656_v45  ;;  %v3561_v63 = vpack.c.bf16 %v2657_v26, %v2657_v26  ;;  %v3558_v40 = vpack.c.bf16 %v2654_v3, %v2654_v3  ;;  %v3559_v54 = vpack.c.bf16 %v2655_v53, %v2655_v53 }
 0x30c   : > { %v2796_v32 = vshrl.u32 %v3556_v2, 16  ;;  %v2799_v14 = vshll.u32 %v3556_v2, 16  ;;  %v2805_v17 = vshll.u32 %v3557_v8, 16  ;;  %v2782_v47 = vshrl.u32 %v3554_v20, 16 }
 0x30d   : > { %v2785_v9 = vshll.u32 %v3554_v20, 16  ;;  %v2791_v18 = vshll.u32 %v3555_v49, 16  ;;  %v2824_v41 = vshrl.u32 %v3560_v52, 16  ;;  %v2827_v11 = vshll.u32 %v3560_v52, 16 }
 0x30e   : > { %v2798_v62 = vrot.slane %v2796_v32, 4  ;;  %v2801_v5 = vrot.slane %v2799_v14, 5  ;;  %v2807_v60 = vrot.slane %v2805_v17, 5  ;;  %v2784_v27 = vrot.slane %v2782_v47, 4 }
 0x30f   : > { %v2787_v57 = vrot.slane %v2785_v9, 5  ;;  %v2793_v31 = vrot.slane %v2791_v18, 5  ;;  %v2826_v61 = vrot.slane %v2824_v41, 4  ;;  %v2829_v29 = vrot.slane %v2827_v11, 5 }
 0x310   : > { %v2802_v50 = vor.u32 %v2801_v5, %v2798_v62  ;;  %v2833_v23 = vshll.u32 %v3561_v63, 16  ;;  %v2810_v44 = vshrl.u32 %v3558_v40, 16  ;;  %v2813_v59 = vshll.u32 %v3558_v40, 16 }
 0x311   : > { %v2788_v33 = vor.u32 %v2787_v57, %v2784_v27  ;;  %v2830_v42 = vor.u32 %v2829_v29, %v2826_v61  ;;  %v2819_v25 = vshll.u32 %v3559_v54, 16  ;;  %v2660_v51 = vmul.f32 %v4985_v30, %v4025_v4 }
 0x312   : > { %v2803_v58 = vrot.slane %v2802_v50, 4  ;;  %v2835_v37 = vrot.slane %v2833_v23, 5  ;;  %v2812_v45 = vrot.slane %v2810_v44, 4  ;;  %v2815_v26 = vrot.slane %v2813_v59, 5 }
 0x313   : > { %v2789_v3 = vrot.slane %v2788_v33, 4  ;;  %v2831_v53 = vrot.slane %v2830_v42, 4  ;;  %v2821_v2 = vrot.slane %v2819_v25, 5  ;;  %v2661_v8 = vmul.f32 %v4985_v30, %v4250_v48 }
 0x314   : > { %v2808_v20 = vsel %vm5005_vm3, %v2803_v58, %v2807_v60  ;;  %v2816_v49 = vor.u32 %v2815_v26, %v2812_v45  ;;  %v3564_v52 = vpack.c.bf16 %v2660_v51, %v2660_v51  ;;  %v2658_v63 = vmul.f32 %v4985_v30, %v5239_v10 }
 0x315   : > { %3007 = vrot.lane.b32.xlu1 %v2808_v20, %s3645_s24  ;;  %v2794_v4 = vsel %vm5005_vm3, %v2789_v3, %v2793_v31  ;;  %v2836_v40 = vsel %vm5005_vm3, %v2831_v53, %v2835_v37  ;;  %v3565_v54 = vpack.c.bf16 %v2661_v8, %v2661_v8  ;;  %v2659_v48 = vmul.f32 %v4985_v30, %v5241_v21 }
 0x316   : > { %3005 = vrot.lane.b32.xlu0 %v2794_v4, %s3645_s24  ;;  %v2817_v32 = vrot.slane %v2816_v49, 4  ;;  %v2852_v14 = vshrl.u32 %v3564_v52, 16  ;;  %v2855_v17 = vshll.u32 %v3564_v52, 16  ;;  %v3562_v47 = vpack.c.bf16 %v2658_v63, %v2658_v63 }
 0x317   : > { %v2861_v9 = vshll.u32 %v3565_v54, 16  ;;  %v3563_v10 = vpack.c.bf16 %v2659_v48, %v2659_v48  ;;  %v2664_v18 = vmul.f32 %v4985_v30, %v4034_v15  ;;  %v2665_v41 = vmul.f32 %v4985_v30, %v4270_v12 }
 0x318   : > { %v2822_v11 = vsel %vm5005_vm3, %v2817_v32, %v2821_v2  ;;  %v2854_v62 = vrot.slane %v2852_v14, 4  ;;  %v2857_v5 = vrot.slane %v2855_v17, 5  ;;  %v2838_v21 = vshrl.u32 %v3562_v47, 16 }
 0x319   : > { %3011 = vrot.lane.b32.xlu1 %v2836_v40, %s3645_s24  ;;  %v2863_v60 = vrot.slane %v2861_v9, 5  ;;  %v2841_v27 = vshll.u32 %v3562_v47, 16  ;;  %v2847_v57 = vshll.u32 %v3563_v10, 16  ;;  %v3568_v31 = vpack.c.bf16 %v2664_v18, %v2664_v18 }
 0x31a   : > { %3009 = vrot.lane.b32.xlu0 %v2822_v11, %s3645_s24  ;;  %v2858_v61 = vor.u32 %v2857_v5, %v2854_v62  ;;  %v2840_v29 = vrot.slane %v2838_v21, 4  ;;  %v3569_v15 = vpack.c.bf16 %v2665_v41, %v2665_v41  ;;  %v2662_v12 = vmul.f32 %v4985_v30, %v4036_v16 }
 0x31b   : > { %v2843_v50 = vrot.slane %v2841_v27, 5  ;;  %v2849_v23 = vrot.slane %v2847_v57, 5  ;;  %v2880_v44 = vshrl.u32 %v3568_v31, 16  ;;  %v2883_v59 = vshll.u32 %v3568_v31, 16 }
 0x31c   : > { %v2859_v33 = vrot.slane %v2858_v61, 4  ;;  %v2889_v42 = vshll.u32 %v3569_v15, 16  ;;  %v2663_v25 = vmul.f32 %v4985_v30, %v4272_v13  ;;  %v3566_v51 = vpack.c.bf16 %v2662_v12, %v2662_v12 }
 0x31d   : > { %v2844_v58 = vor.u32 %v2843_v50, %v2840_v29  ;;  %v2882_v37 = vrot.slane %v2880_v44, 4  ;;  %v2885_v45 = vrot.slane %v2883_v59, 5  ;;  %v2668_v26 = vmul.f32 %v4985_v30, %v4043_v34 }
 0x31e   : > { %v2864_v3 = vsel %vm5005_vm3, %v2859_v33, %v2863_v60  ;;  %v2891_v16 = vrot.slane %v2889_v42, 5  ;;  %v3567_v53 = vpack.c.bf16 %v2663_v25, %v2663_v25  ;;  %v2866_v2 = vshrl.u32 %v3566_v51, 16 }
 0x31f   : > { %3015 = vrot.lane.b32.xlu1 %v2864_v3, %s3645_s24  ;;  %v2845_v8 = vrot.slane %v2844_v58, 4  ;;  %v2886_v20 = vor.u32 %v2885_v45, %v2882_v37  ;;  %v2869_v49 = vshll.u32 %v3566_v51, 16  ;;  %v2669_v13 = vmul.f32 %v4985_v30, %v4588_v24 }
 0x320   : > { %v2868_v52 = vrot.slane %v2866_v2, 4  ;;  %v2875_v63 = vshll.u32 %v3567_v53, 16  ;;  %v3572_v4 = vpack.c.bf16 %v2668_v26, %v2668_v26  ;;  %v2666_v34 = vmul.f32 %v4985_v30, %v4045_v35 }
 0x321   : > { %v2850_v40 = vsel %vm5005_vm3, %v2845_v8, %v2849_v23  ;;  %v2887_v54 = vrot.slane %v2886_v20, 4  ;;  %v2871_v48 = vrot.slane %v2869_v49, 5  ;;  %v3573_v32 = vpack.c.bf16 %v2669_v13, %v2669_v13 }
 0x322   : > { %3013 = vrot.lane.b32.xlu0 %v2850_v40, %s3645_s24  ;;  %v2877_v14 = vrot.slane %v2875_v63, 5  ;;  %v2908_v17 = vshrl.u32 %v3572_v4, 16  ;;  %v2911_v47 = vshll.u32 %v3572_v4, 16  ;;  %v2667_v24 = vmul.f32 %v4985_v30, %v4289_v1 }
 0x323   : > { %v2892_v9 = vsel %vm5005_vm3, %v2887_v54, %v2891_v16  ;;  %v2872_v10 = vor.u32 %v2871_v48, %v2868_v52  ;;  %v2917_v18 = vshll.u32 %v3573_v32, 16  ;;  %v3570_v35 = vpack.c.bf16 %v2666_v34, %v2666_v34 }
 0x324   : > { %3019 = vrot.lane.b32.xlu1 %v2892_v9, %s3645_s24  ;;  %v2910_v41 = vrot.slane %v2908_v17, 4  ;;  %v2913_v11 = vrot.slane %v2911_v47, 5  ;;  %v3571_v62 = vpack.c.bf16 %v2667_v24, %v2667_v24  ;;  %v2672_v5 = vmul.f32 %v4985_v30, %v4052_v55 }
 0x325   : > { %v2873_v21 = vrot.slane %v2872_v10, 4  ;;  %v2919_v60 = vrot.slane %v2917_v18, 5  ;;  %v2894_v27 = vshrl.u32 %v3570_v35, 16  ;;  %v2897_v57 = vshll.u32 %v3570_v35, 16 }
 0x326   : > { %v2914_v31 = vor.u32 %v2913_v11, %v2910_v41  ;;  %v2903_v1 = vshll.u32 %v3571_v62, 16  ;;  %v2673_v61 = vmul.f32 %v4985_v30, %v4592_v28  ;;  %v3576_v29 = vpack.c.bf16 %v2672_v5, %v2672_v5 }
 0x327   : > { %v2878_v15 = vsel %vm5005_vm3, %v2873_v21, %v2877_v14  ;;  %v2896_v12 = vrot.slane %v2894_v27, 4  ;;  %v2899_v50 = vrot.slane %v2897_v57, 5  ;;  %v2670_v23 = vmul.f32 %v4985_v30, %v4054_v56 }
 0x328   : > { %3017 = vrot.lane.b32.xlu0 %v2878_v15, %s3645_s24  ;;  %v2915_v55 = vrot.slane %v2914_v31, 4  ;;  %v2905_v44 = vrot.slane %v2903_v1, 5  ;;  %v3577_v59 = vpack.c.bf16 %v2673_v61, %v2673_v61  ;;  %v2936_v33 = vshrl.u32 %v3576_v29, 16 }
 0x329   : > { %v2900_v42 = vor.u32 %v2899_v50, %v2896_v12  ;;  %v2939_v25 = vshll.u32 %v3576_v29, 16  ;;  %v2671_v28 = vmul.f32 %v4985_v30, %v4594_v46  ;;  %v3574_v51 = vpack.c.bf16 %v2670_v23, %v2670_v23 }
 0x32a   : > { %v2920_v58 = vsel %vm5005_vm3, %v2915_v55, %v2919_v60  ;;  %v2938_v37 = vrot.slane %v2936_v33, 4  ;;  %v2945_v45 = vshll.u32 %v3577_v59, 16  ;;  %v2676_v56 = vmul.f32 %v4985_v30, %v4061_v6 }
 0x32b   : > { %3023 = vrot.lane.b32.xlu1 %v2920_v58, %s3645_s24  ;;  %v2901_v26 = vrot.slane %v2900_v42, 4  ;;  %v2941_v3 = vrot.slane %v2939_v25, 5  ;;  %v3575_v16 = vpack.c.bf16 %v2671_v28, %v2671_v28  ;;  %v2922_v53 = vshrl.u32 %v3574_v51, 16 }
 0x32c   : > { %v2925_v2 = vshll.u32 %v3574_v51, 16  ;;  %v2677_v8 = vmul.f32 %v4985_v30, %v4623_v36  ;;  %v3580_v46 = vpack.c.bf16 %v2676_v56, %v2676_v56  ;;  %v2947_v54 = vrot.slane %v2945_v45, 5 }
 0x32d   : > { %v2906_v20 = vsel %vm5005_vm3, %v2901_v26, %v2905_v44  ;;  %v2942_v49 = vor.u32 %v2941_v3, %v2938_v37  ;;  %v2924_v13 = vrot.slane %v2922_v53, 4  ;;  %v2931_v52 = vshll.u32 %v3575_v16, 16 }
 0x32e   : > { %3021 = vrot.lane.b32.xlu0 %v2906_v20, %s3645_s24  ;;  %v2927_v6 = vrot.slane %v2925_v2, 5  ;;  %v3581_v63 = vpack.c.bf16 %v2677_v8, %v2677_v8  ;;  %v2964_v4 = vshrl.u32 %v3580_v46, 16  ;;  %v2967_v34 = vshll.u32 %v3580_v46, 16 }
 0x32f   : > { %v2943_v40 = vrot.slane %v2942_v49, 4  ;;  %v2674_v48 = vmul.f32 %v4985_v30, %v4063_v7  ;;  %v2675_v36 = vmul.f32 %v4985_v30, %v4616_v38  ;;  %v2680_v18 = vmul.f32 %v4985_v30, %v4070_v19 }
 0x330   : > { %v2928_v32 = vor.u32 %v2927_v6, %v2924_v13  ;;  %v2966_v14 = vrot.slane %v2964_v4, 4  ;;  %v2969_v17 = vrot.slane %v2967_v34, 5  ;;  %v2973_v47 = vshll.u32 %v3581_v63, 16 }
 0x331   : > { %v2948_v24 = vsel %vm5005_vm3, %v2943_v40, %v2947_v54  ;;  %v3578_v9 = vpack.c.bf16 %v2674_v48, %v2674_v48  ;;  %v3579_v10 = vpack.c.bf16 %v2675_v36, %v2675_v36  ;;  %v2933_v41 = vrot.slane %v2931_v52, 5 }
 0x332   : > { %3027 = vrot.lane.b32.xlu1 %v2948_v24, %s3645_s24  ;;  %v2929_v35 = vrot.slane %v2928_v32, 4  ;;  %v2970_v7 = vor.u32 %v2969_v17, %v2966_v14  ;;  %v2681_v38 = vmul.f32 %v4985_v30, %v4650_v43  ;;  %v2975_v11 = vrot.slane %v2973_v47, 5 }
 0x333   : > { %v2950_v62 = vshrl.u32 %v3578_v9, 16  ;;  %v2953_v5 = vshll.u32 %v3578_v9, 16  ;;  %v3584_v21 = vpack.c.bf16 %v2680_v18, %v2680_v18  ;;  %v2678_v19 = vmul.f32 %v4985_v30, %v4072_v22 }
 0x334   : > { %v2934_v60 = vsel %vm5005_vm3, %v2929_v35, %v2933_v41  ;;  %v2971_v27 = vrot.slane %v2970_v7, 4  ;;  %v3585_v57 = vpack.c.bf16 %v2681_v38, %v2681_v38  ;;  %v2959_v61 = vshll.u32 %v3579_v10, 16 }
 0x335   : > { %3025 = vrot.lane.b32.xlu0 %v2934_v60, %s3645_s24  ;;  %v2952_v31 = vrot.slane %v2950_v62, 4  ;;  %v2955_v1 = vrot.slane %v2953_v5, 5  ;;  %v2992_v29 = vshrl.u32 %v3584_v21, 16  ;;  %v2995_v15 = vshll.u32 %v3584_v21, 16 }
 0x336   : > { %v2976_v43 = vsel %vm5005_vm3, %v2971_v27, %v2975_v11  ;;  %v2679_v12 = vmul.f32 %v4985_v30, %v4633_v0  ;;  %v3582_v55 = vpack.c.bf16 %v2678_v19, %v2678_v19  ;;  %v3001_v22 = vshll.u32 %v3585_v57, 16 }
 0x337   : > { %3031 = vrot.lane.b32.xlu1 %v2976_v43, %s3645_s24  ;;  %v2956_v50 = vor.u32 %v2955_v1, %v2952_v31  ;;  %v2994_v23 = vrot.slane %v2992_v29, 4  ;;  %v2997_v44 = vrot.slane %v2995_v15, 5  ;;  %v2961_v42 = vrot.slane %v2959_v61, 5 }
 0x338   : > { %v3583_v59 = vpack.c.bf16 %v2679_v12, %v2679_v12  ;;  %v2978_v25 = vshrl.u32 %v3582_v55, 16  ;;  %v2981_v28 = vshll.u32 %v3582_v55, 16  ;;  %v3003_v56 = vrot.slane %v3001_v22, 5 }
 0x339   : > { %v2957_v33 = vrot.slane %v2956_v50, 4  ;;  %v2998_v51 = vor.u32 %v2997_v44, %v2994_v23 }
 0x33a   : > { %v2980_v37 = vrot.slane %v2978_v25, 4  ;;  %v2983_v45 = vrot.slane %v2981_v28, 5  ;;  %v2987_v0 = vshll.u32 %v3583_v59, 16 }
 0x33b   : > { %v2962_v58 = vsel %vm5005_vm3, %v2957_v33, %v2961_v42  ;;  %v2999_v30 = vrot.slane %v2998_v51, 4 }
 0x33c   : > { %3029 = vrot.lane.b32.xlu0 %v2962_v58, %s3645_s24  ;;  %v2984_v26 = vor.u32 %v2983_v45, %v2980_v37  ;;  %v2989_v53 = vrot.slane %v2987_v0, 5 }
 0x33d   : > { %v3004_v3 = vsel %vm5005_vm3, %v2999_v30, %v3003_v56 }
 0x33e   : > { %3035 = vrot.lane.b32.xlu1 %v3004_v3, %s3645_s24  ;;  %v2985_v16 = vrot.slane %v2984_v26, 4 }
 0x340   : > { %v2990_v2 = vsel %vm5005_vm3, %v2985_v16, %v2989_v53 }
 0x341   : > { %3033 = vrot.lane.b32.xlu0 %v2990_v2, %s3645_s24 }
 0x387   : > { %v3008_v8 = vpop.permute.xlu1 %3007 }
 0x388   : > { %3055 = vst.msk [vmem:[%s5107_s8 + $0x4] sm:$0xf] %vm3053_vm4, %v3008_v8  ;;  %v3006_v39 = vpop.permute.xlu0 %3005 }
 0x389   : > { %3054 = vst.msk [vmem:[%s5107_s8] sm:$0xf] %vm3053_vm4, %v3006_v39 }
 0x38b   : > { %v3012_v46 = vpop.permute.xlu1 %3011 }
 0x38c   : > { %3057 = vst.msk [vmem:[%s5107_s8 + $0xc] sm:$0xf] %vm3053_vm4, %v3012_v46  ;;  %v3010_v20 = vpop.permute.xlu0 %3009 }
 0x38d   : > { %3056 = vst.msk [vmem:[%s5107_s8 + $0x8] sm:$0xf] %vm3053_vm4, %v3010_v20 }
 0x38f   : > { %v3096_v17 = vld [vmem:[%s5107_s8 + $0x4] sm:$0xf] (%p3701_p5) }
 0x390   : > { %v3094_v14 = vld [vmem:[%s5107_s8] sm:$0xf] (%p3701_p5)  ;;  %3097 = vst [vmem:[%s3078_s9 + $0x10] sm:$0xf] (%p3701_p5), %v3096_v17 }
 0x391   : > { %v3016_v49 = vpop.permute.xlu1 %3015  ;;  %3095 = vst [vmem:[%s3078_s9] sm:$0xf] (%p3701_p5), %v3094_v14 }
 0x392   : > { %3059 = vst.msk [vmem:[%s5107_s8 + $0x14] sm:$0xf] %vm3053_vm4, %v3016_v49 }
 0x393   : > { %v3100_v24 = vld [vmem:[%s5107_s8 + $0xc] sm:$0xf] (%p3701_p5) }
 0x394   : > { %v3014_v13 = vpop.permute.xlu0 %3013  ;;  %v3098_v47 = vld [vmem:[%s5107_s8 + $0x8] sm:$0xf] (%p3701_p5)  ;;  %3101 = vst [vmem:[%s3078_s9 + $0x30] sm:$0xf] (%p3701_p5), %v3100_v24 }
 0x395   : > { %3058 = vst.msk [vmem:[%s5107_s8 + $0x10] sm:$0xf] %vm3053_vm4, %v3014_v13  ;;  %3099 = vst [vmem:[%s3078_s9 + $0x20] sm:$0xf] (%p3701_p5), %v3098_v47 }
 0x396   : > { %v3020_v52 = vpop.permute.xlu1 %3019 }
 0x397   : > { %3061 = vst.msk [vmem:[%s5107_s8 + $0x1c] sm:$0xf] %vm3053_vm4, %v3020_v52 }
 0x399   : > { %v3104_v10 = vld [vmem:[%s5107_s8 + $0x14] sm:$0xf] (%p3701_p5) }
 0x39a   : > { %v3018_v6 = vpop.permute.xlu0 %3017  ;;  %3105 = vst [vmem:[%s3078_s9 + $0x50] sm:$0xf] (%p3701_p5), %v3104_v10 }
 0x39b   : > { %3060 = vst.msk [vmem:[%s5107_s8 + $0x18] sm:$0xf] %vm3053_vm4, %v3018_v6 }
 0x39c   : > { %v3102_v9 = vld [vmem:[%s5107_s8 + $0x10] sm:$0xf] (%p3701_p5) }
 0x39d   : > { %v3024_v63 = vpop.permute.xlu1 %3023  ;;  %3103 = vst [vmem:[%s3078_s9 + $0x40] sm:$0xf] (%p3701_p5), %v3102_v9 }
 0x39e   : > { %3063 = vst.msk [vmem:[%s5107_s8 + $0x24] sm:$0xf] %vm3053_vm4, %v3024_v63  ;;  %v3108_v35 = vld [vmem:[%s5107_s8 + $0x1c] sm:$0xf] (%p3701_p5) }
 0x39f   : > { %3109 = vst [vmem:[%s3078_s9 + $0x70] sm:$0xf] (%p3701_p5), %v3108_v35 }
 0x3a0   : > { %v3022_v4 = vpop.permute.xlu0 %3021 }
 0x3a1   : > { %3062 = vst.msk [vmem:[%s5107_s8 + $0x20] sm:$0xf] %vm3053_vm4, %v3022_v4 }
 0x3a2   : > { %v3106_v18 = vld [vmem:[%s5107_s8 + $0x18] sm:$0xf] (%p3701_p5) }
 0x3a3   : > { %3107 = vst [vmem:[%s3078_s9 + $0x60] sm:$0xf] (%p3701_p5), %v3106_v18 }
 0x3a4   : > { %v3028_v34 = vpop.permute.xlu1 %3027 }
 0x3a5   : > { %3065 = vst.msk [vmem:[%s5107_s8 + $0x2c] sm:$0xf] %vm3053_vm4, %v3028_v34  ;;  %v3112_v7 = vld [vmem:[%s5107_s8 + $0x24] sm:$0xf] (%p3701_p5) }
 0x3a6   : > { %3113 = vst [vmem:[%s3078_s9 + $0x90] sm:$0xf] (%p3701_p5), %v3112_v7 }
 0x3a7   : > { %v3026_v40 = vpop.permute.xlu0 %3025 }
 0x3a8   : > { %3064 = vst.msk [vmem:[%s5107_s8 + $0x28] sm:$0xf] %vm3053_vm4, %v3026_v40  ;;  %v3110_v41 = vld [vmem:[%s5107_s8 + $0x20] sm:$0xf] (%p3701_p5) }
 0x3a9   : > { %v3032_v54 = vpop.permute.xlu1 %3031  ;;  %3111 = vst [vmem:[%s3078_s9 + $0x80] sm:$0xf] (%p3701_p5), %v3110_v41 }
 0x3aa   : > { %3067 = vst.msk [vmem:[%s5107_s8 + $0x34] sm:$0xf] %vm3053_vm4, %v3032_v54 }
 0x3ac   : > { %v3116_v11 = vld [vmem:[%s5107_s8 + $0x2c] sm:$0xf] (%p3701_p5) }
 0x3ad   : > { %3117 = vst [vmem:[%s3078_s9 + $0xb0] sm:$0xf] (%p3701_p5), %v3116_v11 }
 0x3ae   : > { %v3030_v48 = vpop.permute.xlu0 %3029  ;;  %3076 = sbr.rel (!%p3701_p5) target bundleno = 957 (0x3bd), region = 77 }
 0x3af   : > { %3066 = vst.msk [vmem:[%s5107_s8 + $0x30] sm:$0xf] %vm3053_vm4, %v3030_v48  ;;  %v3114_v38 = vld [vmem:[%s5107_s8 + $0x28] sm:$0xf] (%p3701_p5) }
 0x3b0   : > { %v3036_v36 = vpop.permute.xlu1 %3035  ;;  %3115 = vst [vmem:[%s3078_s9 + $0xa0] sm:$0xf] (%p3701_p5), %v3114_v38 }
 0x3b1   : > { %3069 = vst.msk [vmem:[%s5107_s8 + $0x3c] sm:$0xf] %vm3053_vm4, %v3036_v36  ;;  %v3120_v5 = vld [vmem:[%s5107_s8 + $0x34] sm:$0xf] (%p3701_p5) }
 0x3b2   : > { %3121 = vst [vmem:[%s3078_s9 + $0xd0] sm:$0xf] (%p3701_p5), %v3120_v5 }
 0x3b3   : > { %v3034_v32 = vpop.permute.xlu0 %3033 }
 0x3b4   : > { %3068 = vst.msk [vmem:[%s5107_s8 + $0x38] sm:$0xf] %vm3053_vm4, %v3034_v32 }
 0x3b6   : > { %v3118_v62 = vld [vmem:[%s5107_s8 + $0x30] sm:$0xf] }
 0x3b7   : > { %3119 = vst [vmem:[%s3078_s9 + $0xc0] sm:$0xf] %v3118_v62 }
 0x3b8   : > { %v3124_v60 = vld [vmem:[%s5107_s8 + $0x3c] sm:$0xf] }
 0x3b9   : > { %3125 = vst [vmem:[%s3078_s9 + $0xf0] sm:$0xf] %v3124_v60 }
 0x3bb   : > { %v3122_v21 = vld [vmem:[%s5107_s8 + $0x38] sm:$0xf] }
 0x3bc   : > { %3123 = vst [vmem:[%s3078_s9 + $0xe0] sm:$0xf] %v3122_v21 }
 0x3bd PF: > { %p12_p10 = scmp.ge.s32.totalorder %s3688_s17, 6   ;;  %s5256_s14 = smov %s3638_s15 }
 0x3be   : > { %s5257_s15 = smov %s3699_s20  ;;  %s5258_s16 = smov %s3688_s17 }
 0x3bf   :  { %14 = sbr.rel (!%p12_p10) target bundleno = 5 (0x5), region = 157 }

// kernel: squeeze.3
= control target key start
LH: loop header
LB: loop body
LE: loop exit
PB: predicated region body
PF: predicated region fallthrough
CT: control target
= control target key end

     0   :  { %vm1027_vm0 = vcmask 392192   ;;  %s3317_s0 = inlined_call_operand.vmem [shape: bf16[432,4,4,4], index: 0, kind: input, shape index: {}]   ;;  %s3318_s1 = inlined_call_operand.vmem [shape: bf16[432,2,2,2,2,2,2], index: 1, kind: output, shape index: {}]  }
   0x1   :  { %v2507_v0 = vld [vmem:[%s3317_s0 + $0x78] sm:$0xff]   ;;  %v2511_v1 = vld [vmem:[%s3317_s0 + $0x70] sm:$0xff]   ;;  %v2515_v2 = vld [vmem:[%s3317_s0 + $0x68] sm:$0xff]  }
   0x2   :  { %v17_v3 = vunpack.c.h.bf16 %v2507_v0  ;;  %v49_v4 = vunpack.c.l.bf16 %v2507_v0  ;;  %v2519_v5 = vld [vmem:[%s3317_s0 + $0x60] sm:$0xff]   ;;  %v81_v6 = vunpack.c.h.bf16 %v2511_v1  ;;  %v113_v7 = vunpack.c.l.bf16 %v2511_v1  ;;  %v2523_v8 = vld [vmem:[%s3317_s0 + $0x58] sm:$0xff]   ;;  %v2527_v11 = vld [vmem:[%s3317_s0 + $0x50] sm:$0xff]  }
   0x3   :  { %v145_v9 = vunpack.c.h.bf16 %v2515_v2  ;;  %v177_v10 = vunpack.c.l.bf16 %v2515_v2  ;;  %v209_v12 = vunpack.c.h.bf16 %v2519_v5  ;;  %v241_v13 = vunpack.c.l.bf16 %v2519_v5  ;;  %v2531_v14 = vld [vmem:[%s3317_s0 + $0x48] sm:$0xff]   ;;  %v2535_v17 = vld [vmem:[%s3317_s0 + $0x40] sm:$0xff]   ;;  %v2539_v20 = vld [vmem:[%s3317_s0 + $0x38] sm:$0xff]  }
   0x4   :  { %20 = vst [vmem:[#allocation1 + $0x1f0] ss:$8 sps:$4 sm:$0xff] %v17_v3   ;;  %52 = vst [vmem:[#allocation1 + $0x1e0] ss:$8 sps:$4 sm:$0xff] %v49_v4   ;;  %v273_v15 = vunpack.c.h.bf16 %v2523_v8  ;;  %v305_v16 = vunpack.c.l.bf16 %v2523_v8  ;;  %v337_v18 = vunpack.c.h.bf16 %v2527_v11  ;;  %v369_v19 = vunpack.c.l.bf16 %v2527_v11  ;;  %v2543_v23 = vld [vmem:[%s3317_s0 + $0x30] sm:$0xff]   ;;  %v2547_v26 = vld [vmem:[%s3317_s0 + $0x28] sm:$0xff]  }
   0x5   :  { %84 = vst [vmem:[#allocation1 + $0x1d0] ss:$8 sps:$4 sm:$0xff] %v81_v6   ;;  %116 = vst [vmem:[#allocation1 + $0x1c0] ss:$8 sps:$4 sm:$0xff] %v113_v7   ;;  %v401_v21 = vunpack.c.h.bf16 %v2531_v14  ;;  %v433_v22 = vunpack.c.l.bf16 %v2531_v14  ;;  %v465_v24 = vunpack.c.h.bf16 %v2535_v17  ;;  %v497_v25 = vunpack.c.l.bf16 %v2535_v17  ;;  %v2551_v29 = vld [vmem:[%s3317_s0 + $0x20] sm:$0xff]   ;;  %v2748_v30 = vld [vmem:[%s3317_s0 + $0x18] sm:$0xff]  }
   0x6   :  { %148 = vst [vmem:[#allocation1 + $0x1b0] ss:$8 sps:$4 sm:$0xff] %v145_v9   ;;  %180 = vst [vmem:[#allocation1 + $0x1a0] ss:$8 sps:$4 sm:$0xff] %v177_v10   ;;  %v529_v27 = vunpack.c.h.bf16 %v2539_v20  ;;  %v561_v28 = vunpack.c.l.bf16 %v2539_v20  ;;  %v2753_v31 = vld [vmem:[%s3317_s0 + $0x10] sm:$0xff]   ;;  %v593_v32 = vunpack.c.h.bf16 %v2543_v23  ;;  %v625_v33 = vunpack.c.l.bf16 %v2543_v23  ;;  %v2758_v34 = vld [vmem:[%s3317_s0 + $0x8] sm:$0xff]  }
   0x7   :  { %212 = vst [vmem:[#allocation1 + $0x190] ss:$8 sps:$4 sm:$0xff] %v209_v12   ;;  %244 = vst [vmem:[#allocation1 + $0x180] ss:$8 sps:$4 sm:$0xff] %v241_v13   ;;  %v657_v38 = vunpack.c.h.bf16 %v2547_v26  ;;  %v689_v39 = vunpack.c.l.bf16 %v2547_v26  ;;  %v2763_v40 = vld [vmem:[%s3317_s0] sm:$0xff]   ;;  %v721_v44 = vunpack.c.h.bf16 %v2551_v29  ;;  %v753_v45 = vunpack.c.l.bf16 %v2551_v29 }
   0x8   :  { %276 = vst [vmem:[#allocation1 + $0x170] ss:$8 sps:$4 sm:$0xff] %v273_v15   ;;  %308 = vst [vmem:[#allocation1 + $0x160] ss:$8 sps:$4 sm:$0xff] %v305_v16   ;;  %v785_v49 = vunpack.c.h.bf16 %v2748_v30  ;;  %v817_v50 = vunpack.c.l.bf16 %v2748_v30  ;;  %v849_v54 = vunpack.c.h.bf16 %v2753_v31  ;;  %v881_v55 = vunpack.c.l.bf16 %v2753_v31 }
   0x9   :  { %340 = vst [vmem:[#allocation1 + $0x150] ss:$8 sps:$4 sm:$0xff] %v337_v18   ;;  %372 = vst [vmem:[#allocation1 + $0x140] ss:$8 sps:$4 sm:$0xff] %v369_v19   ;;  %v913_v59 = vunpack.c.h.bf16 %v2758_v34  ;;  %v945_v60 = vunpack.c.l.bf16 %v2758_v34  ;;  %v977_v0 = vunpack.c.h.bf16 %v2763_v40  ;;  %v1008_v1 = vunpack.c.l.bf16 %v2763_v40 }
   0xa   :  { %404 = vst [vmem:[#allocation1 + $0x130] ss:$8 sps:$4 sm:$0xff] %v401_v21   ;;  %436 = vst [vmem:[#allocation1 + $0x120] ss:$8 sps:$4 sm:$0xff] %v433_v22  }
   0xb   :  { %468 = vst [vmem:[#allocation1 + $0x110] ss:$8 sps:$4 sm:$0xff] %v465_v24   ;;  %500 = vst [vmem:[#allocation1 + $0x100] ss:$8 sps:$4 sm:$0xff] %v497_v25   ;;  %v1131_v35 = vld [vmem:[#allocation1 + $0x1f8] sm:$0xf]  }
   0xc   :  { %v1406_v36 = vld [vmem:[#allocation1 + $0x1e0] sm:$0xf]   ;;  %v1412_v37 = vld [vmem:[#allocation1 + $0x1e8] sm:$0xf]   ;;  %532 = vst [vmem:[#allocation1 + $0xf0] ss:$8 sps:$4 sm:$0xff] %v529_v27  }
   0xd   :  { %564 = vst [vmem:[#allocation1 + $0xe0] ss:$8 sps:$4 sm:$0xff] %v561_v28   ;;  %v1124_v41 = vld [vmem:[#allocation1 + $0x1d8] sm:$0xf]   ;;  %1134 = vst.msk [vmem:[#allocation0 + $0x3d8] sm:$0x3] %vm1027_vm0, %v1131_v35  }
   0xe   :  { %1136 = vst.msk [vmem:[#allocation0 + $0x3f6] sm:$0xc] %vm1027_vm0, %v1131_v35   ;;  %v1388_v42 = vld [vmem:[#allocation1 + $0x1c0] sm:$0xf]   ;;  %v1394_v43 = vld [vmem:[#allocation1 + $0x1c8] sm:$0xf]  }
   0xf   :  { %1408 = vst [vmem:[#allocation0 + $0x3c0] sm:$0x3] %v1406_v36   ;;  %1410 = vst [vmem:[#allocation0 + $0x3de] sm:$0xc] %v1406_v36   ;;  %v1117_v46 = vld [vmem:[#allocation1 + $0x1b8] sm:$0xf]  }
  0x10   :  { %1414 = vst [vmem:[#allocation0 + $0x3c8] sm:$0x3] %v1412_v37   ;;  %1416 = vst [vmem:[#allocation0 + $0x3e6] sm:$0xc] %v1412_v37   ;;  %v1370_v47 = vld [vmem:[#allocation1 + $0x1a0] sm:$0xf]  }
  0x11   :  { %596 = vst [vmem:[#allocation1 + $0xd0] ss:$8 sps:$4 sm:$0xff] %v593_v32   ;;  %628 = vst [vmem:[#allocation1 + $0xc0] ss:$8 sps:$4 sm:$0xff] %v625_v33   ;;  %v1376_v48 = vld [vmem:[#allocation1 + $0x1a8] sm:$0xf]  }
  0x12   :  { %1127 = vst.msk [vmem:[#allocation0 + $0x398] sm:$0x3] %vm1027_vm0, %v1124_v41   ;;  %1129 = vst.msk [vmem:[#allocation0 + $0x3b6] sm:$0xc] %vm1027_vm0, %v1124_v41   ;;  %v1110_v51 = vld [vmem:[#allocation1 + $0x198] sm:$0xf]  }
  0x13   :  { %1390 = vst [vmem:[#allocation0 + $0x380] sm:$0x3] %v1388_v42   ;;  %1392 = vst [vmem:[#allocation0 + $0x39e] sm:$0xc] %v1388_v42   ;;  %v1352_v52 = vld [vmem:[#allocation1 + $0x180] sm:$0xf]  }
  0x14   :  { %1396 = vst [vmem:[#allocation0 + $0x388] sm:$0x3] %v1394_v43   ;;  %1398 = vst [vmem:[#allocation0 + $0x3a6] sm:$0xc] %v1394_v43   ;;  %v1358_v53 = vld [vmem:[#allocation1 + $0x188] sm:$0xf]  }
  0x15   :  { %660 = vst [vmem:[#allocation1 + $0xb0] ss:$8 sps:$4 sm:$0xff] %v657_v38   ;;  %692 = vst [vmem:[#allocation1 + $0xa0] ss:$8 sps:$4 sm:$0xff] %v689_v39   ;;  %v1103_v56 = vld [vmem:[#allocation1 + $0x178] sm:$0xf]  }
  0x16   :  { %1120 = vst.msk [vmem:[#allocation0 + $0x358] sm:$0x3] %vm1027_vm0, %v1117_v46   ;;  %1122 = vst.msk [vmem:[#allocation0 + $0x376] sm:$0xc] %vm1027_vm0, %v1117_v46   ;;  %v1334_v57 = vld [vmem:[#allocation1 + $0x160] sm:$0xf]  }
  0x17   :  { %1372 = vst [vmem:[#allocation0 + $0x340] sm:$0x3] %v1370_v47   ;;  %1374 = vst [vmem:[#allocation0 + $0x35e] sm:$0xc] %v1370_v47   ;;  %v1340_v58 = vld [vmem:[#allocation1 + $0x168] sm:$0xf]  }
  0x18   :  { %1378 = vst [vmem:[#allocation0 + $0x348] sm:$0x3] %v1376_v48   ;;  %1380 = vst [vmem:[#allocation0 + $0x366] sm:$0xc] %v1376_v48   ;;  %v1096_v61 = vld [vmem:[#allocation1 + $0x158] sm:$0xf]  }
  0x19   :  { %724 = vst [vmem:[#allocation1 + $0x90] ss:$8 sps:$4 sm:$0xff] %v721_v44   ;;  %756 = vst [vmem:[#allocation1 + $0x80] ss:$8 sps:$4 sm:$0xff] %v753_v45   ;;  %v1316_v62 = vld [vmem:[#allocation1 + $0x140] sm:$0xf]  }
  0x1a   :  { %1113 = vst.msk [vmem:[#allocation0 + $0x318] sm:$0x3] %vm1027_vm0, %v1110_v51   ;;  %1115 = vst.msk [vmem:[#allocation0 + $0x336] sm:$0xc] %vm1027_vm0, %v1110_v51   ;;  %v1322_v63 = vld [vmem:[#allocation1 + $0x148] sm:$0xf]  }
  0x1b   :  { %1354 = vst [vmem:[#allocation0 + $0x300] sm:$0x3] %v1352_v52   ;;  %1356 = vst [vmem:[#allocation0 + $0x31e] sm:$0xc] %v1352_v52   ;;  %v1089_v2 = vld [vmem:[#allocation1 + $0x138] sm:$0xf]  }
  0x1c   :  { %1360 = vst [vmem:[#allocation0 + $0x308] sm:$0x3] %v1358_v53   ;;  %1362 = vst [vmem:[#allocation0 + $0x326] sm:$0xc] %v1358_v53   ;;  %v1298_v3 = vld [vmem:[#allocation1 + $0x120] sm:$0xf]  }
  0x1d   :  { %788 = vst [vmem:[#allocation1 + $0x70] ss:$8 sps:$4 sm:$0xff] %v785_v49   ;;  %820 = vst [vmem:[#allocation1 + $0x60] ss:$8 sps:$4 sm:$0xff] %v817_v50   ;;  %v1304_v4 = vld [vmem:[#allocation1 + $0x128] sm:$0xf]  }
  0x1e   :  { %1106 = vst.msk [vmem:[#allocation0 + $0x2d8] sm:$0x3] %vm1027_vm0, %v1103_v56   ;;  %1108 = vst.msk [vmem:[#allocation0 + $0x2f6] sm:$0xc] %vm1027_vm0, %v1103_v56   ;;  %v1082_v5 = vld [vmem:[#allocation1 + $0x118] sm:$0xf]  }
  0x1f   :  { %1336 = vst [vmem:[#allocation0 + $0x2c0] sm:$0x3] %v1334_v57   ;;  %1338 = vst [vmem:[#allocation0 + $0x2de] sm:$0xc] %v1334_v57   ;;  %v1280_v6 = vld [vmem:[#allocation1 + $0x100] sm:$0xf]  }
  0x20   :  { %1342 = vst [vmem:[#allocation0 + $0x2c8] sm:$0x3] %v1340_v58   ;;  %1344 = vst [vmem:[#allocation0 + $0x2e6] sm:$0xc] %v1340_v58   ;;  %v1286_v7 = vld [vmem:[#allocation1 + $0x108] sm:$0xf]  }
  0x21   :  { %852 = vst [vmem:[#allocation1 + $0x50] ss:$8 sps:$4 sm:$0xff] %v849_v54   ;;  %884 = vst [vmem:[#allocation1 + $0x40] ss:$8 sps:$4 sm:$0xff] %v881_v55   ;;  %v1075_v8 = vld [vmem:[#allocation1 + $0xf8] sm:$0xf]  }
  0x22   :  { %1099 = vst.msk [vmem:[#allocation0 + $0x298] sm:$0x3] %vm1027_vm0, %v1096_v61   ;;  %1101 = vst.msk [vmem:[#allocation0 + $0x2b6] sm:$0xc] %vm1027_vm0, %v1096_v61   ;;  %v1262_v9 = vld [vmem:[#allocation1 + $0xe0] sm:$0xf]  }
  0x23   :  { %1318 = vst [vmem:[#allocation0 + $0x280] sm:$0x3] %v1316_v62   ;;  %1320 = vst [vmem:[#allocation0 + $0x29e] sm:$0xc] %v1316_v62   ;;  %v1268_v10 = vld [vmem:[#allocation1 + $0xe8] sm:$0xf]  }
  0x24   :  { %1324 = vst [vmem:[#allocation0 + $0x288] sm:$0x3] %v1322_v63   ;;  %1326 = vst [vmem:[#allocation0 + $0x2a6] sm:$0xc] %v1322_v63   ;;  %v1068_v11 = vld [vmem:[#allocation1 + $0xd8] sm:$0xf]  }
  0x25   :  { %916 = vst [vmem:[#allocation1 + $0x30] ss:$8 sps:$4 sm:$0xff] %v913_v59   ;;  %948 = vst [vmem:[#allocation1 + $0x20] ss:$8 sps:$4 sm:$0xff] %v945_v60   ;;  %v1244_v12 = vld [vmem:[#allocation1 + $0xc0] sm:$0xf]  }
  0x26   :  { %1092 = vst.msk [vmem:[#allocation0 + $0x258] sm:$0x3] %vm1027_vm0, %v1089_v2   ;;  %1094 = vst.msk [vmem:[#allocation0 + $0x276] sm:$0xc] %vm1027_vm0, %v1089_v2   ;;  %v1250_v13 = vld [vmem:[#allocation1 + $0xc8] sm:$0xf]  }
  0x27   :  { %1300 = vst [vmem:[#allocation0 + $0x240] sm:$0x3] %v1298_v3   ;;  %1302 = vst [vmem:[#allocation0 + $0x25e] sm:$0xc] %v1298_v3   ;;  %v1061_v14 = vld [vmem:[#allocation1 + $0xb8] sm:$0xf]  }
  0x28   :  { %1306 = vst [vmem:[#allocation0 + $0x248] sm:$0x3] %v1304_v4   ;;  %1308 = vst [vmem:[#allocation0 + $0x266] sm:$0xc] %v1304_v4   ;;  %v1226_v15 = vld [vmem:[#allocation1 + $0xa0] sm:$0xf]  }
  0x29   :  { %980 = vst [vmem:[#allocation1 + $0x10] ss:$8 sps:$4 sm:$0xff] %v977_v0   ;;  %1011 = vst [vmem:[#allocation1] ss:$8 sps:$4 sm:$0xff] %v1008_v1   ;;  %v1232_v16 = vld [vmem:[#allocation1 + $0xa8] sm:$0xf]  }
  0x2a   :  { %1085 = vst.msk [vmem:[#allocation0 + $0x218] sm:$0x3] %vm1027_vm0, %v1082_v5   ;;  %1087 = vst.msk [vmem:[#allocation0 + $0x236] sm:$0xc] %vm1027_vm0, %v1082_v5   ;;  %v1054_v17 = vld [vmem:[#allocation1 + $0x98] sm:$0xf]  }
  0x2b   :  { %1282 = vst [vmem:[#allocation0 + $0x200] sm:$0x3] %v1280_v6   ;;  %1284 = vst [vmem:[#allocation0 + $0x21e] sm:$0xc] %v1280_v6   ;;  %v1208_v18 = vld [vmem:[#allocation1 + $0x80] sm:$0xf]  }
  0x2c   :  { %1288 = vst [vmem:[#allocation0 + $0x208] sm:$0x3] %v1286_v7   ;;  %1290 = vst [vmem:[#allocation0 + $0x226] sm:$0xc] %v1286_v7   ;;  %v1214_v19 = vld [vmem:[#allocation1 + $0x88] sm:$0xf]  }
  0x2d   :  { %1078 = vst.msk [vmem:[#allocation0 + $0x1d8] sm:$0x3] %vm1027_vm0, %v1075_v8   ;;  %1080 = vst.msk [vmem:[#allocation0 + $0x1f6] sm:$0xc] %vm1027_vm0, %v1075_v8   ;;  %v1047_v20 = vld [vmem:[#allocation1 + $0x78] sm:$0xf]  }
  0x2e   :  { %1264 = vst [vmem:[#allocation0 + $0x1c0] sm:$0x3] %v1262_v9   ;;  %1266 = vst [vmem:[#allocation0 + $0x1de] sm:$0xc] %v1262_v9   ;;  %v1190_v21 = vld [vmem:[#allocation1 + $0x60] sm:$0xf]  }
  0x2f   :  { %1270 = vst [vmem:[#allocation0 + $0x1c8] sm:$0x3] %v1268_v10   ;;  %1272 = vst [vmem:[#allocation0 + $0x1e6] sm:$0xc] %v1268_v10   ;;  %v1196_v22 = vld [vmem:[#allocation1 + $0x68] sm:$0xf]  }
  0x30   :  { %1071 = vst.msk [vmem:[#allocation0 + $0x198] sm:$0x3] %vm1027_vm0, %v1068_v11   ;;  %1073 = vst.msk [vmem:[#allocation0 + $0x1b6] sm:$0xc] %vm1027_vm0, %v1068_v11   ;;  %v1040_v23 = vld [vmem:[#allocation1 + $0x58] sm:$0xf]  }
  0x31   :  { %1246 = vst [vmem:[#allocation0 + $0x180] sm:$0x3] %v1244_v12   ;;  %1248 = vst [vmem:[#allocation0 + $0x19e] sm:$0xc] %v1244_v12   ;;  %v1172_v24 = vld [vmem:[#allocation1 + $0x40] sm:$0xf]  }
  0x32   :  { %1252 = vst [vmem:[#allocation0 + $0x188] sm:$0x3] %v1250_v13   ;;  %1254 = vst [vmem:[#allocation0 + $0x1a6] sm:$0xc] %v1250_v13   ;;  %v1178_v25 = vld [vmem:[#allocation1 + $0x48] sm:$0xf]  }
  0x33   :  { %1064 = vst.msk [vmem:[#allocation0 + $0x158] sm:$0x3] %vm1027_vm0, %v1061_v14   ;;  %1066 = vst.msk [vmem:[#allocation0 + $0x176] sm:$0xc] %vm1027_vm0, %v1061_v14   ;;  %v1033_v26 = vld [vmem:[#allocation1 + $0x38] sm:$0xf]  }
  0x34   :  { %1228 = vst [vmem:[#allocation0 + $0x140] sm:$0x3] %v1226_v15   ;;  %1230 = vst [vmem:[#allocation0 + $0x15e] sm:$0xc] %v1226_v15   ;;  %v1154_v27 = vld [vmem:[#allocation1 + $0x20] sm:$0xf]  }
  0x35   :  { %1234 = vst [vmem:[#allocation0 + $0x148] sm:$0x3] %v1232_v16   ;;  %1236 = vst [vmem:[#allocation0 + $0x166] sm:$0xc] %v1232_v16   ;;  %v1160_v28 = vld [vmem:[#allocation1 + $0x28] sm:$0xf]  }
  0x36   :  { %1057 = vst.msk [vmem:[#allocation0 + $0x118] sm:$0x3] %vm1027_vm0, %v1054_v17   ;;  %1059 = vst.msk [vmem:[#allocation0 + $0x136] sm:$0xc] %vm1027_vm0, %v1054_v17   ;;  %v1026_v29 = vld [vmem:[#allocation1 + $0x18] sm:$0xf]  }
  0x37   :  { %1210 = vst [vmem:[#allocation0 + $0x100] sm:$0x3] %v1208_v18   ;;  %1212 = vst [vmem:[#allocation0 + $0x11e] sm:$0xc] %v1208_v18   ;;  %v1137_v30 = vld [vmem:[#allocation1] sm:$0xf]  }
  0x38   :  { %1216 = vst [vmem:[#allocation0 + $0x108] sm:$0x3] %v1214_v19   ;;  %1218 = vst [vmem:[#allocation0 + $0x126] sm:$0xc] %v1214_v19   ;;  %v1142_v31 = vld [vmem:[#allocation1 + $0x8] sm:$0xf]  }
  0x39   :  { %1050 = vst.msk [vmem:[#allocation0 + $0xd8] sm:$0x3] %vm1027_vm0, %v1047_v20   ;;  %1052 = vst.msk [vmem:[#allocation0 + $0xf6] sm:$0xc] %vm1027_vm0, %v1047_v20   ;;  %v1148_v32 = vld [vmem:[#allocation1 + $0x10] sm:$0xf]  }
  0x3a   :  { %1192 = vst [vmem:[#allocation0 + $0xc0] sm:$0x3] %v1190_v21   ;;  %1194 = vst [vmem:[#allocation0 + $0xde] sm:$0xc] %v1190_v21   ;;  %v1166_v33 = vld [vmem:[#allocation1 + $0x30] sm:$0xf]  }
  0x3b   :  { %1198 = vst [vmem:[#allocation0 + $0xc8] sm:$0x3] %v1196_v22   ;;  %1200 = vst [vmem:[#allocation0 + $0xe6] sm:$0xc] %v1196_v22   ;;  %v1184_v34 = vld [vmem:[#allocation1 + $0x50] sm:$0xf]  }
  0x3c   :  { %1043 = vst.msk [vmem:[#allocation0 + $0x98] sm:$0x3] %vm1027_vm0, %v1040_v23   ;;  %1045 = vst.msk [vmem:[#allocation0 + $0xb6] sm:$0xc] %vm1027_vm0, %v1040_v23   ;;  %v1202_v35 = vld [vmem:[#allocation1 + $0x70] sm:$0xf]  }
  0x3d   :  { %1174 = vst [vmem:[#allocation0 + $0x80] sm:$0x3] %v1172_v24   ;;  %1176 = vst [vmem:[#allocation0 + $0x9e] sm:$0xc] %v1172_v24   ;;  %v1220_v36 = vld [vmem:[#allocation1 + $0x90] sm:$0xf]  }
  0x3e   :  { %1180 = vst [vmem:[#allocation0 + $0x88] sm:$0x3] %v1178_v25   ;;  %1182 = vst [vmem:[#allocation0 + $0xa6] sm:$0xc] %v1178_v25   ;;  %v1238_v37 = vld [vmem:[#allocation1 + $0xb0] sm:$0xf]  }
  0x3f   :  { %1036 = vst.msk [vmem:[#allocation0 + $0x58] sm:$0x3] %vm1027_vm0, %v1033_v26   ;;  %1038 = vst.msk [vmem:[#allocation0 + $0x76] sm:$0xc] %vm1027_vm0, %v1033_v26   ;;  %v1256_v38 = vld [vmem:[#allocation1 + $0xd0] sm:$0xf]  }
  0x40   :  { %1156 = vst [vmem:[#allocation0 + $0x40] sm:$0x3] %v1154_v27   ;;  %1158 = vst [vmem:[#allocation0 + $0x5e] sm:$0xc] %v1154_v27   ;;  %v1274_v39 = vld [vmem:[#allocation1 + $0xf0] sm:$0xf]  }
  0x41   :  { %1162 = vst [vmem:[#allocation0 + $0x48] sm:$0x3] %v1160_v28   ;;  %1164 = vst [vmem:[#allocation0 + $0x66] sm:$0xc] %v1160_v28   ;;  %v1292_v40 = vld [vmem:[#allocation1 + $0x110] sm:$0xf]  }
  0x42   :  { %1029 = vst.msk [vmem:[#allocation0 + $0x18] sm:$0x3] %vm1027_vm0, %v1026_v29   ;;  %1031 = vst.msk [vmem:[#allocation0 + $0x36] sm:$0xc] %vm1027_vm0, %v1026_v29   ;;  %v1310_v41 = vld [vmem:[#allocation1 + $0x130] sm:$0xf]  }
  0x43   :  { %1138 = vst [vmem:[#allocation0] sm:$0x3] %v1137_v30   ;;  %1140 = vst [vmem:[#allocation0 + $0x1e] sm:$0xc] %v1137_v30   ;;  %v1328_v42 = vld [vmem:[#allocation1 + $0x150] sm:$0xf]  }
  0x44   :  { %1144 = vst [vmem:[#allocation0 + $0x8] sm:$0x3] %v1142_v31   ;;  %1146 = vst [vmem:[#allocation0 + $0x26] sm:$0xc] %v1142_v31   ;;  %v1346_v43 = vld [vmem:[#allocation1 + $0x170] sm:$0xf]  }
  0x45   :  { %1150 = vst [vmem:[#allocation0 + $0x10] sm:$0x3] %v1148_v32   ;;  %1152 = vst [vmem:[#allocation0 + $0x2e] sm:$0xc] %v1148_v32   ;;  %v1364_v44 = vld [vmem:[#allocation1 + $0x190] sm:$0xf]  }
  0x46   :  { %1168 = vst [vmem:[#allocation0 + $0x50] sm:$0x3] %v1166_v33   ;;  %1170 = vst [vmem:[#allocation0 + $0x6e] sm:$0xc] %v1166_v33   ;;  %v1382_v45 = vld [vmem:[#allocation1 + $0x1b0] sm:$0xf]  }
  0x47   :  { %1186 = vst [vmem:[#allocation0 + $0x90] sm:$0x3] %v1184_v34   ;;  %1188 = vst [vmem:[#allocation0 + $0xae] sm:$0xc] %v1184_v34   ;;  %v1400_v46 = vld [vmem:[#allocation1 + $0x1d0] sm:$0xf]  }
  0x48   :  { %1204 = vst [vmem:[#allocation0 + $0xd0] sm:$0x3] %v1202_v35   ;;  %1206 = vst [vmem:[#allocation0 + $0xee] sm:$0xc] %v1202_v35   ;;  %v1418_v47 = vld [vmem:[#allocation1 + $0x1f0] sm:$0xf]  }
  0x49   :  { %1222 = vst [vmem:[#allocation0 + $0x110] sm:$0x3] %v1220_v36   ;;  %1224 = vst [vmem:[#allocation0 + $0x12e] sm:$0xc] %v1220_v36   ;;  %v1536_v48 = vld [vmem:[#allocation0 + $0x80] sm:$0x3] }
  0x4a   :  { %1240 = vst [vmem:[#allocation0 + $0x150] sm:$0x3] %v1238_v37   ;;  %1242 = vst [vmem:[#allocation0 + $0x16e] sm:$0xc] %v1238_v37   ;;  %v1543_v49 = vld [vmem:[#allocation0 + $0x88] sm:$0x3] }
  0x4b   :  { %1258 = vst [vmem:[#allocation0 + $0x190] sm:$0x3] %v1256_v38   ;;  %1260 = vst [vmem:[#allocation0 + $0x1ae] sm:$0xc] %v1256_v38   ;;  %v1480_v50 = vld [vmem:[#allocation0 + $0x40] sm:$0x3] }
  0x4c   :  { %1276 = vst [vmem:[#allocation0 + $0x1d0] sm:$0x3] %v1274_v39   ;;  %1278 = vst [vmem:[#allocation0 + $0x1ee] sm:$0xc] %v1274_v39   ;;  %v1487_v51 = vld [vmem:[#allocation0 + $0x48] sm:$0x3] }
  0x4d   :  { %1294 = vst [vmem:[#allocation0 + $0x210] sm:$0x3] %v1292_v40   ;;  %1296 = vst [vmem:[#allocation0 + $0x22e] sm:$0xc] %v1292_v40   ;;  %v1501_v52 = vld [vmem:[#allocation0 + $0x58] sm:$0x3] }
  0x4e   :  { %1312 = vst [vmem:[#allocation0 + $0x250] sm:$0x3] %v1310_v41   ;;  %1314 = vst [vmem:[#allocation0 + $0x26e] sm:$0xc] %v1310_v41   ;;  %v2698_v53 = vmov 0.0  }
  0x4f   :  { %1330 = vst [vmem:[#allocation0 + $0x290] sm:$0x3] %v1328_v42   ;;  %1332 = vst [vmem:[#allocation0 + $0x2ae] sm:$0xc] %v1328_v42   ;;  %v1537_v54 = vpack.c.bf16 %v2698_v53, %v1536_v48  ;;  %v1544_v55 = vpack.c.bf16 %v2698_v53, %v1543_v49  ;;  %v1427_v56 = vld [vmem:[#allocation0] sm:$0x3]  ;;  %v1481_v59 = vpack.c.bf16 %v2698_v53, %v1480_v50 }
  0x50   :  { %1348 = vst [vmem:[#allocation0 + $0x2d0] sm:$0x3] %v1346_v43   ;;  %1350 = vst [vmem:[#allocation0 + $0x2ee] sm:$0xc] %v1346_v43   ;;  %v1432_v57 = vld [vmem:[#allocation0 + $0x8] sm:$0x3]  ;;  %v1488_v60 = vpack.c.bf16 %v2698_v53, %v1487_v51  ;;  %v1502_v61 = vpack.c.bf16 %v2698_v53, %v1501_v52  ;;  %v1428_v62 = vpack.c.bf16 %v2698_v53, %v1427_v56 }
  0x51   :  { %1366 = vst [vmem:[#allocation0 + $0x310] sm:$0x3] %v1364_v44   ;;  %1368 = vst [vmem:[#allocation0 + $0x32e] sm:$0xc] %v1364_v44   ;;  %v1445_v58 = vld [vmem:[#allocation0 + $0x18] sm:$0x3]  ;;  %v1433_v63 = vpack.c.bf16 %v2698_v53, %v1432_v57 }
  0x52   :  { %1384 = vst [vmem:[#allocation0 + $0x350] sm:$0x3] %v1382_v45   ;;  %1386 = vst [vmem:[#allocation0 + $0x36e] sm:$0xc] %v1382_v45   ;;  %v1438_v0 = vld [vmem:[#allocation0 + $0x10] sm:$0x3]  ;;  %v1446_v1 = vpack.c.bf16 %v2698_v53, %v1445_v58 }
  0x53   :  { %1402 = vst [vmem:[#allocation0 + $0x390] sm:$0x3] %v1400_v46   ;;  %1404 = vst [vmem:[#allocation0 + $0x3ae] sm:$0xc] %v1400_v46   ;;  %v1452_v2 = vld [vmem:[#allocation0 + $0x20] sm:$0x3]  ;;  %v1439_v4 = vpack.c.bf16 %v2698_v53, %v1438_v0 }
  0x54   :  { %1420 = vst [vmem:[#allocation0 + $0x3d0] sm:$0x3] %v1418_v47   ;;  %1422 = vst [vmem:[#allocation0 + $0x3ee] sm:$0xc] %v1418_v47   ;;  %v1459_v3 = vld [vmem:[#allocation0 + $0x28] sm:$0x3]  ;;  %v1453_v5 = vpack.c.bf16 %v2698_v53, %v1452_v2 }
  0x55   :  { %2585 = vst [vmem:[%s3318_s1 + $0x10] sm:$0x1] %v1537_v54  ;;  %2586 = vst [vmem:[%s3318_s1 + $0x11] sm:$0x1] %v1544_v55  ;;  %v1460_v6 = vpack.c.bf16 %v2698_v53, %v1459_v3  ;;  %v1466_v7 = vld [vmem:[#allocation0 + $0x30] sm:$0x3] }
  0x56   :  { %v1473_v8 = vld [vmem:[#allocation0 + $0x38] sm:$0x3]  ;;  %2577 = vst [vmem:[%s3318_s1 + $0x8] sm:$0x1] %v1481_v59  ;;  %2578 = vst [vmem:[%s3318_s1 + $0x9] sm:$0x1] %v1488_v60  ;;  %v1467_v10 = vpack.c.bf16 %v2698_v53, %v1466_v7 }
  0x57   :  { %v1494_v9 = vld [vmem:[#allocation0 + $0x50] sm:$0x3]  ;;  %2580 = vst [vmem:[%s3318_s1 + $0xb] sm:$0x1] %v1502_v61  ;;  %1430 = vst [vmem:[%s3318_s1] sm:$0x1] %v1428_v62  ;;  %v1474_v11 = vpack.c.bf16 %v2698_v53, %v1473_v8 }
  0x58   :  { %2570 = vst [vmem:[%s3318_s1 + $0x1] sm:$0x1] %v1433_v63  ;;  %2572 = vst [vmem:[%s3318_s1 + $0x3] sm:$0x1] %v1446_v1  ;;  %v1495_v12 = vpack.c.bf16 %v2698_v53, %v1494_v9  ;;  %v1508_v13 = vld [vmem:[#allocation0 + $0x60] sm:$0x3] }
  0x59   :  { %v1515_v14 = vld [vmem:[#allocation0 + $0x68] sm:$0x3]  ;;  %v1522_v15 = vld [vmem:[#allocation0 + $0x70] sm:$0x3]  ;;  %2571 = vst [vmem:[%s3318_s1 + $0x2] sm:$0x1] %v1439_v4  ;;  %v1509_v16 = vpack.c.bf16 %v2698_v53, %v1508_v13 }
  0x5a   :  { %2573 = vst [vmem:[%s3318_s1 + $0x4] sm:$0x1] %v1453_v5  ;;  %2574 = vst [vmem:[%s3318_s1 + $0x5] sm:$0x1] %v1460_v6  ;;  %v1516_v17 = vpack.c.bf16 %v2698_v53, %v1515_v14  ;;  %v1523_v18 = vpack.c.bf16 %v2698_v53, %v1522_v15  ;;  %v1529_v19 = vld [vmem:[#allocation0 + $0x78] sm:$0x3] }
  0x5b   :  { %v1550_v20 = vld [vmem:[#allocation0 + $0x90] sm:$0x3]  ;;  %v1557_v21 = vld [vmem:[#allocation0 + $0x98] sm:$0x3]  ;;  %2575 = vst [vmem:[%s3318_s1 + $0x6] sm:$0x1] %v1467_v10  ;;  %v1530_v22 = vpack.c.bf16 %v2698_v53, %v1529_v19 }
  0x5c   :  { %2576 = vst [vmem:[%s3318_s1 + $0x7] sm:$0x1] %v1474_v11  ;;  %2579 = vst [vmem:[%s3318_s1 + $0xa] sm:$0x1] %v1495_v12  ;;  %v1551_v23 = vpack.c.bf16 %v2698_v53, %v1550_v20  ;;  %v1558_v24 = vpack.c.bf16 %v2698_v53, %v1557_v21  ;;  %v1564_v25 = vld [vmem:[#allocation0 + $0xa0] sm:$0x3] }
  0x5d   :  { %v1571_v26 = vld [vmem:[#allocation0 + $0xa8] sm:$0x3]  ;;  %v1578_v27 = vld [vmem:[#allocation0 + $0xb0] sm:$0x3]  ;;  %2581 = vst [vmem:[%s3318_s1 + $0xc] sm:$0x1] %v1509_v16  ;;  %v1565_v28 = vpack.c.bf16 %v2698_v53, %v1564_v25 }
  0x5e   :  { %2582 = vst [vmem:[%s3318_s1 + $0xd] sm:$0x1] %v1516_v17  ;;  %2583 = vst [vmem:[%s3318_s1 + $0xe] sm:$0x1] %v1523_v18  ;;  %v1572_v29 = vpack.c.bf16 %v2698_v53, %v1571_v26  ;;  %v1579_v30 = vpack.c.bf16 %v2698_v53, %v1578_v27  ;;  %v1585_v31 = vld [vmem:[#allocation0 + $0xb8] sm:$0x3] }
  0x5f   :  { %v1592_v32 = vld [vmem:[#allocation0 + $0xc0] sm:$0x3]  ;;  %v1599_v33 = vld [vmem:[#allocation0 + $0xc8] sm:$0x3]  ;;  %2584 = vst [vmem:[%s3318_s1 + $0xf] sm:$0x1] %v1530_v22  ;;  %v1586_v34 = vpack.c.bf16 %v2698_v53, %v1585_v31 }
  0x60   :  { %2587 = vst [vmem:[%s3318_s1 + $0x12] sm:$0x1] %v1551_v23  ;;  %2588 = vst [vmem:[%s3318_s1 + $0x13] sm:$0x1] %v1558_v24  ;;  %v1593_v35 = vpack.c.bf16 %v2698_v53, %v1592_v32  ;;  %v1600_v36 = vpack.c.bf16 %v2698_v53, %v1599_v33  ;;  %v1606_v37 = vld [vmem:[#allocation0 + $0xd0] sm:$0x3] }
  0x61   :  { %v1613_v38 = vld [vmem:[#allocation0 + $0xd8] sm:$0x3]  ;;  %v1620_v39 = vld [vmem:[#allocation0 + $0xe0] sm:$0x3]  ;;  %2589 = vst [vmem:[%s3318_s1 + $0x14] sm:$0x1] %v1565_v28  ;;  %v1607_v40 = vpack.c.bf16 %v2698_v53, %v1606_v37 }
  0x62   :  { %2590 = vst [vmem:[%s3318_s1 + $0x15] sm:$0x1] %v1572_v29  ;;  %2591 = vst [vmem:[%s3318_s1 + $0x16] sm:$0x1] %v1579_v30  ;;  %v1614_v41 = vpack.c.bf16 %v2698_v53, %v1613_v38  ;;  %v1621_v42 = vpack.c.bf16 %v2698_v53, %v1620_v39  ;;  %v1627_v43 = vld [vmem:[#allocation0 + $0xe8] sm:$0x3] }
  0x63   :  { %v1634_v44 = vld [vmem:[#allocation0 + $0xf0] sm:$0x3]  ;;  %v1641_v45 = vld [vmem:[#allocation0 + $0xf8] sm:$0x3]  ;;  %2592 = vst [vmem:[%s3318_s1 + $0x17] sm:$0x1] %v1586_v34  ;;  %v1628_v46 = vpack.c.bf16 %v2698_v53, %v1627_v43 }
  0x64   :  { %2593 = vst [vmem:[%s3318_s1 + $0x18] sm:$0x1] %v1593_v35  ;;  %2594 = vst [vmem:[%s3318_s1 + $0x19] sm:$0x1] %v1600_v36  ;;  %v1635_v47 = vpack.c.bf16 %v2698_v53, %v1634_v44  ;;  %v1642_v48 = vpack.c.bf16 %v2698_v53, %v1641_v45  ;;  %v1648_v49 = vld [vmem:[#allocation0 + $0x100] sm:$0x3] }
  0x65   :  { %v1655_v50 = vld [vmem:[#allocation0 + $0x108] sm:$0x3]  ;;  %v1662_v51 = vld [vmem:[#allocation0 + $0x110] sm:$0x3]  ;;  %2595 = vst [vmem:[%s3318_s1 + $0x1a] sm:$0x1] %v1607_v40  ;;  %v1649_v52 = vpack.c.bf16 %v2698_v53, %v1648_v49 }
  0x66   :  { %2596 = vst [vmem:[%s3318_s1 + $0x1b] sm:$0x1] %v1614_v41  ;;  %2597 = vst [vmem:[%s3318_s1 + $0x1c] sm:$0x1] %v1621_v42  ;;  %v1656_v54 = vpack.c.bf16 %v2698_v53, %v1655_v50  ;;  %v1663_v55 = vpack.c.bf16 %v2698_v53, %v1662_v51  ;;  %v1669_v56 = vld [vmem:[#allocation0 + $0x118] sm:$0x3] }
  0x67   :  { %v1676_v57 = vld [vmem:[#allocation0 + $0x120] sm:$0x3]  ;;  %v1683_v58 = vld [vmem:[#allocation0 + $0x128] sm:$0x3]  ;;  %2598 = vst [vmem:[%s3318_s1 + $0x1d] sm:$0x1] %v1628_v46  ;;  %v1670_v59 = vpack.c.bf16 %v2698_v53, %v1669_v56 }
  0x68   :  { %2599 = vst [vmem:[%s3318_s1 + $0x1e] sm:$0x1] %v1635_v47  ;;  %2600 = vst [vmem:[%s3318_s1 + $0x1f] sm:$0x1] %v1642_v48  ;;  %v1677_v60 = vpack.c.bf16 %v2698_v53, %v1676_v57  ;;  %v1684_v61 = vpack.c.bf16 %v2698_v53, %v1683_v58  ;;  %v1690_v62 = vld [vmem:[#allocation0 + $0x130] sm:$0x3] }
  0x69   :  { %v1697_v63 = vld [vmem:[#allocation0 + $0x138] sm:$0x3]  ;;  %v1704_v0 = vld [vmem:[#allocation0 + $0x140] sm:$0x3]  ;;  %2601 = vst [vmem:[%s3318_s1 + $0x20] sm:$0x1] %v1649_v52  ;;  %v1691_v1 = vpack.c.bf16 %v2698_v53, %v1690_v62 }
  0x6a   :  { %2602 = vst [vmem:[%s3318_s1 + $0x21] sm:$0x1] %v1656_v54  ;;  %2603 = vst [vmem:[%s3318_s1 + $0x22] sm:$0x1] %v1663_v55  ;;  %v1698_v2 = vpack.c.bf16 %v2698_v53, %v1697_v63  ;;  %v1705_v3 = vpack.c.bf16 %v2698_v53, %v1704_v0  ;;  %v1711_v4 = vld [vmem:[#allocation0 + $0x148] sm:$0x3] }
  0x6b   :  { %v1718_v5 = vld [vmem:[#allocation0 + $0x150] sm:$0x3]  ;;  %v1725_v6 = vld [vmem:[#allocation0 + $0x158] sm:$0x3]  ;;  %2604 = vst [vmem:[%s3318_s1 + $0x23] sm:$0x1] %v1670_v59  ;;  %v1712_v7 = vpack.c.bf16 %v2698_v53, %v1711_v4 }
  0x6c   :  { %2605 = vst [vmem:[%s3318_s1 + $0x24] sm:$0x1] %v1677_v60  ;;  %2606 = vst [vmem:[%s3318_s1 + $0x25] sm:$0x1] %v1684_v61  ;;  %v1719_v8 = vpack.c.bf16 %v2698_v53, %v1718_v5  ;;  %v1726_v9 = vpack.c.bf16 %v2698_v53, %v1725_v6  ;;  %v1732_v10 = vld [vmem:[#allocation0 + $0x160] sm:$0x3] }
  0x6d   :  { %v1739_v11 = vld [vmem:[#allocation0 + $0x168] sm:$0x3]  ;;  %v1746_v12 = vld [vmem:[#allocation0 + $0x170] sm:$0x3]  ;;  %2607 = vst [vmem:[%s3318_s1 + $0x26] sm:$0x1] %v1691_v1  ;;  %v1733_v13 = vpack.c.bf16 %v2698_v53, %v1732_v10 }
  0x6e   :  { %2608 = vst [vmem:[%s3318_s1 + $0x27] sm:$0x1] %v1698_v2  ;;  %2609 = vst [vmem:[%s3318_s1 + $0x28] sm:$0x1] %v1705_v3  ;;  %v1740_v14 = vpack.c.bf16 %v2698_v53, %v1739_v11  ;;  %v1747_v15 = vpack.c.bf16 %v2698_v53, %v1746_v12  ;;  %v1753_v16 = vld [vmem:[#allocation0 + $0x178] sm:$0x3] }
  0x6f   :  { %v1760_v17 = vld [vmem:[#allocation0 + $0x180] sm:$0x3]  ;;  %v1767_v18 = vld [vmem:[#allocation0 + $0x188] sm:$0x3]  ;;  %2610 = vst [vmem:[%s3318_s1 + $0x29] sm:$0x1] %v1712_v7  ;;  %v1754_v19 = vpack.c.bf16 %v2698_v53, %v1753_v16 }
  0x70   :  { %2611 = vst [vmem:[%s3318_s1 + $0x2a] sm:$0x1] %v1719_v8  ;;  %2612 = vst [vmem:[%s3318_s1 + $0x2b] sm:$0x1] %v1726_v9  ;;  %v1761_v20 = vpack.c.bf16 %v2698_v53, %v1760_v17  ;;  %v1768_v21 = vpack.c.bf16 %v2698_v53, %v1767_v18  ;;  %v1774_v22 = vld [vmem:[#allocation0 + $0x190] sm:$0x3] }
  0x71   :  { %v1781_v23 = vld [vmem:[#allocation0 + $0x198] sm:$0x3]  ;;  %v1788_v24 = vld [vmem:[#allocation0 + $0x1a0] sm:$0x3]  ;;  %2613 = vst [vmem:[%s3318_s1 + $0x2c] sm:$0x1] %v1733_v13  ;;  %v1775_v25 = vpack.c.bf16 %v2698_v53, %v1774_v22 }
  0x72   :  { %2614 = vst [vmem:[%s3318_s1 + $0x2d] sm:$0x1] %v1740_v14  ;;  %2615 = vst [vmem:[%s3318_s1 + $0x2e] sm:$0x1] %v1747_v15  ;;  %v1782_v26 = vpack.c.bf16 %v2698_v53, %v1781_v23  ;;  %v1789_v27 = vpack.c.bf16 %v2698_v53, %v1788_v24  ;;  %v1795_v28 = vld [vmem:[#allocation0 + $0x1a8] sm:$0x3] }
  0x73   :  { %v1802_v29 = vld [vmem:[#allocation0 + $0x1b0] sm:$0x3]  ;;  %v1809_v30 = vld [vmem:[#allocation0 + $0x1b8] sm:$0x3]  ;;  %2616 = vst [vmem:[%s3318_s1 + $0x2f] sm:$0x1] %v1754_v19  ;;  %v1796_v31 = vpack.c.bf16 %v2698_v53, %v1795_v28 }
  0x74   :  { %2617 = vst [vmem:[%s3318_s1 + $0x30] sm:$0x1] %v1761_v20  ;;  %2618 = vst [vmem:[%s3318_s1 + $0x31] sm:$0x1] %v1768_v21  ;;  %v1803_v32 = vpack.c.bf16 %v2698_v53, %v1802_v29  ;;  %v1810_v33 = vpack.c.bf16 %v2698_v53, %v1809_v30  ;;  %v1816_v34 = vld [vmem:[#allocation0 + $0x1c0] sm:$0x3] }
  0x75   :  { %v1823_v35 = vld [vmem:[#allocation0 + $0x1c8] sm:$0x3]  ;;  %v1830_v36 = vld [vmem:[#allocation0 + $0x1d0] sm:$0x3]  ;;  %2619 = vst [vmem:[%s3318_s1 + $0x32] sm:$0x1] %v1775_v25  ;;  %v1817_v37 = vpack.c.bf16 %v2698_v53, %v1816_v34 }
  0x76   :  { %2620 = vst [vmem:[%s3318_s1 + $0x33] sm:$0x1] %v1782_v26  ;;  %2621 = vst [vmem:[%s3318_s1 + $0x34] sm:$0x1] %v1789_v27  ;;  %v1824_v38 = vpack.c.bf16 %v2698_v53, %v1823_v35  ;;  %v1831_v39 = vpack.c.bf16 %v2698_v53, %v1830_v36  ;;  %v1837_v40 = vld [vmem:[#allocation0 + $0x1d8] sm:$0x3] }
  0x77   :  { %v1844_v41 = vld [vmem:[#allocation0 + $0x1e0] sm:$0x3]  ;;  %v1851_v42 = vld [vmem:[#allocation0 + $0x1e8] sm:$0x3]  ;;  %2622 = vst [vmem:[%s3318_s1 + $0x35] sm:$0x1] %v1796_v31  ;;  %v1838_v43 = vpack.c.bf16 %v2698_v53, %v1837_v40 }
  0x78   :  { %2623 = vst [vmem:[%s3318_s1 + $0x36] sm:$0x1] %v1803_v32  ;;  %2624 = vst [vmem:[%s3318_s1 + $0x37] sm:$0x1] %v1810_v33  ;;  %v1845_v44 = vpack.c.bf16 %v2698_v53, %v1844_v41  ;;  %v1852_v45 = vpack.c.bf16 %v2698_v53, %v1851_v42  ;;  %v1858_v46 = vld [vmem:[#allocation0 + $0x1f0] sm:$0x3] }
  0x79   :  { %v1865_v47 = vld [vmem:[#allocation0 + $0x1f8] sm:$0x3]  ;;  %v1872_v48 = vld [vmem:[#allocation0 + $0x200] sm:$0x3]  ;;  %2625 = vst [vmem:[%s3318_s1 + $0x38] sm:$0x1] %v1817_v37  ;;  %v1859_v49 = vpack.c.bf16 %v2698_v53, %v1858_v46 }
  0x7a   :  { %2626 = vst [vmem:[%s3318_s1 + $0x39] sm:$0x1] %v1824_v38  ;;  %2627 = vst [vmem:[%s3318_s1 + $0x3a] sm:$0x1] %v1831_v39  ;;  %v1866_v50 = vpack.c.bf16 %v2698_v53, %v1865_v47  ;;  %v1873_v51 = vpack.c.bf16 %v2698_v53, %v1872_v48  ;;  %v1879_v52 = vld [vmem:[#allocation0 + $0x208] sm:$0x3] }
  0x7b   :  { %v1886_v54 = vld [vmem:[#allocation0 + $0x210] sm:$0x3]  ;;  %v1893_v55 = vld [vmem:[#allocation0 + $0x218] sm:$0x3]  ;;  %2628 = vst [vmem:[%s3318_s1 + $0x3b] sm:$0x1] %v1838_v43  ;;  %v1880_v56 = vpack.c.bf16 %v2698_v53, %v1879_v52 }
  0x7c   :  { %2629 = vst [vmem:[%s3318_s1 + $0x3c] sm:$0x1] %v1845_v44  ;;  %2630 = vst [vmem:[%s3318_s1 + $0x3d] sm:$0x1] %v1852_v45  ;;  %v1887_v57 = vpack.c.bf16 %v2698_v53, %v1886_v54  ;;  %v1894_v58 = vpack.c.bf16 %v2698_v53, %v1893_v55  ;;  %v1900_v59 = vld [vmem:[#allocation0 + $0x220] sm:$0x3] }
  0x7d   :  { %v1907_v60 = vld [vmem:[#allocation0 + $0x228] sm:$0x3]  ;;  %v1914_v61 = vld [vmem:[#allocation0 + $0x230] sm:$0x3]  ;;  %2631 = vst [vmem:[%s3318_s1 + $0x3e] sm:$0x1] %v1859_v49  ;;  %v1901_v62 = vpack.c.bf16 %v2698_v53, %v1900_v59 }
  0x7e   :  { %2632 = vst [vmem:[%s3318_s1 + $0x3f] sm:$0x1] %v1866_v50  ;;  %2633 = vst [vmem:[%s3318_s1 + $0x40] sm:$0x1] %v1873_v51  ;;  %v1908_v63 = vpack.c.bf16 %v2698_v53, %v1907_v60  ;;  %v1915_v0 = vpack.c.bf16 %v2698_v53, %v1914_v61  ;;  %v1921_v1 = vld [vmem:[#allocation0 + $0x238] sm:$0x3] }
  0x7f   :  { %v1928_v2 = vld [vmem:[#allocation0 + $0x240] sm:$0x3]  ;;  %v1935_v3 = vld [vmem:[#allocation0 + $0x248] sm:$0x3]  ;;  %2634 = vst [vmem:[%s3318_s1 + $0x41] sm:$0x1] %v1880_v56  ;;  %v1922_v4 = vpack.c.bf16 %v2698_v53, %v1921_v1 }
  0x80   :  { %2635 = vst [vmem:[%s3318_s1 + $0x42] sm:$0x1] %v1887_v57  ;;  %2636 = vst [vmem:[%s3318_s1 + $0x43] sm:$0x1] %v1894_v58  ;;  %v1929_v5 = vpack.c.bf16 %v2698_v53, %v1928_v2  ;;  %v1936_v6 = vpack.c.bf16 %v2698_v53, %v1935_v3  ;;  %v1942_v7 = vld [vmem:[#allocation0 + $0x250] sm:$0x3] }
  0x81   :  { %v1949_v8 = vld [vmem:[#allocation0 + $0x258] sm:$0x3]  ;;  %v1956_v9 = vld [vmem:[#allocation0 + $0x260] sm:$0x3]  ;;  %2637 = vst [vmem:[%s3318_s1 + $0x44] sm:$0x1] %v1901_v62  ;;  %v1943_v10 = vpack.c.bf16 %v2698_v53, %v1942_v7 }
  0x82   :  { %2638 = vst [vmem:[%s3318_s1 + $0x45] sm:$0x1] %v1908_v63  ;;  %2639 = vst [vmem:[%s3318_s1 + $0x46] sm:$0x1] %v1915_v0  ;;  %v1950_v11 = vpack.c.bf16 %v2698_v53, %v1949_v8  ;;  %v1957_v12 = vpack.c.bf16 %v2698_v53, %v1956_v9  ;;  %v1963_v13 = vld [vmem:[#allocation0 + $0x268] sm:$0x3] }
  0x83   :  { %v1970_v14 = vld [vmem:[#allocation0 + $0x270] sm:$0x3]  ;;  %v1977_v15 = vld [vmem:[#allocation0 + $0x278] sm:$0x3]  ;;  %2640 = vst [vmem:[%s3318_s1 + $0x47] sm:$0x1] %v1922_v4  ;;  %v1964_v16 = vpack.c.bf16 %v2698_v53, %v1963_v13 }
  0x84   :  { %2641 = vst [vmem:[%s3318_s1 + $0x48] sm:$0x1] %v1929_v5  ;;  %2642 = vst [vmem:[%s3318_s1 + $0x49] sm:$0x1] %v1936_v6  ;;  %v1971_v17 = vpack.c.bf16 %v2698_v53, %v1970_v14  ;;  %v1978_v18 = vpack.c.bf16 %v2698_v53, %v1977_v15  ;;  %v1984_v19 = vld [vmem:[#allocation0 + $0x280] sm:$0x3] }
  0x85   :  { %v1991_v20 = vld [vmem:[#allocation0 + $0x288] sm:$0x3]  ;;  %v1998_v21 = vld [vmem:[#allocation0 + $0x290] sm:$0x3]  ;;  %2643 = vst [vmem:[%s3318_s1 + $0x4a] sm:$0x1] %v1943_v10  ;;  %v1985_v22 = vpack.c.bf16 %v2698_v53, %v1984_v19 }
  0x86   :  { %2644 = vst [vmem:[%s3318_s1 + $0x4b] sm:$0x1] %v1950_v11  ;;  %2645 = vst [vmem:[%s3318_s1 + $0x4c] sm:$0x1] %v1957_v12  ;;  %v1992_v23 = vpack.c.bf16 %v2698_v53, %v1991_v20  ;;  %v1999_v24 = vpack.c.bf16 %v2698_v53, %v1998_v21  ;;  %v2005_v25 = vld [vmem:[#allocation0 + $0x298] sm:$0x3] }
  0x87   :  { %v2012_v26 = vld [vmem:[#allocation0 + $0x2a0] sm:$0x3]  ;;  %v2019_v27 = vld [vmem:[#allocation0 + $0x2a8] sm:$0x3]  ;;  %2646 = vst [vmem:[%s3318_s1 + $0x4d] sm:$0x1] %v1964_v16  ;;  %v2006_v28 = vpack.c.bf16 %v2698_v53, %v2005_v25 }
  0x88   :  { %2647 = vst [vmem:[%s3318_s1 + $0x4e] sm:$0x1] %v1971_v17  ;;  %2648 = vst [vmem:[%s3318_s1 + $0x4f] sm:$0x1] %v1978_v18  ;;  %v2013_v29 = vpack.c.bf16 %v2698_v53, %v2012_v26  ;;  %v2020_v30 = vpack.c.bf16 %v2698_v53, %v2019_v27  ;;  %v2026_v31 = vld [vmem:[#allocation0 + $0x2b0] sm:$0x3] }
  0x89   :  { %v2033_v32 = vld [vmem:[#allocation0 + $0x2b8] sm:$0x3]  ;;  %v2040_v33 = vld [vmem:[#allocation0 + $0x2c0] sm:$0x3]  ;;  %2649 = vst [vmem:[%s3318_s1 + $0x50] sm:$0x1] %v1985_v22  ;;  %v2027_v34 = vpack.c.bf16 %v2698_v53, %v2026_v31 }
  0x8a   :  { %2650 = vst [vmem:[%s3318_s1 + $0x51] sm:$0x1] %v1992_v23  ;;  %2651 = vst [vmem:[%s3318_s1 + $0x52] sm:$0x1] %v1999_v24  ;;  %v2034_v35 = vpack.c.bf16 %v2698_v53, %v2033_v32  ;;  %v2041_v36 = vpack.c.bf16 %v2698_v53, %v2040_v33  ;;  %v2047_v37 = vld [vmem:[#allocation0 + $0x2c8] sm:$0x3] }
  0x8b   :  { %v2054_v38 = vld [vmem:[#allocation0 + $0x2d0] sm:$0x3]  ;;  %v2061_v39 = vld [vmem:[#allocation0 + $0x2d8] sm:$0x3]  ;;  %2652 = vst [vmem:[%s3318_s1 + $0x53] sm:$0x1] %v2006_v28  ;;  %v2048_v40 = vpack.c.bf16 %v2698_v53, %v2047_v37 }
  0x8c   :  { %2653 = vst [vmem:[%s3318_s1 + $0x54] sm:$0x1] %v2013_v29  ;;  %2654 = vst [vmem:[%s3318_s1 + $0x55] sm:$0x1] %v2020_v30  ;;  %v2055_v41 = vpack.c.bf16 %v2698_v53, %v2054_v38  ;;  %v2062_v42 = vpack.c.bf16 %v2698_v53, %v2061_v39  ;;  %v2068_v43 = vld [vmem:[#allocation0 + $0x2e0] sm:$0x3] }
  0x8d   :  { %v2075_v44 = vld [vmem:[#allocation0 + $0x2e8] sm:$0x3]  ;;  %v2082_v45 = vld [vmem:[#allocation0 + $0x2f0] sm:$0x3]  ;;  %2655 = vst [vmem:[%s3318_s1 + $0x56] sm:$0x1] %v2027_v34  ;;  %v2069_v46 = vpack.c.bf16 %v2698_v53, %v2068_v43 }
  0x8e   :  { %2656 = vst [vmem:[%s3318_s1 + $0x57] sm:$0x1] %v2034_v35  ;;  %2657 = vst [vmem:[%s3318_s1 + $0x58] sm:$0x1] %v2041_v36  ;;  %v2076_v47 = vpack.c.bf16 %v2698_v53, %v2075_v44  ;;  %v2083_v48 = vpack.c.bf16 %v2698_v53, %v2082_v45  ;;  %v2089_v49 = vld [vmem:[#allocation0 + $0x2f8] sm:$0x3] }
  0x8f   :  { %v2096_v50 = vld [vmem:[#allocation0 + $0x300] sm:$0x3]  ;;  %v2103_v51 = vld [vmem:[#allocation0 + $0x308] sm:$0x3]  ;;  %2658 = vst [vmem:[%s3318_s1 + $0x59] sm:$0x1] %v2048_v40  ;;  %v2090_v52 = vpack.c.bf16 %v2698_v53, %v2089_v49 }
  0x90   :  { %2659 = vst [vmem:[%s3318_s1 + $0x5a] sm:$0x1] %v2055_v41  ;;  %2660 = vst [vmem:[%s3318_s1 + $0x5b] sm:$0x1] %v2062_v42  ;;  %v2097_v54 = vpack.c.bf16 %v2698_v53, %v2096_v50  ;;  %v2104_v55 = vpack.c.bf16 %v2698_v53, %v2103_v51  ;;  %v2110_v56 = vld [vmem:[#allocation0 + $0x310] sm:$0x3] }
  0x91   :  { %v2117_v57 = vld [vmem:[#allocation0 + $0x318] sm:$0x3]  ;;  %v2124_v58 = vld [vmem:[#allocation0 + $0x320] sm:$0x3]  ;;  %2661 = vst [vmem:[%s3318_s1 + $0x5c] sm:$0x1] %v2069_v46  ;;  %v2111_v59 = vpack.c.bf16 %v2698_v53, %v2110_v56 }
  0x92   :  { %2662 = vst [vmem:[%s3318_s1 + $0x5d] sm:$0x1] %v2076_v47  ;;  %2663 = vst [vmem:[%s3318_s1 + $0x5e] sm:$0x1] %v2083_v48  ;;  %v2118_v60 = vpack.c.bf16 %v2698_v53, %v2117_v57  ;;  %v2125_v61 = vpack.c.bf16 %v2698_v53, %v2124_v58  ;;  %v2131_v62 = vld [vmem:[#allocation0 + $0x328] sm:$0x3] }
  0x93   :  { %v2138_v63 = vld [vmem:[#allocation0 + $0x330] sm:$0x3]  ;;  %v2145_v0 = vld [vmem:[#allocation0 + $0x338] sm:$0x3]  ;;  %2664 = vst [vmem:[%s3318_s1 + $0x5f] sm:$0x1] %v2090_v52  ;;  %v2132_v1 = vpack.c.bf16 %v2698_v53, %v2131_v62 }
  0x94   :  { %2665 = vst [vmem:[%s3318_s1 + $0x60] sm:$0x1] %v2097_v54  ;;  %2666 = vst [vmem:[%s3318_s1 + $0x61] sm:$0x1] %v2104_v55  ;;  %v2139_v2 = vpack.c.bf16 %v2698_v53, %v2138_v63  ;;  %v2146_v3 = vpack.c.bf16 %v2698_v53, %v2145_v0  ;;  %v2152_v4 = vld [vmem:[#allocation0 + $0x340] sm:$0x3] }
  0x95   :  { %v2159_v5 = vld [vmem:[#allocation0 + $0x348] sm:$0x3]  ;;  %v2166_v6 = vld [vmem:[#allocation0 + $0x350] sm:$0x3]  ;;  %2667 = vst [vmem:[%s3318_s1 + $0x62] sm:$0x1] %v2111_v59  ;;  %v2153_v7 = vpack.c.bf16 %v2698_v53, %v2152_v4 }
  0x96   :  { %2668 = vst [vmem:[%s3318_s1 + $0x63] sm:$0x1] %v2118_v60  ;;  %2669 = vst [vmem:[%s3318_s1 + $0x64] sm:$0x1] %v2125_v61  ;;  %v2160_v8 = vpack.c.bf16 %v2698_v53, %v2159_v5  ;;  %v2167_v9 = vpack.c.bf16 %v2698_v53, %v2166_v6  ;;  %v2173_v10 = vld [vmem:[#allocation0 + $0x358] sm:$0x3] }
  0x97   :  { %v2180_v11 = vld [vmem:[#allocation0 + $0x360] sm:$0x3]  ;;  %v2187_v12 = vld [vmem:[#allocation0 + $0x368] sm:$0x3]  ;;  %2670 = vst [vmem:[%s3318_s1 + $0x65] sm:$0x1] %v2132_v1  ;;  %v2174_v13 = vpack.c.bf16 %v2698_v53, %v2173_v10 }
  0x98   :  { %2671 = vst [vmem:[%s3318_s1 + $0x66] sm:$0x1] %v2139_v2  ;;  %2672 = vst [vmem:[%s3318_s1 + $0x67] sm:$0x1] %v2146_v3  ;;  %v2181_v14 = vpack.c.bf16 %v2698_v53, %v2180_v11  ;;  %v2188_v15 = vpack.c.bf16 %v2698_v53, %v2187_v12  ;;  %v2194_v16 = vld [vmem:[#allocation0 + $0x370] sm:$0x3] }
  0x99   :  { %v2201_v17 = vld [vmem:[#allocation0 + $0x378] sm:$0x3]  ;;  %v2208_v18 = vld [vmem:[#allocation0 + $0x380] sm:$0x3]  ;;  %2673 = vst [vmem:[%s3318_s1 + $0x68] sm:$0x1] %v2153_v7  ;;  %v2195_v19 = vpack.c.bf16 %v2698_v53, %v2194_v16 }
  0x9a   :  { %2674 = vst [vmem:[%s3318_s1 + $0x69] sm:$0x1] %v2160_v8  ;;  %2675 = vst [vmem:[%s3318_s1 + $0x6a] sm:$0x1] %v2167_v9  ;;  %v2202_v20 = vpack.c.bf16 %v2698_v53, %v2201_v17  ;;  %v2209_v21 = vpack.c.bf16 %v2698_v53, %v2208_v18  ;;  %v2215_v22 = vld [vmem:[#allocation0 + $0x388] sm:$0x3] }
  0x9b   :  { %v2222_v23 = vld [vmem:[#allocation0 + $0x390] sm:$0x3]  ;;  %v2229_v24 = vld [vmem:[#allocation0 + $0x398] sm:$0x3]  ;;  %2676 = vst [vmem:[%s3318_s1 + $0x6b] sm:$0x1] %v2174_v13  ;;  %v2216_v25 = vpack.c.bf16 %v2698_v53, %v2215_v22 }
  0x9c   :  { %2677 = vst [vmem:[%s3318_s1 + $0x6c] sm:$0x1] %v2181_v14  ;;  %2678 = vst [vmem:[%s3318_s1 + $0x6d] sm:$0x1] %v2188_v15  ;;  %v2223_v26 = vpack.c.bf16 %v2698_v53, %v2222_v23  ;;  %v2230_v27 = vpack.c.bf16 %v2698_v53, %v2229_v24  ;;  %v2236_v28 = vld [vmem:[#allocation0 + $0x3a0] sm:$0x3] }
  0x9d   :  { %v2243_v29 = vld [vmem:[#allocation0 + $0x3a8] sm:$0x3]  ;;  %v2250_v30 = vld [vmem:[#allocation0 + $0x3b0] sm:$0x3]  ;;  %2679 = vst [vmem:[%s3318_s1 + $0x6e] sm:$0x1] %v2195_v19  ;;  %v2237_v31 = vpack.c.bf16 %v2698_v53, %v2236_v28 }
  0x9e   :  { %2680 = vst [vmem:[%s3318_s1 + $0x6f] sm:$0x1] %v2202_v20  ;;  %2681 = vst [vmem:[%s3318_s1 + $0x70] sm:$0x1] %v2209_v21  ;;  %v2244_v32 = vpack.c.bf16 %v2698_v53, %v2243_v29  ;;  %v2251_v33 = vpack.c.bf16 %v2698_v53, %v2250_v30  ;;  %v2257_v34 = vld [vmem:[#allocation0 + $0x3b8] sm:$0x3] }
  0x9f   :  { %v2264_v35 = vld [vmem:[#allocation0 + $0x3c0] sm:$0x3]  ;;  %v2271_v36 = vld [vmem:[#allocation0 + $0x3c8] sm:$0x3]  ;;  %2682 = vst [vmem:[%s3318_s1 + $0x71] sm:$0x1] %v2216_v25  ;;  %v2258_v37 = vpack.c.bf16 %v2698_v53, %v2257_v34 }
  0xa0   :  { %2683 = vst [vmem:[%s3318_s1 + $0x72] sm:$0x1] %v2223_v26  ;;  %2684 = vst [vmem:[%s3318_s1 + $0x73] sm:$0x1] %v2230_v27  ;;  %v2265_v38 = vpack.c.bf16 %v2698_v53, %v2264_v35  ;;  %v2272_v39 = vpack.c.bf16 %v2698_v53, %v2271_v36  ;;  %v2278_v40 = vld [vmem:[#allocation0 + $0x3d0] sm:$0x3] }
  0xa1   :  { %v2285_v41 = vld [vmem:[#allocation0 + $0x3d8] sm:$0x3]  ;;  %v2292_v42 = vld [vmem:[#allocation0 + $0x3e0] sm:$0x3]  ;;  %2685 = vst [vmem:[%s3318_s1 + $0x74] sm:$0x1] %v2237_v31  ;;  %v2279_v43 = vpack.c.bf16 %v2698_v53, %v2278_v40 }
  0xa2   :  { %2686 = vst [vmem:[%s3318_s1 + $0x75] sm:$0x1] %v2244_v32  ;;  %2687 = vst [vmem:[%s3318_s1 + $0x76] sm:$0x1] %v2251_v33  ;;  %v2286_v44 = vpack.c.bf16 %v2698_v53, %v2285_v41  ;;  %v2293_v45 = vpack.c.bf16 %v2698_v53, %v2292_v42  ;;  %v2299_v46 = vld [vmem:[#allocation0 + $0x3e8] sm:$0x3] }
  0xa3   :  { %v2306_v47 = vld [vmem:[#allocation0 + $0x3f0] sm:$0x3]  ;;  %v2313_v48 = vld [vmem:[#allocation0 + $0x3f8] sm:$0x3]  ;;  %2688 = vst [vmem:[%s3318_s1 + $0x77] sm:$0x1] %v2258_v37  ;;  %v2300_v49 = vpack.c.bf16 %v2698_v53, %v2299_v46 }
  0xa4   :  { %2689 = vst [vmem:[%s3318_s1 + $0x78] sm:$0x1] %v2265_v38  ;;  %2690 = vst [vmem:[%s3318_s1 + $0x79] sm:$0x1] %v2272_v39  ;;  %v2307_v50 = vpack.c.bf16 %v2698_v53, %v2306_v47  ;;  %v2314_v53 = vpack.c.bf16 %v2698_v53, %v2313_v48 }
  0xa5   :  { %2691 = vst [vmem:[%s3318_s1 + $0x7a] sm:$0x1] %v2279_v43  ;;  %2692 = vst [vmem:[%s3318_s1 + $0x7b] sm:$0x1] %v2286_v44 }
  0xa6   :  { %2693 = vst [vmem:[%s3318_s1 + $0x7c] sm:$0x1] %v2293_v45  ;;  %2694 = vst [vmem:[%s3318_s1 + $0x7d] sm:$0x1] %v2300_v49 }
  0xa7   :  { %2695 = vst [vmem:[%s3318_s1 + $0x7e] sm:$0x1] %v2307_v50  ;;  %2696 = vst [vmem:[%s3318_s1 + $0x7f] sm:$0x1] %v2314_v53 }

// kernel: attention_3d_cnn_forward.5
= control target key start
LH: loop header
LB: loop body
LE: loop exit
PB: predicated region body
PF: predicated region fallthrough
CT: control target
= control target key end

     0   :  { %v3771_v1 = vmov 0   ;;  %vm277_vm0 = vcmask 392192   ;;  %s4780_s2 = inlined_call_operand.vmem [shape: bf16[8,432,128], index: 2, kind: input, shape index: {}]   ;;  %s4781_s0 = inlined_call_operand.vmem [shape: bf16[32,432], index: 0, kind: input, shape index: {}]   ;;  %s4782_s1 = inlined_call_operand.vmem [shape: f32[32,1], index: 1, kind: input, shape index: {}]   ;;  %s4783_s3 = inlined_call_operand.vmem [shape: bf16[32,128], index: 3, kind: output, shape index: {}]  }
   0x1   :  { %v3535_v0 = vld [vmem:[%s4780_s2 + $0x40] sm:$0xff]   ;;  %3533 = vset.pattern.permute.xlu0 %v3771_v1  ;;  %3534 = vset.pattern.permute.xlu1 %v3771_v1  ;;  %v3536_v2 = vld [vmem:[%s4780_s2 + $0x118] sm:$0xff]   ;;  %v3539_v5 = vld [vmem:[%s4780_s2 + $0x48] sm:$0xff]  }
   0x2   :  { %3308 = vmatprep.subr.bf16.mxu1 %v3535_v0  ;;  %v3537_v3 = vld [vmem:[%s4780_s2] sm:$0xff]   ;;  %3336 = vmatprep.subr.bf16.mxu0 %v3536_v2  ;;  %v3538_v4 = vld [vmem:[%s4780_s2 + $0xd8] sm:$0xff]   ;;  %v3541_v7 = vld [vmem:[%s4780_s2 + $0x8] sm:$0xff]  }
   0x3   :  { %3309 = vmatpush3.bf16.msra.mxu1 %v3537_v3  ;;  %3337 = vmatpush3.bf16.msra.mxu0 %v3538_v4  ;;  %v3540_v6 = vld [vmem:[%s4780_s2 + $0x120] sm:$0xff]   ;;  %v3543_v9 = vld [vmem:[%s4780_s2 + $0x50] sm:$0xff]   ;;  %v3544_v10 = vld [vmem:[%s4780_s2 + $0x128] sm:$0xff]  }
   0x4   :  { %3310 = vmatprep.subr.bf16.mxu1 %v3539_v5  ;;  %3338 = vmatprep.subr.bf16.mxu0 %v3540_v6  ;;  %v3542_v8 = vld [vmem:[%s4780_s2 + $0xe0] sm:$0xff]   ;;  %v3545_v11 = vld [vmem:[%s4780_s2 + $0x10] sm:$0xff]   ;;  %v3546_v12 = vld [vmem:[%s4780_s2 + $0xe8] sm:$0xff]  }
   0x5   :  { %v3547_v13 = vld [vmem:[%s4780_s2 + $0x58] sm:$0xff]   ;;  %v3548_v14 = vld [vmem:[%s4780_s2 + $0x130] sm:$0xff]   ;;  %v3551_v17 = vld [vmem:[%s4780_s2 + $0x60] sm:$0xff]  }
   0x6   :  { %v3549_v15 = vld [vmem:[%s4780_s2 + $0x18] sm:$0xff]   ;;  %v3550_v16 = vld [vmem:[%s4780_s2 + $0xf0] sm:$0xff]   ;;  %v3553_v19 = vld [vmem:[%s4780_s2 + $0x20] sm:$0xff]  }
   0x7   :  { %3311 = vmatpush3.bf16.msra.mxu1 %v3541_v7  ;;  %3339 = vmatpush3.bf16.msra.mxu0 %v3542_v8  ;;  %v3552_v18 = vld [vmem:[%s4780_s2 + $0x138] sm:$0xff]   ;;  %v3555_v21 = vld [vmem:[%s4780_s2 + $0x68] sm:$0xff]   ;;  %v3556_v22 = vld [vmem:[%s4780_s2 + $0x140] sm:$0xff]  }
   0x8   :  { %3312 = vmatprep.subr.bf16.mxu1 %v3543_v9  ;;  %3340 = vmatprep.subr.bf16.mxu0 %v3544_v10  ;;  %v3554_v20 = vld [vmem:[%s4780_s2 + $0xf8] sm:$0xff]   ;;  %v3557_v23 = vld [vmem:[%s4780_s2 + $0x28] sm:$0xff]   ;;  %v3558_v24 = vld [vmem:[%s4780_s2 + $0x100] sm:$0xff]  }
   0x9   :  { %v3559_v25 = vld [vmem:[%s4780_s2 + $0x70] sm:$0xff]   ;;  %v3560_v26 = vld [vmem:[%s4780_s2 + $0x148] sm:$0xff]   ;;  %v3563_v29 = vld [vmem:[%s4780_s2 + $0x78] sm:$0xff]  }
   0xa   :  { %v3561_v27 = vld [vmem:[%s4780_s2 + $0x30] sm:$0xff]   ;;  %v3562_v28 = vld [vmem:[%s4780_s2 + $0x108] sm:$0xff]   ;;  %v3565_v31 = vld [vmem:[%s4780_s2 + $0x38] sm:$0xff]  }
   0xb   :  { %3313 = vmatpush3.bf16.msra.mxu1 %v3545_v11  ;;  %3341 = vmatpush3.bf16.msra.mxu0 %v3546_v12  ;;  %v3564_v30 = vld [vmem:[%s4780_s2 + $0x150] sm:$0xff]   ;;  %v3571_v36 = vld [vmem:[%s4780_s2 + $0x80] sm:$0xff]   ;;  %v3573_v38 = vld [vmem:[%s4780_s2 + $0x1f8] sm:$0xff]  }
   0xc   :  { %3314 = vmatprep.subr.bf16.mxu1 %v3547_v13  ;;  %3342 = vmatprep.subr.bf16.mxu0 %v3548_v14  ;;  %v3566_v32 = vld [vmem:[%s4780_s2 + $0x110] sm:$0xff]   ;;  %v3574_v39 = vld [vmem:[%s4780_s2 + $0x88] sm:$0xff]   ;;  %v3575_v40 = vld [vmem:[%s4780_s2 + $0x1b8] sm:$0xff]  }
   0xd   :  { %v3893_v33 = vld [vmem:[%s4781_s0 + $0x4] ss:$16 sps:$4 sm:$0xff]   ;;  %v3898_v34 = vld [vmem:[%s4781_s0] ss:$16 sps:$4 sm:$0xff]   ;;  %v3579_v44 = vld [vmem:[%s4780_s2 + $0x208] sm:$0xff]  }
   0xe   :  { %316 = vmatprep.mubr.bf16.mxu1 %v3893_v33  ;;  %631 = vmatprep.mubr.bf16.mxu0 %v3893_v33  ;;  %v3570_v35 = vld [vmem:[%s4780_s2 + $0x1f0] sm:$0xff]   ;;  %v3576_v41 = vld [vmem:[%s4780_s2 + $0x200] sm:$0xff]   ;;  %v3580_v45 = vld [vmem:[%s4780_s2 + $0x98] sm:$0xff]  }
   0xf   :  { %3315 = vmatpush3.bf16.msra.mxu1 %v3549_v15  ;;  %3343 = vmatpush3.bf16.msra.mxu0 %v3550_v16  ;;  %v3572_v37 = vld [vmem:[%s4780_s2 + $0x1b0] sm:$0xff]   ;;  %v3578_v43 = vld [vmem:[%s4780_s2 + $0x1c0] sm:$0xff]   ;;  %v3581_v46 = vld [vmem:[%s4780_s2 + $0x1c8] sm:$0xff]  }
  0x10   :  { %3316 = vmatprep.subr.bf16.mxu1 %v3551_v17  ;;  %3344 = vmatprep.subr.bf16.mxu0 %v3552_v18  ;;  %v3577_v42 = vld [vmem:[%s4780_s2 + $0x90] sm:$0xff]   ;;  %v3583_v48 = vld [vmem:[%s4780_s2 + $0xa0] sm:$0xff]   ;;  %v3585_v50 = vld [vmem:[%s4780_s2 + $0x218] sm:$0xff]  }
  0x11   :  { %v3582_v47 = vld [vmem:[%s4780_s2 + $0x210] sm:$0xff]   ;;  %v3586_v52 = vld [vmem:[%s4780_s2 + $0xa8] sm:$0xff]   ;;  %v3587_v53 = vld [vmem:[%s4780_s2 + $0x1d8] sm:$0xff]  }
  0x12   :  { %v3584_v49 = vld [vmem:[%s4780_s2 + $0x1d0] sm:$0xff]   ;;  %v3590_v55 = vld [vmem:[%s4780_s2 + $0x220] sm:$0xff]   ;;  %v3594_v58 = vld [vmem:[%s4780_s2 + $0x228] sm:$0xff]  }
  0x13   :  { %3317 = vmatpush3.bf16.msra.mxu1 %v3553_v19  ;;  %3345 = vmatpush3.bf16.msra.mxu0 %v3554_v20  ;;  %v3960_v51 = vld [vmem:[%s4781_s0 + $0x24] ss:$16 sps:$4 sm:$0xff]   ;;  %v3972_v54 = vld [vmem:[%s4781_s0 + $0x20] ss:$16 sps:$4 sm:$0xff]   ;;  %v3595_v59 = vld [vmem:[%s4780_s2 + $0xb8] sm:$0xff]  }
  0x14   :  { %3318 = vmatprep.subr.bf16.mxu1 %v3555_v21  ;;  %3346 = vmatprep.subr.bf16.mxu0 %v3556_v22  ;;  %v3591_v56 = vld [vmem:[%s4780_s2 + $0xb0] sm:$0xff]   ;;  %v3593_v57 = vld [vmem:[%s4780_s2 + $0x1e0] sm:$0xff]   ;;  %v3596_v60 = vld [vmem:[%s4780_s2 + $0x1e8] sm:$0xff]  }
  0x15   :  { %v3597_v61 = vld [vmem:[%s4780_s2 + $0x2c8] sm:$0xff]   ;;  %v3598_v62 = vld [vmem:[%s4780_s2 + $0xc0] sm:$0xff]   ;;  %v3600_v0 = vld [vmem:[%s4780_s2 + $0x2d0] sm:$0xff]  }
  0x16   :  { %v3599_v63 = vld [vmem:[%s4780_s2 + $0x288] sm:$0xff]   ;;  %v3602_v4 = vld [vmem:[%s4780_s2 + $0x290] sm:$0xff]   ;;  %v3603_v5 = vld [vmem:[%s4780_s2 + $0x2d8] sm:$0xff]  }
  0x17   :  { %3319 = vmatpush3.bf16.msra.mxu1 %v3557_v23  ;;  %3347 = vmatpush3.bf16.msra.mxu0 %v3558_v24  ;;  %v4015_v2 = vld [vmem:[%s4781_s0 + $0xc] ss:$16 sps:$4 sm:$0xff]   ;;  %v3604_v6 = vld [vmem:[%s4780_s2 + $0xd0] sm:$0xff]   ;;  %v4041_v8 = vld [vmem:[%s4781_s0 + $0x8] ss:$16 sps:$4 sm:$0xff]  }
  0x18   :  { %3320 = vmatprep.subr.bf16.mxu1 %v3559_v25  ;;  %3348 = vmatprep.subr.bf16.mxu0 %v3560_v26  ;;  %v3601_v3 = vld [vmem:[%s4780_s2 + $0xc8] sm:$0xff]   ;;  %v3605_v7 = vld [vmem:[%s4780_s2 + $0x298] sm:$0xff]   ;;  %v3609_v9 = vld [vmem:[%s4780_s2 + $0x2e0] sm:$0xff]  }
  0x19   :  { %v3610_v10 = vld [vmem:[%s4780_s2 + $0x158] sm:$0xff]   ;;  %v3611_v12 = vld [vmem:[%s4780_s2 + $0x2a0] sm:$0xff]   ;;  %v3612_v13 = vld [vmem:[%s4780_s2 + $0x2e8] sm:$0xff]  }
  0x1a   :  { %v4052_v11 = vld [vmem:[%s4781_s0 + $0x2c] ss:$16 sps:$4 sm:$0xff]   ;;  %v3613_v14 = vld [vmem:[%s4780_s2 + $0x160] sm:$0xff]   ;;  %v3618_v16 = vld [vmem:[%s4780_s2 + $0x2f0] sm:$0xff]  }
  0x1b   :  { %3321 = vmatpush3.bf16.msra.mxu1 %v3561_v27  ;;  %3349 = vmatpush3.bf16.msra.mxu0 %v3562_v28  ;;  %v3614_v15 = vld [vmem:[%s4780_s2 + $0x2a8] sm:$0xff]   ;;  %v3620_v19 = vld [vmem:[%s4780_s2 + $0x2b0] sm:$0xff]   ;;  %v3621_v20 = vld [vmem:[%s4780_s2 + $0x2f8] sm:$0xff]  }
  0x1c   :  { %3322 = vmatprep.subr.bf16.mxu1 %v3563_v29  ;;  %3350 = vmatprep.subr.bf16.mxu0 %v3564_v30  ;;  %v4079_v17 = vld [vmem:[%s4781_s0 + $0x28] ss:$16 sps:$4 sm:$0xff]   ;;  %v3622_v21 = vld [vmem:[%s4780_s2 + $0x170] sm:$0xff]   ;;  %v3624_v23 = vld [vmem:[%s4780_s2 + $0x300] sm:$0xff]  }
  0x1d   :  { %v3619_v18 = vld [vmem:[%s4780_s2 + $0x168] sm:$0xff]   ;;  %v3623_v22 = vld [vmem:[%s4780_s2 + $0x2b8] sm:$0xff]   ;;  %v3626_v25 = vld [vmem:[%s4780_s2 + $0x2c0] sm:$0xff]  }
  0x1e   :  { %v3625_v24 = vld [vmem:[%s4780_s2 + $0x178] sm:$0xff]   ;;  %v3627_v26 = vld [vmem:[%s4780_s2 + $0x180] sm:$0xff]   ;;  %v3628_v27 = vld [vmem:[%s4780_s2 + $0x308] sm:$0xff]  }
  0x1f   :  { %3323 = vmatpush3.bf16.msra.mxu1 %v3565_v31  ;;  %3351 = vmatpush3.bf16.msra.mxu0 %v3566_v32  ;;  %v3629_v28 = vld [vmem:[%s4780_s2 + $0x188] sm:$0xff]   ;;  %v3630_v29 = vld [vmem:[%s4780_s2 + $0x310] sm:$0xff]   ;;  %v3632_v31 = vld [vmem:[%s4780_s2 + $0x318] sm:$0xff]  }
  0x20   :  { %333 = vmatprep.subr.bf16.mxu1 %v3771_v1  ;;  %3364 = vmatprep.subr.bf16.mxu0 %v3570_v35  ;;  %v3631_v30 = vld [vmem:[%s4780_s2 + $0x190] sm:$0xff]   ;;  %v3633_v32 = vld [vmem:[%s4780_s2 + $0x198] sm:$0xff]   ;;  %v3635_v35 = vld [vmem:[%s4780_s2 + $0x1a0] sm:$0xff]  }
  0x22   :  { %317 = vmatmul.mubr.bf16.vlgmr.msra.gmra.mrb[0].mxu1 %v3898_v34  ;;  %632 = vmatmul.mubr.bf16.vlgmr.msra.gmra.mrb[0].mxu0 %v3898_v34 }
  0x23   :  { %334 = vmatpush1.bf16.msra.mxu1 %v3571_v36  ;;  %3365 = vmatpush3.bf16.msra.mxu0 %v3572_v37  ;;  %v3636_v36 = vld [vmem:[%s4780_s2 + $0x328] sm:$0xff]  }
  0x24   :  { %335 = vmatprep.subr.bf16.mxu1 %v3771_v1  ;;  %3366 = vmatprep.subr.bf16.mxu0 %v3573_v38  ;;  %v3637_v37 = vld [vmem:[%s4780_s2 + $0x1a8] sm:$0xff]   ;;  %v3638_v38 = vld [vmem:[%s4780_s2 + $0x330] sm:$0xff]  }
  0x25   :  { %639 = vmatprep.mubr.bf16.mxu0 %v3960_v51  ;;  %324 = vmatprep.mubr.bf16.mxu1 %v3960_v51 }
  0x27   :  { %336 = vmatpush1.bf16.msra.mxu1 %v3574_v39  ;;  %3367 = vmatpush3.bf16.msra.mxu0 %v3575_v40  ;;  %v3639_v39 = vld [vmem:[%s4780_s2 + $0x230] sm:$0xff]   ;;  %v3640_v40 = vld [vmem:[%s4780_s2 + $0x338] sm:$0xff]  }
  0x28   :  { %337 = vmatprep.subr.bf16.mxu1 %v3771_v1  ;;  %3368 = vmatprep.subr.bf16.mxu0 %v3576_v41  ;;  %v3641_v41 = vld [vmem:[%s4780_s2 + $0x238] sm:$0xff]  }
  0x2a   :  { %640 = vmatmul.mubr.bf16.gmra.mrb[4].mxu0 %v3972_v54  ;;  %325 = vmatmul.mubr.bf16.gmra.mrb[4].mxu1 %v3972_v54 }
  0x2b   :  { %338 = vmatpush1.bf16.msra.mxu1 %v3577_v42  ;;  %3369 = vmatpush3.bf16.msra.mxu0 %v3578_v43  ;;  %v3642_v42 = vld [vmem:[%s4780_s2 + $0x340] sm:$0xff]  }
  0x2c   :  { %339 = vmatprep.subr.bf16.mxu1 %v3771_v1  ;;  %3370 = vmatprep.subr.bf16.mxu0 %v3579_v44  ;;  %v3643_v43 = vld [vmem:[%s4780_s2 + $0x240] sm:$0xff]   ;;  %v3644_v44 = vld [vmem:[%s4780_s2 + $0x348] sm:$0xff]  }
  0x2d   :  { %950 = vmatprep.mubr.bf16.mxu0 %v3893_v33  ;;  %2706 = vmatprep.mubr.msk.bf16.mxu1 %vm277_vm0, %v4015_v2 }
  0x2f   :  { %340 = vmatpush1.bf16.msra.mxu1 %v3580_v45  ;;  %3371 = vmatpush3.bf16.msra.mxu0 %v3581_v46  ;;  %v3645_v45 = vld [vmem:[%s4780_s2 + $0x248] sm:$0xff]   ;;  %v3646_v46 = vld [vmem:[%s4780_s2 + $0x350] sm:$0xff]  }
  0x30   :  { %341 = vmatprep.subr.bf16.mxu1 %v3771_v1  ;;  %3372 = vmatprep.subr.bf16.mxu0 %v3582_v47  ;;  %v3647_v47 = vld [vmem:[%s4780_s2 + $0x250] sm:$0xff]  }
  0x33   :  { %342 = vmatpush1.bf16.msra.mxu1 %v3583_v48  ;;  %3373 = vmatpush3.bf16.msra.mxu0 %v3584_v49  ;;  %v3648_v48 = vld [vmem:[%s4780_s2 + $0x358] sm:$0xff]  }
  0x34   :  { %343 = vmatprep.subr.bf16.mxu1 %v3771_v1  ;;  %3374 = vmatprep.subr.bf16.mxu0 %v3585_v50  ;;  %v3649_v49 = vld [vmem:[%s4780_s2 + $0x478] sm:$0xff]  }
  0x35   :  { %v3650_v50 = vld [vmem:[%s4780_s2 + $0x258] sm:$0xff]  }
  0x37   :  { %344 = vmatpush1.bf16.msra.mxu1 %v3586_v52  ;;  %3375 = vmatpush3.bf16.msra.mxu0 %v3587_v53  ;;  %v3651_v52 = vld [vmem:[%s4780_s2 + $0x438] sm:$0xff]   ;;  %v3652_v53 = vld [vmem:[%s4780_s2 + $0x480] sm:$0xff]  }
  0x38   :  { %345 = vmatprep.subr.bf16.mxu1 %v3771_v1  ;;  %3376 = vmatprep.subr.bf16.mxu0 %v3590_v55  ;;  %v3654_v55 = vld [vmem:[%s4780_s2 + $0x440] sm:$0xff]  }
  0x3b   :  { %346 = vmatpush1.bf16.msra.mxu1 %v3591_v56  ;;  %3377 = vmatpush3.bf16.msra.mxu0 %v3593_v57  ;;  %v3655_v56 = vld [vmem:[%s4780_s2 + $0x488] sm:$0xff]  }
  0x3c   :  { %347 = vmatprep.subr.bf16.mxu1 %v3771_v1  ;;  %3378 = vmatprep.subr.bf16.mxu0 %v3594_v58  ;;  %v3656_v57 = vld [vmem:[%s4780_s2 + $0x268] sm:$0xff]  }
  0x3d   :  { %v3657_v58 = vld [vmem:[%s4780_s2 + $0x448] sm:$0xff]  }
  0x3f   :  { %348 = vmatpush1.bf16.msra.mxu1 %v3595_v59  ;;  %3379 = vmatpush3.bf16.msra.mxu0 %v3596_v60  ;;  %v3658_v59 = vld [vmem:[%s4780_s2 + $0x490] sm:$0xff]  }
  0x40   :  { %349 = vmatprep.subr.bf16.mxu1 %v3771_v1  ;;  %3392 = vmatprep.subr.bf16.mxu0 %v3597_v61  ;;  %v3659_v60 = vld [vmem:[%s4780_s2 + $0x270] sm:$0xff]  }
  0x41   :  { %v3660_v61 = vld [vmem:[%s4780_s2 + $0x450] sm:$0xff]  }
  0x42   :  { %951 = vmatmul.mubr.bf16.vlgmr.msra.gmra.mrb[8].mxu0 %v3898_v34 }
  0x43   :  { %350 = vmatpush1.bf16.msra.mxu1 %v3598_v62  ;;  %3393 = vmatpush3.bf16.msra.mxu0 %v3599_v63  ;;  %v3661_v62 = vld [vmem:[%s4780_s2 + $0x498] sm:$0xff]  }
  0x44   :  { %351 = vmatprep.subr.bf16.mxu1 %v3771_v1  ;;  %3394 = vmatprep.subr.bf16.mxu0 %v3600_v0  ;;  %v3662_v63 = vld [vmem:[%s4780_s2 + $0x278] sm:$0xff]  }
  0x45   :  { %958 = vmatprep.mubr.bf16.mxu0 %v3960_v51  ;;  %v3663_v0 = vld [vmem:[%s4780_s2 + $0x458] sm:$0xff]  }
  0x47   :  { %352 = vmatpush1.bf16.msra.mxu1 %v3601_v3  ;;  %3395 = vmatpush3.bf16.msra.mxu0 %v3602_v4  ;;  %v3664_v3 = vld [vmem:[%s4780_s2 + $0x4a0] sm:$0xff]  }
  0x48   :  { %353 = vmatprep.subr.bf16.mxu1 %v3771_v1  ;;  %3396 = vmatprep.subr.bf16.mxu0 %v3603_v5  ;;  %v3666_v4 = vld [vmem:[%s4780_s2 + $0x460] sm:$0xff]  }
  0x49   :  { %v3667_v5 = vld [vmem:[%s4780_s2 + $0x3a0] sm:$0xff]  }
  0x4a   :  { %959 = vmatmul.mubr.bf16.gmra.mrb[12].mxu0 %v3972_v54 }
  0x4b   :  { %354 = vmatpush1.bf16.msra.mxu1 %v3604_v6  ;;  %3397 = vmatpush3.bf16.msra.mxu0 %v3605_v7  ;;  %v3668_v6 = vld [vmem:[%s4780_s2 + $0x4a8] sm:$0xff]   ;;  %v3669_v7 = vld [vmem:[%s4780_s2 + $0x360] sm:$0xff]  }
  0x4c   :  { %648 = vmatprep.subr.bf16.mxu1 %v3771_v1  ;;  %3398 = vmatprep.subr.bf16.mxu0 %v3609_v9  ;;  %v3670_v9 = vld [vmem:[%s4780_s2 + $0x468] sm:$0xff]  }
  0x4d   :  { %1269 = vmatprep.mubr.bf16.mxu0 %v3893_v33 }
  0x4e   :  { %366 = vmatmul.mubr.bf16.vlgmr.msra.gmra.mrb[8].mxu1 %v4041_v8 }
  0x4f   :  { %649 = vmatpush1.bf16.msra.mxu1 %v3610_v10  ;;  %2707 = vmatprep.mubr.msk.bf16.mxu1 %vm277_vm0, %v4052_v11  ;;  %v3671_v10 = vld [vmem:[%s4780_s2 + $0x3a8] sm:$0xff]  }
  0x50   :  { %3399 = vmatpush3.bf16.msra.mxu0 %v3611_v12  ;;  %650 = vmatprep.subr.bf16.mxu1 %v3771_v1  ;;  %v3672_v12 = vld [vmem:[%s4780_s2 + $0x4b0] sm:$0xff]  }
  0x51   :  { %3400 = vmatprep.subr.bf16.mxu0 %v3612_v13  ;;  %v3673_v13 = vld [vmem:[%s4780_s2 + $0x368] sm:$0xff]  }
  0x53   :  { %651 = vmatpush1.bf16.msra.mxu1 %v3613_v14  ;;  %v3674_v14 = vld [vmem:[%s4780_s2 + $0x470] sm:$0xff]  }
  0x54   :  { %3401 = vmatpush3.bf16.msra.mxu0 %v3614_v15  ;;  %652 = vmatprep.subr.bf16.mxu1 %v3771_v1  ;;  %v3675_v15 = vld [vmem:[%s4780_s2 + $0x3b0] sm:$0xff]  }
  0x55   :  { %3402 = vmatprep.subr.bf16.mxu0 %v3618_v16  ;;  %v3677_v16 = vld [vmem:[%s4780_s2 + $0x4b8] sm:$0xff]  }
  0x56   :  { %374 = vmatmul.mubr.bf16.gmra.mrb[12].mxu1 %v4079_v17 }
  0x57   :  { %653 = vmatpush1.bf16.msra.mxu1 %v3619_v18  ;;  %2789 = vmatprep.mubr.msk.bf16.mxu1 %vm277_vm0, %v4015_v2  ;;  %v3679_v18 = vld [vmem:[%s4780_s2 + $0x378] sm:$0xff]  }
  0x58   :  { %3403 = vmatpush3.bf16.msra.mxu0 %v3620_v19  ;;  %654 = vmatprep.subr.bf16.mxu1 %v3771_v1  ;;  %v4322_v19 = vld [vmem:[%s4781_s0] ss:$16 sps:$4 sm:$0xff]  }
  0x59   :  { %3404 = vmatprep.subr.bf16.mxu0 %v3621_v20  ;;  %v3680_v20 = vld [vmem:[%s4780_s2 + $0x4c0] sm:$0xff]  }
  0x5b   :  { %655 = vmatpush1.bf16.msra.mxu1 %v3622_v21  ;;  %v4335_v21 = vld [vmem:[%s4781_s0 + $0x4] ss:$16 sps:$4 sm:$0xff]  }
  0x5c   :  { %3405 = vmatpush3.bf16.msra.mxu0 %v3623_v22  ;;  %656 = vmatprep.subr.bf16.mxu1 %v3771_v1  ;;  %v3682_v22 = vld [vmem:[%s4780_s2 + $0x380] sm:$0xff]  }
  0x5d   :  { %3406 = vmatprep.subr.bf16.mxu0 %v3624_v23  ;;  %v3683_v23 = vld [vmem:[%s4780_s2 + $0x4c8] sm:$0xff]  }
  0x5f   :  { %657 = vmatpush1.bf16.msra.mxu1 %v3625_v24  ;;  %v3684_v24 = vld [vmem:[%s4780_s2 + $0x3c8] sm:$0xff]  }
  0x60   :  { %3407 = vmatpush3.bf16.msra.mxu0 %v3626_v25  ;;  %658 = vmatprep.subr.bf16.mxu1 %v3771_v1  ;;  %v3685_v25 = vld [vmem:[%s4780_s2 + $0x388] sm:$0xff]  }
  0x61   :  { %1286 = vmatprep.subr.bf16.mxu0 %v3771_v1 }
  0x63   :  { %659 = vmatpush1.bf16.msra.mxu1 %v3627_v26  ;;  %1270 = vmatmul.mubr.bf16.vlgmr.msra.gmra.mrb[16].mxu0 %v3898_v34  ;;  %v3634_v34 = vld [vmem:[%s4780_s2 + $0x320] sm:$0xff]  }
  0x64   :  { %1287 = vmatpush1.bf16.msra.mxu0 %v3628_v27  ;;  %660 = vmatprep.subr.bf16.mxu1 %v3771_v1  ;;  %v4358_v26 = vld [vmem:[%s4781_s0 + $0x20] ss:$16 sps:$4 sm:$0xff]  }
  0x65   :  { %1288 = vmatprep.subr.bf16.mxu0 %v3771_v1  ;;  %1277 = vmatprep.mubr.bf16.mxu0 %v3960_v51  ;;  %v3687_v27 = vld [vmem:[%s4780_s2 + $0x3d0] sm:$0xff]  }
  0x67   :  { %661 = vmatpush1.bf16.msra.mxu1 %v3629_v28  ;;  %v3688_v28 = vld [vmem:[%s4780_s2 + $0x390] sm:$0xff]  }
  0x68   :  { %1289 = vmatpush1.bf16.msra.mxu0 %v3630_v29  ;;  %662 = vmatprep.subr.bf16.mxu1 %v3771_v1  ;;  %v3689_v29 = vld [vmem:[%s4780_s2 + $0x4d8] sm:$0xff]  }
  0x69   :  { %1290 = vmatprep.subr.bf16.mxu0 %v3771_v1 }
  0x6b   :  { %663 = vmatpush1.bf16.msra.mxu1 %v3631_v30  ;;  %1278 = vmatmul.mubr.bf16.gmra.mrb[20].mxu0 %v3972_v54  ;;  %v3653_v54 = vld [vmem:[%s4780_s2 + $0x260] sm:$0xff]   ;;  %v3690_v30 = vld [vmem:[%s4780_s2 + $0x3d8] sm:$0xff]  }
  0x6c   :  { %1291 = vmatpush1.bf16.msra.mxu0 %v3632_v31  ;;  %664 = vmatprep.subr.bf16.mxu1 %v3771_v1  ;;  %v3692_v31 = vld [vmem:[%s4780_s2 + $0x4e0] sm:$0xff]  }
  0x6d   :  { %1292 = vmatprep.subr.bf16.mxu0 %v3771_v1  ;;  %2955 = vmatprep.mubr.msk.bf16.mxu0 %vm277_vm0, %v4015_v2 }
  0x6f   :  { %665 = vmatpush1.bf16.msra.mxu1 %v3633_v32  ;;  %v3693_v32 = vld [vmem:[%s4780_s2 + $0x3e0] sm:$0xff]  }
  0x70   :  { %1293 = vmatpush1.bf16.msra.mxu0 %v3634_v34  ;;  %666 = vmatprep.subr.bf16.mxu1 %v3771_v1  ;;  %v3694_v34 = vld [vmem:[%s4780_s2 + $0x4e8] sm:$0xff]  }
  0x71   :  { %1294 = vmatprep.subr.bf16.mxu0 %v3771_v1 }
  0x73   :  { %667 = vmatpush1.bf16.msra.mxu1 %v3635_v35  ;;  %v3695_v35 = vld [vmem:[%s4780_s2 + $0x3e8] sm:$0xff]  }
  0x74   :  { %1295 = vmatpush1.bf16.msra.mxu0 %v3636_v36  ;;  %668 = vmatprep.subr.bf16.mxu1 %v3771_v1  ;;  %v4399_v36 = vld [vmem:[%s4781_s0 + $0x24] ss:$16 sps:$4 sm:$0xff]  }
  0x75   :  { %1296 = vmatprep.subr.bf16.mxu0 %v3771_v1 }
  0x77   :  { %669 = vmatpush1.bf16.msra.mxu1 %v3637_v37  ;;  %v3696_v37 = vld [vmem:[%s4780_s2 + $0x4f0] sm:$0xff]  }
  0x78   :  { %1297 = vmatpush1.bf16.msra.mxu0 %v3638_v38  ;;  %967 = vmatprep.subr.bf16.mxu1 %v3771_v1  ;;  %v3697_v38 = vld [vmem:[%s4780_s2 + $0x3f0] sm:$0xff]  }
  0x79   :  { %1298 = vmatprep.subr.bf16.mxu0 %v3771_v1 }
  0x7a   :  { %681 = vmatmul.mubr.bf16.vlgmr.msra.gmra.mrb[16].mxu1 %v4041_v8 }
  0x7b   :  { %968 = vmatpush1.bf16.msra.mxu1 %v3639_v39  ;;  %2790 = vmatprep.mubr.msk.bf16.mxu1 %vm277_vm0, %v4052_v11  ;;  %v3698_v39 = vld [vmem:[%s4780_s2 + $0x4f8] sm:$0xff]  }
  0x7c   :  { %1299 = vmatpush1.bf16.msra.mxu0 %v3640_v40  ;;  %969 = vmatprep.subr.bf16.mxu1 %v3771_v1  ;;  %v3699_v40 = vld [vmem:[%s4780_s2 + $0x3f8] sm:$0xff]  }
  0x7d   :  { %1300 = vmatprep.subr.bf16.mxu0 %v3771_v1 }
  0x7f   :  { %970 = vmatpush1.bf16.msra.mxu1 %v3641_v41  ;;  %v4422_v41 = vld [vmem:[%s4781_s0 + $0xc] ss:$16 sps:$4 sm:$0xff]  }
  0x80   :  { %1301 = vmatpush1.bf16.msra.mxu0 %v3642_v42  ;;  %971 = vmatprep.subr.bf16.mxu1 %v3771_v1  ;;  %v3700_v42 = vld [vmem:[%s4780_s2 + $0x500] sm:$0xff]  }
  0x81   :  { %1302 = vmatprep.subr.bf16.mxu0 %v3771_v1 }
  0x82   :  { %689 = vmatmul.mubr.bf16.gmra.mrb[20].mxu1 %v4079_v17 }
  0x83   :  { %972 = vmatpush1.bf16.msra.mxu1 %v3643_v43  ;;  %2872 = vmatprep.mubr.msk.bf16.mxu1 %vm277_vm0, %v4015_v2  ;;  %v3701_v43 = vld [vmem:[%s4780_s2 + $0x400] sm:$0xff]  }
  0x84   :  { %1303 = vmatpush1.bf16.msra.mxu0 %v3644_v44  ;;  %973 = vmatprep.subr.bf16.mxu1 %v3771_v1  ;;  %v3702_v44 = vld [vmem:[%s4780_s2 + $0x508] sm:$0xff]  }
  0x85   :  { %1304 = vmatprep.subr.bf16.mxu0 %v3771_v1 }
  0x87   :  { %974 = vmatpush1.bf16.msra.mxu1 %v3645_v45  ;;  %v3703_v45 = vld [vmem:[%s4780_s2 + $0x628] sm:$0xff]  }
  0x88   :  { %1305 = vmatpush1.bf16.msra.mxu0 %v3646_v46  ;;  %975 = vmatprep.subr.bf16.mxu1 %v3771_v1  ;;  %v3704_v46 = vld [vmem:[%s4780_s2 + $0x408] sm:$0xff]  }
  0x89   :  { %1306 = vmatprep.subr.bf16.mxu0 %v3771_v1 }
  0x8b   :  { %976 = vmatpush1.bf16.msra.mxu1 %v3647_v47  ;;  %v3705_v47 = vld [vmem:[%s4780_s2 + $0x5e8] sm:$0xff]  }
  0x8c   :  { %1307 = vmatpush1.bf16.msra.mxu0 %v3648_v48  ;;  %977 = vmatprep.subr.bf16.mxu1 %v3771_v1  ;;  %v3706_v48 = vld [vmem:[%s4780_s2 + $0x630] sm:$0xff]  }
  0x8d   :  { %3448 = vmatprep.subr.bf16.mxu0 %v3649_v49  ;;  %v4455_v49 = vld [vmem:[%s4781_s0 + $0x8] ss:$16 sps:$4 sm:$0xff]  }
  0x8f   :  { %1319 = vmatmul.mubr.bf16.vlgmr.msra.gmra.mrb[24].mxu0 %v4041_v8  ;;  %978 = vmatpush1.bf16.msra.mxu1 %v3650_v50  ;;  %v3707_v50 = vld [vmem:[%s4780_s2 + $0x410] sm:$0xff]  }
  0x90   :  { %3449 = vmatpush3.bf16.msra.mxu0 %v3651_v52  ;;  %979 = vmatprep.subr.bf16.mxu1 %v3771_v1  ;;  %v3708_v52 = vld [vmem:[%s4780_s2 + $0x5f0] sm:$0xff]  }
  0x91   :  { %3450 = vmatprep.subr.bf16.mxu0 %v3652_v53  ;;  %2956 = vmatprep.mubr.msk.bf16.mxu0 %vm277_vm0, %v4052_v11  ;;  %v3709_v53 = vld [vmem:[%s4780_s2 + $0x638] sm:$0xff]  }
  0x93   :  { %980 = vmatpush1.bf16.msra.mxu1 %v3653_v54  ;;  %v4471_v54 = vld [vmem:[%s4781_s0 + $0x2c] ss:$16 sps:$4 sm:$0xff]  }
  0x94   :  { %3451 = vmatpush3.bf16.msra.mxu0 %v3654_v55  ;;  %981 = vmatprep.subr.bf16.mxu1 %v3771_v1  ;;  %v3710_v55 = vld [vmem:[%s4780_s2 + $0x418] sm:$0xff]  }
  0x95   :  { %3452 = vmatprep.subr.bf16.mxu0 %v3655_v56  ;;  %v3711_v56 = vld [vmem:[%s4780_s2 + $0x5f8] sm:$0xff]  }
  0x97   :  { %982 = vmatpush1.bf16.msra.mxu1 %v3656_v57  ;;  %1327 = vmatmul.mubr.bf16.gmra.mrb[28].mxu0 %v4079_v17  ;;  %v3712_v57 = vld [vmem:[%s4780_s2 + $0x640] sm:$0xff]  }
  0x98   :  { %3453 = vmatpush3.bf16.msra.mxu0 %v3657_v58  ;;  %983 = vmatprep.subr.bf16.mxu1 %v3771_v1  ;;  %v3713_v58 = vld [vmem:[%s4780_s2 + $0x420] sm:$0xff]  }
  0x99   :  { %3454 = vmatprep.subr.bf16.mxu0 %v3658_v59  ;;  %1907 = vmatprep.mubr.bf16.mxu0 %v3893_v33  ;;  %v3665_v33 = vld [vmem:[%s4780_s2 + $0x280] sm:$0xff]   ;;  %v4491_v59 = vld [vmem:[%s4781_s0 + $0x28] ss:$16 sps:$4 sm:$0xff]  }
  0x9b   :  { %984 = vmatpush1.bf16.msra.mxu1 %v3659_v60  ;;  %v3714_v60 = vld [vmem:[%s4780_s2 + $0x600] sm:$0xff]  }
  0x9c   :  { %3455 = vmatpush3.bf16.msra.mxu0 %v3660_v61  ;;  %985 = vmatprep.subr.bf16.mxu1 %v3771_v1  ;;  %v3715_v61 = vld [vmem:[%s4780_s2 + $0x648] sm:$0xff]  }
  0x9d   :  { %3456 = vmatprep.subr.bf16.mxu0 %v3661_v62  ;;  %v3716_v62 = vld [vmem:[%s4780_s2 + $0x428] sm:$0xff]  }
  0x9f   :  { %986 = vmatpush1.bf16.msra.mxu1 %v3662_v63  ;;  %v3717_v63 = vld [vmem:[%s4780_s2 + $0x608] sm:$0xff]  }
  0xa0   :  { %3457 = vmatpush3.bf16.msra.mxu0 %v3663_v0  ;;  %987 = vmatprep.subr.bf16.mxu1 %v3771_v1  ;;  %v3718_v0 = vld [vmem:[%s4780_s2 + $0x650] sm:$0xff]  }
  0xa1   :  { %3458 = vmatprep.subr.bf16.mxu0 %v3664_v3  ;;  %v3719_v3 = vld [vmem:[%s4780_s2 + $0x430] sm:$0xff]  }
  0xa3   :  { %988 = vmatpush1.bf16.msra.mxu1 %v3665_v33  ;;  %v3720_v33 = vld [vmem:[%s4780_s2 + $0x610] sm:$0xff]  }
  0xa4   :  { %3459 = vmatpush3.bf16.msra.mxu0 %v3666_v4  ;;  %3420 = vmatprep.subr.bf16.mxu1 %v3667_v5  ;;  %v3721_v4 = vld [vmem:[%s4780_s2 + $0x550] sm:$0xff]   ;;  %v3722_v5 = vld [vmem:[%s4780_s2 + $0x658] sm:$0xff]  }
  0xa5   :  { %3460 = vmatprep.subr.bf16.mxu0 %v3668_v6  ;;  %v3723_v6 = vld [vmem:[%s4780_s2 + $0x510] sm:$0xff]  }
  0xa6   :  { %1000 = vmatmul.mubr.bf16.vlgmr.msra.gmra.mrb[24].mxu1 %v4041_v8  ;;  %v3676_v8 = vld [vmem:[%s4780_s2 + $0x370] sm:$0xff]  }
  0xa7   :  { %3421 = vmatpush3.bf16.msra.mxu1 %v3669_v7  ;;  %2873 = vmatprep.mubr.msk.bf16.mxu1 %vm277_vm0, %v4052_v11  ;;  %v3678_v11 = vld [vmem:[%s4780_s2 + $0x3b8] sm:$0xff]  }
  0xa8   :  { %3461 = vmatpush3.bf16.msra.mxu0 %v3670_v9  ;;  %3422 = vmatprep.subr.bf16.mxu1 %v3671_v10  ;;  %v3724_v7 = vld [vmem:[%s4780_s2 + $0x618] sm:$0xff]   ;;  %v3726_v10 = vld [vmem:[%s4780_s2 + $0x660] sm:$0xff]  }
  0xa9   :  { %3462 = vmatprep.subr.bf16.mxu0 %v3672_v12  ;;  %v3725_v9 = vld [vmem:[%s4780_s2 + $0x558] sm:$0xff]  }
  0xaa   :  { %v3727_v12 = vld [vmem:[%s4780_s2 + $0x518] sm:$0xff]  }
  0xab   :  { %3423 = vmatpush3.bf16.msra.mxu1 %v3673_v13 }
  0xac   :  { %3463 = vmatpush3.bf16.msra.mxu0 %v3674_v14  ;;  %3424 = vmatprep.subr.bf16.mxu1 %v3675_v15  ;;  %v3728_v14 = vld [vmem:[%s4780_s2 + $0x620] sm:$0xff]  }
  0xad   :  { %1924 = vmatprep.subr.bf16.mxu0 %v3771_v1  ;;  %v3729_v15 = vld [vmem:[%s4780_s2 + $0x560] sm:$0xff]  }
  0xae   :  { %1008 = vmatmul.mubr.bf16.gmra.mrb[28].mxu1 %v4079_v17  ;;  %v3681_v17 = vld [vmem:[%s4780_s2 + $0x3c0] sm:$0xff]  }
  0xaf   :  { %3425 = vmatpush3.bf16.msra.mxu1 %v3676_v8  ;;  %1908 = vmatmul.mubr.bf16.vlgmr.msra.gmra.mrb[32].mxu0 %v4322_v19 }
  0xb0   :  { %1925 = vmatpush1.bf16.msra.mxu0 %v3677_v16  ;;  %3426 = vmatprep.subr.bf16.mxu1 %v3678_v11 }
  0xb1   :  { %1926 = vmatprep.subr.bf16.mxu0 %v3771_v1  ;;  %1588 = vmatprep.mubr.bf16.mxu1 %v4335_v21 }
  0xb2   :  { %1915 = vmatprep.mubr.bf16.mxu0 %v3960_v51  ;;  %v3686_v51 = vld [vmem:[%s4780_s2 + $0x4d0] sm:$0xff]  }
  0xb3   :  { %3427 = vmatpush3.bf16.msra.mxu1 %v3679_v18 }
  0xb4   :  { %1927 = vmatpush1.bf16.msra.mxu0 %v3680_v20  ;;  %3428 = vmatprep.subr.bf16.mxu1 %v3681_v17 }
  0xb5   :  { %1928 = vmatprep.subr.bf16.mxu0 %v3771_v1 }
  0xb7   :  { %3429 = vmatpush3.bf16.msra.mxu1 %v3682_v22  ;;  %1916 = vmatmul.mubr.bf16.gmra.mrb[36].mxu0 %v4358_v26  ;;  %v3730_v22 = vld [vmem:[%s4780_s2 + $0x520] sm:$0xff]  }
  0xb8   :  { %1929 = vmatpush1.bf16.msra.mxu0 %v3683_v23  ;;  %3430 = vmatprep.subr.bf16.mxu1 %v3684_v24 }
  0xb9   :  { %1930 = vmatprep.subr.bf16.mxu0 %v3771_v1  ;;  %3121 = vmatprep.mubr.msk.bf16.mxu0 %vm277_vm0, %v4015_v2  ;;  %v3691_v2 = vld [vmem:[%s4780_s2 + $0x398] sm:$0xff]  }
  0xbb   :  { %3431 = vmatpush3.bf16.msra.mxu1 %v3685_v25 }
  0xbc   :  { %1931 = vmatpush1.bf16.msra.mxu0 %v3686_v51  ;;  %3432 = vmatprep.subr.bf16.mxu1 %v3687_v27  ;;  %v3731_v51 = vld [vmem:[%s4780_s2 + $0x668] sm:$0xff]  }
  0xbd   :  { %1932 = vmatprep.subr.bf16.mxu0 %v3771_v1  ;;  %v3732_v27 = vld [vmem:[%s4780_s2 + $0x568] sm:$0xff]  }
  0xbf   :  { %3433 = vmatpush3.bf16.msra.mxu1 %v3688_v28 }
  0xc0   :  { %1933 = vmatpush1.bf16.msra.mxu0 %v3689_v29  ;;  %3434 = vmatprep.subr.bf16.mxu1 %v3690_v30  ;;  %v3733_v30 = vld [vmem:[%s4780_s2 + $0x528] sm:$0xff]  }
  0xc1   :  { %1934 = vmatprep.subr.bf16.mxu0 %v3771_v1 }
  0xc3   :  { %3435 = vmatpush3.bf16.msra.mxu1 %v3691_v2  ;;  %v3734_v2 = vld [vmem:[%s4780_s2 + $0x670] sm:$0xff]  }
  0xc4   :  { %1935 = vmatpush1.bf16.msra.mxu0 %v3692_v31  ;;  %1605 = vmatprep.subr.bf16.mxu1 %v3771_v1  ;;  %v3735_v31 = vld [vmem:[%s4780_s2 + $0x570] sm:$0xff]  }
  0xc5   :  { %1936 = vmatprep.subr.bf16.mxu0 %v3771_v1 }
  0xc6   :  { %1589 = vmatmul.mubr.bf16.vlgmr.msra.gmra.mrb[32].mxu1 %v4322_v19 }
  0xc7   :  { %1606 = vmatpush1.bf16.msra.mxu1 %v3693_v32  ;;  %1596 = vmatprep.mubr.bf16.mxu1 %v4399_v36  ;;  %v3736_v32 = vld [vmem:[%s4780_s2 + $0x530] sm:$0xff]  }
  0xc8   :  { %1937 = vmatpush1.bf16.msra.mxu0 %v3694_v34  ;;  %1607 = vmatprep.subr.bf16.mxu1 %v3771_v1  ;;  %v3737_v34 = vld [vmem:[%s4780_s2 + $0x678] sm:$0xff]  }
  0xc9   :  { %1938 = vmatprep.subr.bf16.mxu0 %v3771_v1 }
  0xcb   :  { %1608 = vmatpush1.bf16.msra.mxu1 %v3695_v35  ;;  %v3738_v35 = vld [vmem:[%s4780_s2 + $0x578] sm:$0xff]  }
  0xcc   :  { %1939 = vmatpush1.bf16.msra.mxu0 %v3696_v37  ;;  %1609 = vmatprep.subr.bf16.mxu1 %v3771_v1  ;;  %v3740_v37 = vld [vmem:[%s4780_s2 + $0x680] sm:$0xff]  }
  0xcd   :  { %1940 = vmatprep.subr.bf16.mxu0 %v3771_v1 }
  0xce   :  { %1597 = vmatmul.mubr.bf16.gmra.mrb[36].mxu1 %v4358_v26 }
  0xcf   :  { %1610 = vmatpush1.bf16.msra.mxu1 %v3697_v38  ;;  %3038 = vmatprep.mubr.msk.bf16.mxu1 %vm277_vm0, %v4422_v41  ;;  %v3741_v38 = vld [vmem:[%s4780_s2 + $0x580] sm:$0xff]  }
  0xd0   :  { %1941 = vmatpush1.bf16.msra.mxu0 %v3698_v39  ;;  %1611 = vmatprep.subr.bf16.mxu1 %v3771_v1  ;;  %v3742_v39 = vld [vmem:[%s4780_s2 + $0x540] sm:$0xff]  }
  0xd1   :  { %1942 = vmatprep.subr.bf16.mxu0 %v3771_v1 }
  0xd3   :  { %1612 = vmatpush1.bf16.msra.mxu1 %v3699_v40  ;;  %v2615_v40 = vld [vmem:[%s4782_s1] sm:$0xff] }
  0xd4   :  { %1943 = vmatpush1.bf16.msra.mxu0 %v3700_v42  ;;  %1613 = vmatprep.subr.bf16.mxu1 %v3771_v1  ;;  %v3743_v42 = vld [vmem:[%s4780_s2 + $0x688] sm:$0xff]  }
  0xd5   :  { %1944 = vmatprep.subr.bf16.mxu0 %v3771_v1  ;;  %2621 = vperm.xlu0 %3533, %v2615_v40   ;;  %v3761_v40 = vld [vmem:[%s4780_s2 + $0x5d8] sm:$0xff]  }
  0xd7   :  { %1614 = vmatpush1.bf16.msra.mxu1 %v3701_v43  ;;  %v3744_v43 = vld [vmem:[%s4780_s2 + $0x588] sm:$0xff]  }
  0xd8   :  { %1945 = vmatpush1.bf16.msra.mxu0 %v3702_v44  ;;  %1615 = vmatprep.subr.bf16.mxu1 %v3771_v1 }
  0xd9   :  { %3504 = vmatprep.subr.bf16.mxu0 %v3703_v45 }
  0xdb   :  { %1957 = vmatmul.mubr.bf16.vlgmr.msra.gmra.mrb[40].mxu0 %v4455_v49  ;;  %1616 = vmatpush1.bf16.msra.mxu1 %v3704_v46  ;;  %v3745_v46 = vld [vmem:[%s4780_s2 + $0x548] sm:$0xff]  }
  0xdc   :  { %3505 = vmatpush3.bf16.msra.mxu0 %v3705_v47  ;;  %1617 = vmatprep.subr.bf16.mxu1 %v3771_v1 }
  0xdd   :  { %3506 = vmatprep.subr.bf16.mxu0 %v3706_v48  ;;  %3122 = vmatprep.mubr.msk.bf16.mxu0 %vm277_vm0, %v4471_v54 }
  0xdf   :  { %1618 = vmatpush1.bf16.msra.mxu1 %v3707_v50  ;;  %v3746_v50 = vld [vmem:[%s4780_s2 + $0x690] sm:$0xff]  }
  0xe0   :  { %3507 = vmatpush3.bf16.msra.mxu0 %v3708_v52  ;;  %1619 = vmatprep.subr.bf16.mxu1 %v3771_v1 }
  0xe1   :  { %3508 = vmatprep.subr.bf16.mxu0 %v3709_v53 }
  0xe3   :  { %1620 = vmatpush1.bf16.msra.mxu1 %v3710_v55  ;;  %1965 = vmatmul.mubr.bf16.gmra.mrb[44].mxu0 %v4491_v59 }
  0xe4   :  { %3509 = vmatpush3.bf16.msra.mxu0 %v3711_v56  ;;  %1621 = vmatprep.subr.bf16.mxu1 %v3771_v1 }
  0xe5   :  { %3510 = vmatprep.subr.bf16.mxu0 %v3712_v57  ;;  %2545 = vmatprep.mubr.bf16.mxu0 %v4335_v21 }
  0xe7   :  { %1622 = vmatpush1.bf16.msra.mxu1 %v3713_v58 }
  0xe8   :  { %3511 = vmatpush3.bf16.msra.mxu0 %v3714_v60  ;;  %1623 = vmatprep.subr.bf16.mxu1 %v3771_v1  ;;  %v3747_v60 = vld [vmem:[%s4780_s2 + $0x590] sm:$0xff]  }
  0xe9   :  { %3512 = vmatprep.subr.bf16.mxu0 %v3715_v61 }
  0xeb   :  { %1624 = vmatpush1.bf16.msra.mxu1 %v3716_v62  ;;  %v3748_v62 = vld [vmem:[%s4780_s2 + $0x698] sm:$0xff]  }
  0xec   :  { %3513 = vmatpush3.bf16.msra.mxu0 %v3717_v63  ;;  %1625 = vmatprep.subr.bf16.mxu1 %v3771_v1 }
  0xed   :  { %3514 = vmatprep.subr.bf16.mxu0 %v3718_v0  ;;  %v3749_v0 = vld [vmem:[%s4780_s2 + $0x598] sm:$0xff]  }
  0xef   :  { %1626 = vmatpush1.bf16.msra.mxu1 %v3719_v3  ;;  %v3750_v3 = vld [vmem:[%s4780_s2 + $0x6a0] sm:$0xff]  }
  0xf0   :  { %3515 = vmatpush3.bf16.msra.mxu0 %v3720_v33  ;;  %3476 = vmatprep.subr.bf16.mxu1 %v3721_v4 }
  0xf1   :  { %3516 = vmatprep.subr.bf16.mxu0 %v3722_v5 }
  0xf2   :  { %1638 = vmatmul.mubr.bf16.vlgmr.msra.gmra.mrb[40].mxu1 %v4455_v49 }
  0xf3   :  { %3477 = vmatpush3.bf16.msra.mxu1 %v3723_v6  ;;  %3039 = vmatprep.mubr.msk.bf16.mxu1 %vm277_vm0, %v4471_v54 }
  0xf4   :  { %3517 = vmatpush3.bf16.msra.mxu0 %v3724_v7  ;;  %3478 = vmatprep.subr.bf16.mxu1 %v3725_v9  ;;  %v2617_v9 = vld [vmem:[%s4782_s1 + $0x10] sm:$0xff] }
  0xf5   :  { %v3324_v13 = vpop.f32.mrb[0].mxu1  ;;  %3518 = vmatprep.subr.bf16.mxu0 %v3726_v10  ;;  %v3352_v16 = vpop.f32.mrb[0].mxu0  ;;  %2631 = vperm.xlu1 %3534, %v2617_v9  }
  0xf6   :  { %v3325_v8 = vpop.f32.mrb[1].mxu1  ;;  %v3353_v20 = vpop.f32.mrb[1].mxu0 }
  0xf7   :  { %v4549_v11 = vadd.f32 %v3325_v8, %v3324_v13  ;;  %v3327_v18 = vpop.f32.mrb[2].mxu1  ;;  %3479 = vmatpush3.bf16.msra.mxu1 %v3727_v12  ;;  %v4554_v23 = vadd.f32 %v3353_v20, %v3352_v16  ;;  %v3355_v24 = vpop.f32.mrb[2].mxu0  ;;  %v2616_v12 = vld [vmem:[%s4782_s1 + $0x8] sm:$0xff]  ;;  %v3756_v16 = vld [vmem:[%s4780_s2 + $0x6b8] sm:$0xff]  }
  0xf8   :  { %v3328_v17 = vpop.f32.mrb[3].mxu1  ;;  %3519 = vmatpush3.bf16.msra.mxu0 %v3728_v14  ;;  %3480 = vmatprep.subr.bf16.mxu1 %v3729_v15  ;;  %v3356_v28 = vpop.f32.mrb[3].mxu0  ;;  %v3753_v13 = vld [vmem:[%s4780_s2 + $0x5a8] sm:$0xff]   ;;  %v2618_v14 = vld [vmem:[%s4782_s1 + $0x18] sm:$0xff] }
  0xf9   :  { %v4556_v25 = vadd.f32 %v3328_v17, %v3327_v18  ;;  %2562 = vmatprep.subr.bf16.mxu0 %v3771_v1  ;;  %v4565_v29 = vadd.f32 %v3356_v28, %v3355_v24  ;;  %2626 = vperm.xlu0 %3533, %v2616_v12  }
  0xfa   :  { %1646 = vmatmul.mubr.bf16.gmra.mrb[44].mxu1 %v4491_v59  ;;  %2636 = vperm.xlu1 %3534, %v2618_v14  }
  0xfb   :  { %3481 = vmatpush3.bf16.msra.mxu1 %v3730_v22  ;;  %2546 = vmatmul.mubr.bf16.vlgmr.msra.gmra.mrb[48].mxu0 %v4322_v19 }
  0xfc   :  { %2563 = vmatpush1.bf16.msra.mxu0 %v3731_v51  ;;  %3482 = vmatprep.subr.bf16.mxu1 %v3732_v27 }
  0xfd   :  { %2564 = vmatprep.subr.bf16.mxu0 %v3771_v1  ;;  %2226 = vmatprep.mubr.bf16.mxu1 %v4335_v21  ;;  %v3739_v21 = vld [vmem:[%s4780_s2 + $0x538] sm:$0xff]   ;;  %v3358_v44 = vpop.f32.mrb[4].mxu0  ;;  %v3330_v52 = vpop.f32.mrb[4].mxu1 }
  0xfe   :  { %2553 = vmatprep.mubr.bf16.mxu0 %v4399_v36  ;;  %v3359_v45 = vpop.f32.mrb[5].mxu0  ;;  %v3331_v55 = vpop.f32.mrb[5].mxu1 }
  0xff   :  { %3483 = vmatpush3.bf16.msra.mxu1 %v3733_v30  ;;  %v4620_v47 = vadd.f32 %v3359_v45, %v3358_v44  ;;  %v3361_v48 = vpop.f32.mrb[6].mxu0  ;;  %v4628_v57 = vadd.f32 %v3331_v55, %v3330_v52  ;;  %v3333_v58 = vpop.f32.mrb[6].mxu1  ;;  %v3757_v30 = vld [vmem:[%s4780_s2 + $0x5b8] sm:$0xff]  }
 0x100   :  { %2565 = vmatpush1.bf16.msra.mxu0 %v3734_v2  ;;  %3484 = vmatprep.subr.bf16.mxu1 %v3735_v31  ;;  %v3362_v53 = vpop.f32.mrb[7].mxu0  ;;  %v3334_v61 = vpop.f32.mrb[7].mxu1 }
 0x101   :  { %2566 = vmatprep.subr.bf16.mxu0 %v3771_v1  ;;  %v4626_v56 = vadd.f32 %v3362_v53, %v3361_v48  ;;  %v4637_v63 = vadd.f32 %v3334_v61, %v3333_v58 }
 0x103   :  { %3485 = vmatpush3.bf16.msra.mxu1 %v3736_v32  ;;  %2554 = vmatmul.mubr.bf16.gmra.mrb[52].mxu0 %v4358_v26 }
 0x104   :  { %2567 = vmatpush1.bf16.msra.mxu0 %v3737_v34  ;;  %3486 = vmatprep.subr.bf16.mxu1 %v3738_v35 }
 0x105   :  { %2568 = vmatprep.subr.bf16.mxu0 %v3771_v1  ;;  %3287 = vmatprep.mubr.msk.bf16.mxu0 %vm277_vm0, %v4422_v41 }
 0x107   :  { %3487 = vmatpush3.bf16.msra.mxu1 %v3739_v21  ;;  %v3759_v21 = vld [vmem:[%s4780_s2 + $0x5c8] sm:$0xff]  }
 0x108   :  { %2569 = vmatpush1.bf16.msra.mxu0 %v3740_v37  ;;  %3488 = vmatprep.subr.bf16.mxu1 %v3741_v38 }
 0x109   :  { %2570 = vmatprep.subr.bf16.mxu0 %v3771_v1 }
 0x10b   :  { %3489 = vmatpush3.bf16.msra.mxu1 %v3742_v39  ;;  %v3760_v39 = vld [vmem:[%s4780_s2 + $0x5d0] sm:$0xff]  }
 0x10c   :  { %2571 = vmatpush1.bf16.msra.mxu0 %v3743_v42  ;;  %3490 = vmatprep.subr.bf16.mxu1 %v3744_v43  ;;  %v3762_v43 = vld [vmem:[%s4780_s2 + $0x5e0] sm:$0xff]  }
 0x10d   :  { %2572 = vmatprep.subr.bf16.mxu0 %v3771_v1 }
 0x10f   :  { %3491 = vmatpush3.bf16.msra.mxu1 %v3745_v46 }
 0x110   :  { %2573 = vmatpush1.bf16.msra.mxu0 %v3746_v50  ;;  %2243 = vmatprep.subr.bf16.mxu1 %v3771_v1 }
 0x111   :  { %2574 = vmatprep.subr.bf16.mxu0 %v3771_v1 }
 0x112   :  { %2227 = vmatmul.mubr.bf16.vlgmr.msra.gmra.mrb[48].mxu1 %v4322_v19  ;;  %v3751_v19 = vld [vmem:[%s4780_s2 + $0x5a0] sm:$0xff]  }
 0x113   :  { %2244 = vmatpush1.bf16.msra.mxu1 %v3747_v60  ;;  %2234 = vmatprep.mubr.bf16.mxu1 %v4399_v36  ;;  %v3752_v36 = vld [vmem:[%s4780_s2 + $0x6a8] sm:$0xff]  }
 0x114   :  { %2575 = vmatpush1.bf16.msra.mxu0 %v3748_v62  ;;  %2245 = vmatprep.subr.bf16.mxu1 %v3771_v1 }
 0x115   :  { %2576 = vmatprep.subr.bf16.mxu0 %v3771_v1  ;;  %v3380_v33 = vpop.f32.mrb[8].mxu0 }
 0x116   :  { %v3381_v4 = vpop.f32.mrb[9].mxu0 }
 0x117   :  { %2246 = vmatpush1.bf16.msra.mxu1 %v3749_v0  ;;  %v4657_v5 = vadd.f32 %v3381_v4, %v3380_v33  ;;  %v3383_v6 = vpop.f32.mrb[10].mxu0 }
 0x118   :  { %2577 = vmatpush1.bf16.msra.mxu0 %v3750_v3  ;;  %2247 = vmatprep.subr.bf16.mxu1 %v3771_v1  ;;  %v3384_v7 = vpop.f32.mrb[11].mxu0 }
 0x119   :  { %2578 = vmatprep.subr.bf16.mxu0 %v3771_v1  ;;  %v4663_v10 = vadd.f32 %v3384_v7, %v3383_v6 }
 0x11a   :  { %2235 = vmatmul.mubr.bf16.gmra.mrb[52].mxu1 %v4358_v26  ;;  %v3754_v26 = vld [vmem:[%s4780_s2 + $0x6b0] sm:$0xff]  }
 0x11b   :  { %2248 = vmatpush1.bf16.msra.mxu1 %v3751_v19  ;;  %3204 = vmatprep.mubr.msk.bf16.mxu1 %vm277_vm0, %v4422_v41  ;;  %v3755_v41 = vld [vmem:[%s4780_s2 + $0x5b0] sm:$0xff]  }
 0x11c   :  { %2579 = vmatpush1.bf16.msra.mxu0 %v3752_v36  ;;  %2249 = vmatprep.subr.bf16.mxu1 %v3771_v1 }
 0x11d   :  { %2580 = vmatprep.subr.bf16.mxu0 %v3771_v1  ;;  %v3386_v15 = vpop.f32.mrb[12].mxu0 }
 0x11e   :  { %v3387_v8 = vpop.f32.mrb[13].mxu0 }
 0x11f   :  { %2250 = vmatpush1.bf16.msra.mxu1 %v3753_v13  ;;  %v4689_v18 = vadd.f32 %v3387_v8, %v3386_v15  ;;  %v3389_v20 = vpop.f32.mrb[14].mxu0 }
 0x120   :  { %2581 = vmatpush1.bf16.msra.mxu0 %v3754_v26  ;;  %2251 = vmatprep.subr.bf16.mxu1 %v3771_v1  ;;  %v3390_v22 = vpop.f32.mrb[15].mxu0 }
 0x121   :  { %v367_v17 = vpop.f32.mrb[8].mxu1  ;;  %2582 = vmatprep.subr.bf16.mxu0 %v3771_v1  ;;  %v4695_v27 = vadd.f32 %v3390_v22, %v3389_v20 }
 0x122   :  { %v4693_v24 = vadd.f32 %v4549_v11, %v367_v17  ;;  %v369_v51 = vpop.f32.mrb[9].mxu1  ;;  %v3758_v11 = vld [vmem:[%s4780_s2 + $0x5c0] sm:$0xff]  }
 0x123   :  { %v370_v28 = vpop.f32.mrb[10].mxu1  ;;  %2252 = vmatpush1.bf16.msra.mxu1 %v3755_v41 }
 0x124   :  { %v4701_v2 = vadd.f32 %v4556_v25, %v370_v28  ;;  %2583 = vmatpush1.bf16.msra.mxu0 %v3756_v16  ;;  %v372_v31 = vpop.f32.mrb[11].mxu1  ;;  %2253 = vmatprep.subr.bf16.mxu1 %v3771_v1 }
 0x127   :  { %2595 = vmatmul.mubr.bf16.vlgmr.msra.gmra.mrb[56].mxu0 %v4455_v49  ;;  %2254 = vmatpush1.bf16.msra.mxu1 %v3757_v30 }
 0x128   :  { %2255 = vmatprep.subr.bf16.mxu1 %v3771_v1  ;;  %3288 = vmatprep.mubr.msk.bf16.mxu0 %vm277_vm0, %v4471_v54 }
 0x129   :  { %v375_v32 = vpop.f32.mrb[12].mxu1 }
 0x12a   :  { %v4712_v25 = vadd.f32 %v4628_v57, %v375_v32  ;;  %v377_v34 = vpop.f32.mrb[13].mxu1 }
 0x12b   :  { %v378_v35 = vpop.f32.mrb[14].mxu1  ;;  %2256 = vmatpush1.bf16.msra.mxu1 %v3758_v11 }
 0x12c   :  { %v4718_v37 = vadd.f32 %v4637_v63, %v378_v35  ;;  %2257 = vmatprep.subr.bf16.mxu1 %v3771_v1  ;;  %v380_v38 = vpop.f32.mrb[15].mxu1 }
 0x12f   :  { %2258 = vmatpush1.bf16.msra.mxu1 %v3759_v21  ;;  %2603 = vmatmul.mubr.bf16.gmra.mrb[60].mxu0 %v4491_v59 }
 0x130   :  { %2259 = vmatprep.subr.bf16.mxu1 %v3771_v1 }
 0x133   :  { %2260 = vmatpush1.bf16.msra.mxu1 %v3760_v39 }
 0x134   :  { %2261 = vmatprep.subr.bf16.mxu1 %v3771_v1 }
 0x136   :  { %v3408_v42 = vpop.f32.mrb[16].mxu0 }
 0x137   :  { %2262 = vmatpush1.bf16.msra.mxu1 %v3761_v40  ;;  %v3409_v44 = vpop.f32.mrb[17].mxu0 }
 0x138   :  { %2263 = vmatprep.subr.bf16.mxu1 %v3771_v1  ;;  %v3410_v45 = vadd.f32 %v3409_v44, %v3408_v42  ;;  %v3411_v46 = vpop.f32.mrb[18].mxu0 }
 0x139   :  { %v3412_v48 = vpop.f32.mrb[19].mxu0 }
 0x13a   :  { %v3413_v50 = vadd.f32 %v3412_v48, %v3411_v46 }
 0x13b   :  { %2264 = vmatpush1.bf16.msra.mxu1 %v3762_v43 }
 0x13e   :  { %2276 = vmatmul.mubr.bf16.vlgmr.msra.gmra.mrb[56].mxu1 %v4455_v49  ;;  %v3414_v52 = vpop.f32.mrb[20].mxu0 }
 0x13f   :  { %3205 = vmatprep.mubr.msk.bf16.mxu1 %vm277_vm0, %v4471_v54  ;;  %v3415_v53 = vpop.f32.mrb[21].mxu0 }
 0x140   :  { %v3416_v55 = vadd.f32 %v3415_v53, %v3414_v52  ;;  %v3417_v57 = vpop.f32.mrb[22].mxu0 }
 0x141   :  { %v3418_v58 = vpop.f32.mrb[23].mxu0 }
 0x142   :  { %v3419_v60 = vadd.f32 %v3418_v58, %v3417_v57 }
 0x146   :  { %2284 = vmatmul.mubr.bf16.gmra.mrb[60].mxu1 %v4491_v59 }
 0x14d   :  { %v682_v61 = vpop.f32.mrb[16].mxu1 }
 0x14e   :  { %v683_v1 = vadd.f32 %v4554_v23, %v682_v61  ;;  %v684_v62 = vpop.f32.mrb[17].mxu1 }
 0x14f   :  { %v685_v63 = vpop.f32.mrb[18].mxu1 }
 0x150   :  { %v697_v0 = vmax.f32 %v4693_v24, %v683_v1  ;;  %v686_v49 = vadd.f32 %v4565_v29, %v685_v63  ;;  %v687_v3 = vpop.f32.mrb[19].mxu1 }
 0x152   :  { %v698_v33 = vmax.f32 %v4701_v2, %v686_v49 }
 0x155   :  { %v690_v54 = vpop.f32.mrb[20].mxu1 }
 0x156   :  { %v691_v19 = vadd.f32 %v4620_v47, %v690_v54  ;;  %v692_v4 = vpop.f32.mrb[21].mxu1 }
 0x157   :  { %v693_v36 = vpop.f32.mrb[22].mxu1 }
 0x158   :  { %v699_v6 = vmax.f32 %v4712_v25, %v691_v19  ;;  %v694_v59 = vadd.f32 %v4626_v56, %v693_v36  ;;  %v695_v7 = vpop.f32.mrb[23].mxu1 }
 0x15a   :  { %v700_v23 = vmax.f32 %v4718_v37, %v694_v59 }
 0x162   :  { %v1320_v9 = vpop.f32.mrb[24].mxu0 }
 0x163   :  { %v4746_v12 = vadd.f32 %v3410_v45, %v1320_v9  ;;  %v1322_v13 = vpop.f32.mrb[25].mxu0 }
 0x164   :  { %v1323_v29 = vpop.f32.mrb[26].mxu0 }
 0x165   :  { %v4748_v26 = vadd.f32 %v3413_v50, %v1323_v29  ;;  %v1325_v14 = vpop.f32.mrb[27].mxu0 }
 0x16a   :  { %v1328_v15 = vpop.f32.mrb[28].mxu0 }
 0x16b   :  { %v4750_v41 = vadd.f32 %v3416_v55, %v1328_v15  ;;  %v1330_v47 = vpop.f32.mrb[29].mxu0 }
 0x16c   :  { %v1331_v8 = vpop.f32.mrb[30].mxu0 }
 0x16d   :  { %v4752_v16 = vadd.f32 %v3419_v60, %v1331_v8  ;;  %v1333_v20 = vpop.f32.mrb[31].mxu0 }
 0x179   :  { %v1001_v56 = vpop.f32.mrb[24].mxu1 }
 0x17a   :  { %v1002_v17 = vadd.f32 %v4657_v5, %v1001_v56  ;;  %v1003_v22 = vpop.f32.mrb[25].mxu1 }
 0x17b   :  { %v1004_v24 = vpop.f32.mrb[26].mxu1 }
 0x17c   :  { %v1016_v51 = vmax.f32 %v697_v0, %v1002_v17  ;;  %v1005_v28 = vadd.f32 %v4663_v10, %v1004_v24  ;;  %v1006_v30 = vpop.f32.mrb[27].mxu1 }
 0x17e   :  { %v1017_v2 = vmax.f32 %v698_v33, %v1005_v28  ;;  %v1335_v31 = vmax.f32 %v1016_v51, %v4746_v12 }
 0x180   :  { %v1336_v11 = vmax.f32 %v1017_v2, %v4748_v26 }
 0x181   :  { %v1009_v32 = vpop.f32.mrb[28].mxu1 }
 0x182   :  { %v1010_v25 = vadd.f32 %v4689_v18, %v1009_v32  ;;  %v1011_v34 = vpop.f32.mrb[29].mxu1  ;;  %v3464_v35 = vpop.f32.mrb[32].mxu0 }
 0x183   :  { %v1012_v21 = vpop.f32.mrb[30].mxu1  ;;  %v3465_v37 = vpop.f32.mrb[33].mxu0 }
 0x184   :  { %v1018_v38 = vmax.f32 %v699_v6, %v1010_v25  ;;  %v1013_v5 = vadd.f32 %v4695_v27, %v1012_v21  ;;  %v1014_v39 = vpop.f32.mrb[31].mxu1  ;;  %v3466_v40 = vadd.f32 %v3465_v37, %v3464_v35  ;;  %v3467_v42 = vpop.f32.mrb[34].mxu0 }
 0x185   :  { %v3468_v10 = vpop.f32.mrb[35].mxu0 }
 0x186   :  { %v1019_v43 = vmax.f32 %v700_v23, %v1013_v5  ;;  %v3469_v44 = vadd.f32 %v3468_v10, %v3467_v42  ;;  %v1337_v45 = vmax.f32 %v1018_v38, %v4750_v41 }
 0x188   :  { %v1338_v46 = vmax.f32 %v1019_v43, %v4752_v16 }
 0x18a   :  { %v3470_v48 = vpop.f32.mrb[36].mxu0 }
 0x18b   :  { %v3471_v50 = vpop.f32.mrb[37].mxu0 }
 0x18c   :  { %v3472_v18 = vadd.f32 %v3471_v50, %v3470_v48  ;;  %v3473_v52 = vpop.f32.mrb[38].mxu0 }
 0x18d   :  { %v3474_v53 = vpop.f32.mrb[39].mxu0 }
 0x18e   :  { %v3475_v55 = vadd.f32 %v3474_v53, %v3473_v52 }
 0x199   :  { %v3436_v57 = vpop.f32.mrb[32].mxu1 }
 0x19a   :  { %v3437_v58 = vpop.f32.mrb[33].mxu1 }
 0x19b   :  { %v3438_v60 = vadd.f32 %v3437_v58, %v3436_v57  ;;  %v3439_v27 = vpop.f32.mrb[34].mxu1 }
 0x19c   :  { %v3440_v61 = vpop.f32.mrb[35].mxu1 }
 0x19d   :  { %v3441_v1 = vadd.f32 %v3440_v61, %v3439_v27 }
 0x1a1   :  { %v3442_v62 = vpop.f32.mrb[36].mxu1 }
 0x1a2   :  { %v3443_v63 = vpop.f32.mrb[37].mxu1 }
 0x1a3   :  { %v3444_v0 = vadd.f32 %v3443_v63, %v3442_v62  ;;  %v3445_v49 = vpop.f32.mrb[38].mxu1 }
 0x1a4   :  { %v3446_v3 = vpop.f32.mrb[39].mxu1 }
 0x1a5   :  { %v3447_v33 = vadd.f32 %v3446_v3, %v3445_v49 }
 0x1ae   :  { %v1958_v54 = vpop.f32.mrb[40].mxu0 }
 0x1af   :  { %v4762_v19 = vadd.f32 %v3466_v40, %v1958_v54  ;;  %v1960_v4 = vpop.f32.mrb[41].mxu0 }
 0x1b0   :  { %v1961_v36 = vpop.f32.mrb[42].mxu0 }
 0x1b1   :  { %v4764_v6 = vadd.f32 %v3469_v44, %v1961_v36  ;;  %v1963_v59 = vpop.f32.mrb[43].mxu0 }
 0x1b2   :  { %v2622_v59 = vpop.permute.xlu0 %2621 }
 0x1b6   :  { %v1966_v7 = vpop.f32.mrb[44].mxu0 }
 0x1b7   :  { %v4766_v23 = vadd.f32 %v3472_v18, %v1966_v7  ;;  %v1968_v9 = vpop.f32.mrb[45].mxu0 }
 0x1b8   :  { %v1969_v12 = vpop.f32.mrb[46].mxu0 }
 0x1b9   :  { %v4768_v13 = vadd.f32 %v3475_v55, %v1969_v12  ;;  %v1971_v29 = vpop.f32.mrb[47].mxu0 }
 0x1c5   :  { %v1639_v26 = vpop.f32.mrb[40].mxu1 }
 0x1c6   :  { %v1640_v14 = vadd.f32 %v3438_v60, %v1639_v26  ;;  %v1641_v15 = vpop.f32.mrb[41].mxu1 }
 0x1c7   :  { %v1642_v41 = vpop.f32.mrb[42].mxu1  ;;  %v2627_v15 = vpop.permute.xlu0 %2626 }
 0x1c8   :  { %v1654_v47 = vmax.f32 %v1335_v31, %v1640_v14  ;;  %v1643_v8 = vadd.f32 %v3441_v1, %v1642_v41  ;;  %v1644_v16 = vpop.f32.mrb[43].mxu1 }
 0x1ca   :  { %v1655_v20 = vmax.f32 %v1336_v11, %v1643_v8  ;;  %v1973_v56 = vmax.f32 %v1654_v47, %v4762_v19 }
 0x1cc   :  { %v1974_v17 = vmax.f32 %v1655_v20, %v4764_v6 }
 0x1cd   :  { %v1647_v22 = vpop.f32.mrb[44].mxu1 }
 0x1ce   :  { %v1648_v24 = vadd.f32 %v3444_v0, %v1647_v22  ;;  %v1649_v51 = vpop.f32.mrb[45].mxu1  ;;  %v3520_v28 = vpop.f32.mrb[48].mxu0 }
 0x1cf   :  { %v1650_v30 = vpop.f32.mrb[46].mxu1  ;;  %v3521_v2 = vpop.f32.mrb[49].mxu0 }
 0x1d0   :  { %v1656_v32 = vmax.f32 %v1337_v45, %v1648_v24  ;;  %v1651_v25 = vadd.f32 %v3447_v33, %v1650_v30  ;;  %v1652_v34 = vpop.f32.mrb[47].mxu1  ;;  %v3522_v35 = vadd.f32 %v3521_v2, %v3520_v28  ;;  %v3523_v21 = vpop.f32.mrb[50].mxu0 }
 0x1d1   :  { %v3524_v37 = vpop.f32.mrb[51].mxu0  ;;  %v2632_v24 = vpop.permute.xlu1 %2631 }
 0x1d2   :  { %v1657_v31 = vmax.f32 %v1338_v46, %v1651_v25  ;;  %v3525_v38 = vadd.f32 %v3524_v37, %v3523_v21  ;;  %v1975_v11 = vmax.f32 %v1656_v32, %v4766_v23 }
 0x1d4   :  { %v1976_v5 = vmax.f32 %v1657_v31, %v4768_v13 }
 0x1d5   :  { %v2637_v37 = vpop.permute.xlu1 %2636 }
 0x1d6   :  { %v3526_v39 = vpop.f32.mrb[52].mxu0 }
 0x1d7   :  { %v3527_v40 = vpop.f32.mrb[53].mxu0 }
 0x1d8   :  { %v3528_v42 = vadd.f32 %v3527_v40, %v3526_v39  ;;  %v3529_v10 = vpop.f32.mrb[54].mxu0 }
 0x1d9   :  { %v3530_v43 = vpop.f32.mrb[55].mxu0 }
 0x1da   :  { %v3531_v44 = vadd.f32 %v3530_v43, %v3529_v10 }
 0x1e5   :  { %v3492_v48 = vpop.f32.mrb[48].mxu1 }
 0x1e6   :  { %v3493_v50 = vpop.f32.mrb[49].mxu1 }
 0x1e7   :  { %v3494_v45 = vadd.f32 %v3493_v50, %v3492_v48  ;;  %v3495_v18 = vpop.f32.mrb[50].mxu1 }
 0x1e8   :  { %v3496_v52 = vpop.f32.mrb[51].mxu1 }
 0x1e9   :  { %v3497_v53 = vadd.f32 %v3496_v52, %v3495_v18 }
 0x1ed   :  { %v3498_v55 = vpop.f32.mrb[52].mxu1 }
 0x1ee   :  { %v3499_v57 = vpop.f32.mrb[53].mxu1 }
 0x1ef   :  { %v3500_v46 = vadd.f32 %v3499_v57, %v3498_v55  ;;  %v3501_v58 = vpop.f32.mrb[54].mxu1 }
 0x1f0   :  { %v3502_v60 = vpop.f32.mrb[55].mxu1 }
 0x1f1   :  { %v3503_v27 = vadd.f32 %v3502_v60, %v3501_v58 }
 0x1fa   :  { %v2596_v61 = vpop.f32.mrb[56].mxu0 }
 0x1fb   :  { %v2597_v1 = vadd.f32 %v3522_v35, %v2596_v61  ;;  %v2598_v62 = vpop.f32.mrb[57].mxu0 }
 0x1fc   :  { %v2599_v63 = vpop.f32.mrb[58].mxu0 }
 0x1fd   :  { %v2600_v0 = vadd.f32 %v3525_v38, %v2599_v63  ;;  %v2601_v49 = vpop.f32.mrb[59].mxu0 }
 0x202   :  { %v2604_v3 = vpop.f32.mrb[60].mxu0 }
 0x203   :  { %v2605_v33 = vadd.f32 %v3528_v42, %v2604_v3  ;;  %v2606_v54 = vpop.f32.mrb[61].mxu0 }
 0x204   :  { %v2607_v19 = vpop.f32.mrb[62].mxu0 }
 0x205   :  { %v2608_v4 = vadd.f32 %v3531_v44, %v2607_v19  ;;  %v2609_v36 = vpop.f32.mrb[63].mxu0 }
 0x211   :  { %v2277_v6 = vpop.f32.mrb[56].mxu1 }
 0x212   :  { %v2278_v7 = vadd.f32 %v3494_v45, %v2277_v6  ;;  %v2279_v23 = vpop.f32.mrb[57].mxu1 }
 0x213   :  { %v2280_v9 = vpop.f32.mrb[58].mxu1 }
 0x214   :  { %v2292_v12 = vmax.f32 %v1973_v56, %v2278_v7  ;;  %v2281_v13 = vadd.f32 %v3497_v53, %v2280_v9  ;;  %v2282_v29 = vpop.f32.mrb[59].mxu1 }
 0x216   :  { %v2293_v26 = vmax.f32 %v1974_v17, %v2281_v13  ;;  %v2611_v14 = vmax.f32 %v2292_v12, %v2597_v1 }
 0x218   :  { %v2639_v41 = vadd.f32 %v2622_v59, %v2611_v14  ;;  %v2612_v47 = vmax.f32 %v2293_v26, %v2600_v0 }
 0x219   :  { %v2285_v8 = vpop.f32.mrb[60].mxu1 }
 0x21a   :  { %v2640_v16 = vadd.f32 %v2627_v15, %v2612_v47  ;;  %v2286_v20 = vadd.f32 %v3500_v46, %v2285_v8  ;;  %v2287_v22 = vpop.f32.mrb[61].mxu1  ;;  %v2643_v28 = vmax.f32 %v2639_v41, 0.0 }
 0x21b   :  { %v2288_v51 = vpop.f32.mrb[62].mxu1 }
 0x21c   :  { %v2644_v30 = vmax.f32 %v2640_v16, 0.0  ;;  %v2294_v2 = vmax.f32 %v1975_v11, %v2286_v20  ;;  %v2289_v32 = vadd.f32 %v3503_v27, %v2288_v51  ;;  %v2290_v25 = vpop.f32.mrb[63].mxu1 }
 0x21e   :  { %v3300_v34 = vpack.c.bf16 %v2644_v30, %v2643_v28  ;;  %v2613_v56 = vmax.f32 %v2294_v2, %v2605_v33  ;;  %v2295_v35 = vmax.f32 %v1976_v5, %v2289_v32 }
 0x220   :  { %3301 = vst [vmem:[%s4783_s3] sm:$0xff] %v3300_v34   ;;  %v2614_v17 = vmax.f32 %v2295_v35, %v2608_v4  ;;  %v2641_v21 = vadd.f32 %v2632_v24, %v2613_v56 }
 0x222   :  { %v2642_v31 = vadd.f32 %v2637_v37, %v2614_v17  ;;  %v2645_v38 = vmax.f32 %v2641_v21, 0.0 }
 0x224   :  { %v2646_v39 = vmax.f32 %v2642_v31, 0.0 }
 0x226   :  { %v3305_v40 = vpack.c.bf16 %v2646_v39, %v2645_v38 }
 0x228   :  { %3307 = vst [vmem:[%s4783_s3 + $0x8] sm:$0xff] %v3305_v40  }

</bundles_post_ra>
